<compile_context>
chip_gen: v7x
topology: tpu7x:2x2x1
jax: 0.10.0
libtpu: 0.0.40
codegen_flags: <defaults>
</compile_context>

<pallas_src>
import functools

import jax
import jax.numpy as jnp
from jax.experimental import pallas as pl
from jax.experimental.pallas import tpu as pltpu

N_LAYERS = 3
N_HEADS = 5


def lstm_net_kernel(x_ref,
                    wih0, whh0, b0,
                    wih1, whh1, b1,
                    wih2, whh2, b2,
                    w_out, b_out,
                    out_ref,
                    proj_ref, hseq_ref, h_ref, c_ref,
                    *, chunk_len, btile, hidden_p, mxu_dtype):
    """One (batch_tile, time_chunk) grid step.

    x_ref:    (chunk_len*btile, input_size) time-major rows t*btile + b_local.
    proj_ref: (chunk_len*btile, 4*Hp) scratch — hoisted input projection for the chunk.
    hseq_ref: (chunk_len*btile, Hp)  scratch — previous layer's h over the chunk.
    h_ref/c_ref: (N_LAYERS, btile, Hp) scratch — recurrent state carried across chunks.
    """
    Hp = hidden_p
    B = btile
    chunk = pl.program_id(1)

    # (Re)initialize carried state at the start of each batch tile's sequence.
    @pl.when(chunk == 0)
    def _():
        h_ref[...] = jnp.zeros_like(h_ref)
        c_ref[...] = jnp.zeros_like(c_ref)

    # Gate-lane mask, hoisted: lanes [2Hp, 3Hp) are the cell candidate (tanh lanes).
    lane = jax.lax.broadcasted_iota(jnp.int32, (B, 4 * Hp), 1)
    g_mask = (lane >= 2 * Hp) & (lane < 3 * Hp)

    layer_params = ((wih0, whh0, b0), (wih1, whh1, b1), (wih2, whh2, b2))
    for layer, (wih_r, whh_r, b_r) in enumerate(layer_params):
        # Hoist weight/bias loads out of the recurrent loop.
        whh = whh_r[...]
        bias = b_r[...]
        seq_in = x_ref[...] if layer == 0 else hseq_ref[...]

        # Hoisted input projection for the whole chunk: one MXU pass into VMEM scratch.
        # (MXU operands optionally bf16; accumulate + everything downstream stays f32.)
        proj_ref[...] = (jnp.dot(seq_in.astype(mxu_dtype), wih_r[...],
                                 preferred_element_type=jnp.float32) + bias)

        write_hseq = layer < N_LAYERS - 1

        def step(t, carry):
            h, c = carry
            row = pl.multiple_of(t * B, 8)
            gates = proj_ref[pl.ds(row, B), :] + jnp.dot(
                h, whh, preferred_element_type=jnp.float32)        # (B, 4Hp)
            # One EUP tanh for all lanes; sigmoid(x) = 0.5*(tanh(x/2)+1) fix-up on VPU.
            y = jnp.tanh(jnp.where(g_mask, gates, 0.5 * gates))
            act = jnp.where(g_mask, y, 0.5 * y + 0.5)
            i = act[:, 0 * Hp:1 * Hp]
            f = act[:, 1 * Hp:2 * Hp]
            g = act[:, 2 * Hp:3 * Hp]
            o = act[:, 3 * Hp:4 * Hp]
            c_new = f * c + i * g
            h_new = o * jnp.tanh(c_new)
            if write_hseq:
                hseq_ref[pl.ds(row, B), :] = h_new   # lane-dense (B, Hp) store
            return (h_new, c_new)

        h_fin, c_fin = jax.lax.fori_loop(
            0, chunk_len, step, (h_ref[layer], c_ref[layer]),
            unroll=min(chunk_len, 8))
        h_ref[layer] = h_fin
        c_ref[layer] = c_fin
        # TODO(synk): nn.LSTM inter-layer dropout is train-mode only; eval identity here.

    # 5 heads fused as (Hp, 5): only the final chunk's last-layer h is the real output.
    @pl.when(chunk == pl.num_programs(1) - 1)
    def _():
        out_ref[...] = (jnp.dot(h_ref[N_LAYERS - 1], w_out[...],
                                preferred_element_type=jnp.float32)
                        + b_out[...]).astype(out_ref.dtype)


def _pad_gates(w, H, Hp):
    """Pad each of the 4 gate blocks along the last axis from H to Hp lanes (zeros)."""
    if Hp == H:
        return w
    blocks = [w[..., k * H:(k + 1) * H] for k in range(4)]
    pad = ((0, 0),) * (w.ndim - 1) + ((0, Hp - H),)
    return jnp.concatenate([jnp.pad(b, pad) for b in blocks], axis=-1)


def _pad_params(params, H, Hp, mxu_dtype):
    """Zero-pad hidden dim to Hp (lane-dense); padded gate lanes stay exactly 0/0.5 so
    padded h/c lanes remain 0 and do not perturb the real lanes."""
    (wih0, whh0, b0, wih1, whh1, b1, wih2, whh2, b2, w_out, b_out) = params

    def pad_rows(w):
        return jnp.pad(w, ((0, Hp - H), (0, 0))) if Hp != H else w

    out = []
    for layer, (wih, whh, b) in enumerate(
            ((wih0, whh0, b0), (wih1, whh1, b1), (wih2, whh2, b2))):
        wih_p = _pad_gates(wih, H, Hp)
        if layer > 0:
            wih_p = pad_rows(wih_p)
        out += [wih_p.astype(mxu_dtype),               # MXU-side operand dtype
                pad_rows(_pad_gates(whh, H, Hp)),      # recurrent weight stays f32
                _pad_gates(b, H, Hp)]
    out.append(pad_rows(w_out))
    out.append(b_out)
    return tuple(out)


def lstm_net_forward(x, params, *, mxu_dtype=jnp.float32, max_chunk_len=64):
    """x: (batch, seq_len, input_size) float32 (batch_first, like the PyTorch module)."""
    batch, seq_len, input_size = x.shape
    H = params[1].shape[0]                      # whh0: (H, 4H)
    Hp = ((H + 127) // 128) * 128               # lane-dense hidden dim

    is_bf16 = mxu_dtype == jnp.bfloat16
    sub = 16 if is_bf16 else 8                  # dense sublane packing for MXU operands
    b_pad = ((batch + sub - 1) // sub) * sub

    # v7x: split the padded batch into >=2 independent tiles on a "parallel" grid axis
    # (second TensorCore); degenerates to a single tile at small batch (v5e/v6e: 1 TC).
    if b_pad % (2 * sub) == 0 and b_pad >= 2 * sub:
        n_btiles, btile = 2, b_pad // 2
    else:
        n_btiles, btile = 1, b_pad

    # Largest divisor of seq_len <= max_chunk_len keeps the in-kernel time loop static.
    chunk_len = 1
    for d in range(1, min(seq_len, max_chunk_len) + 1):
        if seq_len % d == 0:
            chunk_len = d
    n_chunks = seq_len // chunk_len
    chunk_rows = chunk_len * btile

    # Layout: (n_btiles, seq_len*btile, input) with rows t*btile + b_local per tile.
    x_p = jnp.pad(x.astype(jnp.float32), ((0, b_pad - batch), (0, 0), (0, 0)))
    x_tiles = (x_p.reshape(n_btiles, btile, seq_len, input_size)
               .transpose(0, 2, 1, 3)
               .reshape(n_btiles, seq_len * btile, input_size))

    pp = _pad_params(params, H, Hp, mxu_dtype)

    kernel = functools.partial(lstm_net_kernel, chunk_len=chunk_len, btile=btile,
                               hidden_p=Hp, mxu_dtype=mxu_dtype)

    x_spec = pl.BlockSpec((None, chunk_rows, input_size), lambda bt, c: (bt, c, 0))
    param_specs = [pl.BlockSpec(p.shape, lambda bt, c: (0, 0)) for p in pp]
    out_spec = pl.BlockSpec((btile, N_HEADS), lambda bt, c: (bt, 0))

    scratch_shapes = [
        pltpu.VMEM((chunk_rows, 4 * Hp), jnp.float32),   # proj chunk
        pltpu.VMEM((chunk_rows, Hp), jnp.float32),       # prev-layer h chunk
        pltpu.VMEM((N_LAYERS, btile, Hp), jnp.float32),  # h state per layer
        pltpu.VMEM((N_LAYERS, btile, Hp), jnp.float32),  # c state per layer
    ]

    # Explicit VMEM budget derived from the chunk sizing (v7x: 64 MiB physical,
    # 32 MiB scoped default); clamp to a generation-safe 48 MiB ceiling.
    needed = (4 * (chunk_rows * 4 * Hp + chunk_rows * Hp
                   + 2 * N_LAYERS * btile * Hp + btile * N_HEADS)
              + 2 * 4 * chunk_rows * input_size
              + sum(int(p.size) * p.dtype.itemsize for p in pp))
    vmem_limit = int(min(48 * 2**20, max(32 * 2**20, 2 * needed)))

    out = pl.pallas_call(
        kernel,
        out_shape=jax.ShapeDtypeStruct((b_pad, N_HEADS), jnp.float32),
        grid_spec=pltpu.PrefetchScalarGridSpec(
            num_scalar_prefetch=0,
            grid=(n_btiles, n_chunks),
            in_specs=[x_spec] + param_specs,
            out_specs=out_spec,
            scratch_shapes=scratch_shapes),
        compiler_params=pltpu.CompilerParams(
            dimension_semantics=("parallel", "arbitrary"),
            vmem_limit_bytes=vmem_limit),
    )(x_tiles, *pp)
    return out[:batch]


def init_params(key, input_size, hidden_dim):
    """Deterministic init mimicking PyTorch's U(-1/sqrt(H), 1/sqrt(H)) for LSTM/Linear."""
    H = hidden_dim
    stdv = 1.0 / jnp.sqrt(jnp.float32(H))
    params = []
    keys = jax.random.split(key, 4 * N_LAYERS + 2 * N_HEADS)
    ki = 0
    for layer in range(N_LAYERS):
        in_dim = input_size if layer == 0 else H
        w_ih = jax.random.uniform(keys[ki], (in_dim, 4 * H), jnp.float32, -stdv, stdv); ki += 1
        w_hh = jax.random.uniform(keys[ki], (H, 4 * H), jnp.float32, -stdv, stdv); ki += 1
        b_ih = jax.random.uniform(keys[ki], (4 * H,), jnp.float32, -stdv, stdv); ki += 1
        b_hh = jax.random.uniform(keys[ki], (4 * H,), jnp.float32, -stdv, stdv); ki += 1
        params += [w_ih, w_hh, (b_ih + b_hh).reshape(1, 4 * H)]
    # 5 heads: Linear(H, 1) each -> stacked as (H, 5) weight and (1, 5) bias.
    head_ws, head_bs = [], []
    lin_stdv = 1.0 / jnp.sqrt(jnp.float32(H))
    for _ in range(N_HEADS):
        head_ws.append(jax.random.uniform(keys[ki], (H, 1), jnp.float32, -lin_stdv, lin_stdv)); ki += 1
        head_bs.append(jax.random.uniform(keys[ki], (1,), jnp.float32, -lin_stdv, lin_stdv)); ki += 1
    params.append(jnp.concatenate(head_ws, axis=1))                      # (H, 5)
    params.append(jnp.concatenate(head_bs, axis=0).reshape(1, N_HEADS))  # (1, 5)
    return tuple(params)


def reference_forward(x, params):
    """Pure-JAX reference of the same math, for a correctness check."""
    batch, seq_len, _ = x.shape
    H = params[1].shape[0]
    (wih0, whh0, b0, wih1, whh1, b1, wih2, whh2, b2, w_out, b_out) = params
    layer_params = ((wih0, whh0, b0), (wih1, whh1, b1), (wih2, whh2, b2))
    inp_seq = x
    h_l = None
    for (wih, whh, b) in layer_params:
        h_l = jnp.zeros((batch, H), jnp.float32)
        c_l = jnp.zeros((batch, H), jnp.float32)
        outs = []
        for t in range(seq_len):
            gates = inp_seq[:, t] @ wih + h_l @ whh + b
            i = jax.nn.sigmoid(gates[:, 0 * H:1 * H])
            f = jax.nn.sigmoid(gates[:, 1 * H:2 * H])
            g = jnp.tanh(gates[:, 2 * H:3 * H])
            o = jax.nn.sigmoid(gates[:, 3 * H:4 * H])
            c_l = f * c_l + i * g
            h_l = o * jnp.tanh(c_l)
            outs.append(h_l)
        inp_seq = jnp.stack(outs, axis=1)
    return h_l @ w_out + b_out


if __name__ == "__main__":
    input_size, hidden_dim = 16, 32
    seq_len, batch = 8, 2

    key = jax.random.PRNGKey(0)
    kx, kp, kx2 = jax.random.split(key, 3)
    x = jax.random.normal(kx, (batch, seq_len, input_size), jnp.float32)
    params = init_params(kp, input_size, hidden_dim)

    # 1) f32 path at the module's small shapes.
    out = jax.block_until_ready(lstm_net_forward(x, params))
    assert out.shape == (batch, N_HEADS) and out.dtype == jnp.float32
    ref = reference_forward(x, params)
    assert jnp.allclose(out, ref, atol=2e-5, rtol=2e-5), (out, ref)

    # 2) exercise sequence chunking (3 chunks) + the 2-way "parallel" batch-tile axis.
    x2 = jax.random.normal(kx2, (16, 12, input_size), jnp.float32)
    out2 = jax.block_until_ready(lstm_net_forward(x2, params, max_chunk_len=4))
    ref2 = reference_forward(x2, params)
    assert jnp.allclose(out2, ref2, atol=2e-5, rtol=2e-5), (out2, ref2)

    # 3) bf16 MXU operands for the hoisted input projection (recurrence/gates stay f32).
    out_bf16 = jax.block_until_ready(
        lstm_net_forward(x, params, mxu_dtype=jnp.bfloat16))
    assert jnp.allclose(out_bf16, ref, atol=3e-2, rtol=3e-2), (out_bf16, ref)

    print("KERNEL_OK")
</pallas_src>

<mosaic_0001>
module attributes {stable_mosaic.version = 11 : i64} {
  func.func @lstm_net_kernel(%arg0: i32, %arg1: i32, %arg2: memref<1x64x16xf32, #tpu.memory_space<vmem>>, %arg3: memref<16x512xf32, #tpu.memory_space<vmem>>, %arg4: memref<128x512xf32, #tpu.memory_space<vmem>>, %arg5: memref<1x512xf32, #tpu.memory_space<vmem>>, %arg6: memref<128x512xf32, #tpu.memory_space<vmem>>, %arg7: memref<128x512xf32, #tpu.memory_space<vmem>>, %arg8: memref<1x512xf32, #tpu.memory_space<vmem>>, %arg9: memref<128x512xf32, #tpu.memory_space<vmem>>, %arg10: memref<128x512xf32, #tpu.memory_space<vmem>>, %arg11: memref<1x512xf32, #tpu.memory_space<vmem>>, %arg12: memref<128x5xf32, #tpu.memory_space<vmem>>, %arg13: memref<1x5xf32, #tpu.memory_space<vmem>>, %arg14: memref<8x5xf32, #tpu.memory_space<vmem>>, %arg15: memref<64x512xf32, #tpu.memory_space<vmem>>, %arg16: memref<64x128xf32, #tpu.memory_space<vmem>>, %arg17: memref<3x8x128xf32, #tpu.memory_space<vmem>>, %arg18: memref<3x8x128xf32, #tpu.memory_space<vmem>>) attributes {dimension_semantics = [#tpu.dimension_semantics<parallel>, #tpu.dimension_semantics<arbitrary>], iteration_bounds = array<i64: 1, 1>, scalar_prefetch = 0 : i64, scratch_operands = 4 : i64, tpu.core_type = #tpu.core_type<tc>, window_params = [{transform_indices = @transform_0, window_bounds = array<i64: 1, 64, 16>}, {pipeline_mode = #tpu.pipeline_mode<synchronous>, transform_indices = @transform_1, window_bounds = array<i64: 16, 512>}, {pipeline_mode = #tpu.pipeline_mode<synchronous>, transform_indices = @transform_2, window_bounds = array<i64: 128, 512>}, {pipeline_mode = #tpu.pipeline_mode<synchronous>, transform_indices = @transform_3, window_bounds = array<i64: 1, 512>}, {pipeline_mode = #tpu.pipeline_mode<synchronous>, transform_indices = @transform_4, window_bounds = array<i64: 128, 512>}, {pipeline_mode = #tpu.pipeline_mode<synchronous>, transform_indices = @transform_5, window_bounds = array<i64: 128, 512>}, {pipeline_mode = #tpu.pipeline_mode<synchronous>, transform_indices = @transform_6, window_bounds = array<i64: 1, 512>}, {pipeline_mode = #tpu.pipeline_mode<synchronous>, transform_indices = @transform_7, window_bounds = array<i64: 128, 512>}, {pipeline_mode = #tpu.pipeline_mode<synchronous>, transform_indices = @transform_8, window_bounds = array<i64: 128, 512>}, {pipeline_mode = #tpu.pipeline_mode<synchronous>, transform_indices = @transform_9, window_bounds = array<i64: 1, 512>}, {pipeline_mode = #tpu.pipeline_mode<synchronous>, transform_indices = @transform_10, window_bounds = array<i64: 128, 5>}, {pipeline_mode = #tpu.pipeline_mode<synchronous>, transform_indices = @transform_11, window_bounds = array<i64: 1, 5>}, {transform_indices = @transform_12, window_bounds = array<i64: 8, 5>}]} {
    %c0_i32 = arith.constant 0 : i32
    %0 = arith.cmpi eq, %arg1, %c0_i32 : i32
    %1 = arith.extui %0 : i1 to i32
    %c0_i32_0 = arith.constant 0 : i32
    %2 = arith.cmpi ne, %1, %c0_i32_0 : i32
    scf.if %2 {
      %cst_248 = arith.constant 0.000000e+00 : f32
      %675 = vector.broadcast %cst_248 : f32 to vector<3x8x128xf32>
      %c0_249 = arith.constant 0 : index
      %c0_250 = arith.constant 0 : index
      %c0_251 = arith.constant 0 : index
      %676 = vector.load %arg17[%c0_249, %c0_250, %c0_251] : memref<3x8x128xf32, #tpu.memory_space<vmem>>, vector<3x8x128xf32>
      tpu.vector_store %arg17[%c0_249, %c0_250, %c0_251], %675 {strides = array<i32>} : memref<3x8x128xf32, #tpu.memory_space<vmem>>, vector<3x8x128xf32>,
      %cst_252 = arith.constant 0.000000e+00 : f32
      %677 = vector.broadcast %cst_252 : f32 to vector<3x8x128xf32>
      %c0_253 = arith.constant 0 : index
      %c0_254 = arith.constant 0 : index
      %c0_255 = arith.constant 0 : index
      %678 = vector.load %arg18[%c0_253, %c0_254, %c0_255] : memref<3x8x128xf32, #tpu.memory_space<vmem>>, vector<3x8x128xf32>
      tpu.vector_store %arg18[%c0_253, %c0_254, %c0_255], %677 {strides = array<i32>} : memref<3x8x128xf32, #tpu.memory_space<vmem>>, vector<3x8x128xf32>,
    } else {
    }
    %3 = tpu.iota {dimensions = array<i32: 1>} : vector<8x512xi32>
    %c256_i32 = arith.constant 256 : i32
    %4 = vector.broadcast %c256_i32 : i32 to vector<8x512xi32>
    %5 = arith.cmpi sge, %3, %4 : vector<8x512xi32>
    %c384_i32 = arith.constant 384 : i32
    %6 = vector.broadcast %c384_i32 : i32 to vector<8x512xi32>
    %7 = arith.cmpi slt, %3, %6 : vector<8x512xi32>
    %8 = arith.andi %5, %7 : vector<8x512xi1>
    %c0 = arith.constant 0 : index
    %c0_1 = arith.constant 0 : index
    %9 = vector.load %arg4[%c0, %c0_1] : memref<128x512xf32, #tpu.memory_space<vmem>>, vector<128x512xf32>
    %c0_2 = arith.constant 0 : index
    %c0_3 = arith.constant 0 : index
    %10 = vector.load %arg5[%c0_2, %c0_3] : memref<1x512xf32, #tpu.memory_space<vmem>>, vector<1x512xf32>
    %c0_4 = arith.constant 0 : index
    %c0_5 = arith.constant 0 : index
    %c0_6 = arith.constant 0 : index
    %11 = vector.load %arg2[%c0_4, %c0_5, %c0_6] : memref<1x64x16xf32, #tpu.memory_space<vmem>>, vector<1x64x16xf32>
    %12 = vector.shape_cast %11 : vector<1x64x16xf32> to vector<64x16xf32>
    %c0_7 = arith.constant 0 : index
    %c0_8 = arith.constant 0 : index
    %13 = vector.load %arg3[%c0_7, %c0_8] : memref<16x512xf32, #tpu.memory_space<vmem>>, vector<16x512xf32>
    %cst = arith.constant dense<0.000000e+00> : vector<64x512xf32>
    %14 = tpu.matmul %12, %13, %cst {dimension_numbers = #tpu.dot_dimension_numbers<[1], [0], [0], [1], [0, 0, 1, 1], [], []>} : vector<64x16xf32>, vector<16x512xf32>, vector<64x512xf32> -> vector<64x512xf32>
    %15 = vector.broadcast %10 : vector<1x512xf32> to vector<64x512xf32>
    %16 = arith.addf %14, %15 : vector<64x512xf32>
    %c0_9 = arith.constant 0 : index
    %c0_10 = arith.constant 0 : index
    %17 = vector.load %arg15[%c0_9, %c0_10] : memref<64x512xf32, #tpu.memory_space<vmem>>, vector<64x512xf32>
    tpu.vector_store %arg15[%c0_9, %c0_10], %16 {strides = array<i32>} : memref<64x512xf32, #tpu.memory_space<vmem>>, vector<64x512xf32>,
    %c0_11 = arith.constant 0 : index
    %c0_12 = arith.constant 0 : index
    %c0_13 = arith.constant 0 : index
    %18 = vector.load %arg17[%c0_11, %c0_12, %c0_13] : memref<3x8x128xf32, #tpu.memory_space<vmem>>, vector<1x8x128xf32>
    %19 = vector.shape_cast %18 : vector<1x8x128xf32> to vector<8x128xf32>
    %c0_14 = arith.constant 0 : index
    %c0_15 = arith.constant 0 : index
    %c0_16 = arith.constant 0 : index
    %20 = vector.load %arg18[%c0_14, %c0_15, %c0_16] : memref<3x8x128xf32, #tpu.memory_space<vmem>>, vector<1x8x128xf32>
    %21 = vector.shape_cast %20 : vector<1x8x128xf32> to vector<8x128xf32>
    %c0_i32_17 = arith.constant 0 : i32
    %c8_i32 = arith.constant 8 : i32
    %22 = arith.muli %c0_i32_17, %c8_i32 : i32
    %23 = tpu.assume_multiple %22, 8 : i32
    %24 = arith.index_cast %23 : i32 to index
    %c0_18 = arith.constant 0 : index
    %25 = vector.load %arg15[%24, %c0_18] : memref<64x512xf32, #tpu.memory_space<vmem>>, vector<8x512xf32>
    %cst_19 = arith.constant dense<0.000000e+00> : vector<8x512xf32>
    %26 = tpu.matmul %19, %9, %cst_19 {dimension_numbers = #tpu.dot_dimension_numbers<[1], [0], [0], [1], [0, 0, 1, 1], [], []>} : vector<8x128xf32>, vector<128x512xf32>, vector<8x512xf32> -> vector<8x512xf32>
    %27 = arith.addf %25, %26 : vector<8x512xf32>
    %cst_20 = arith.constant 5.000000e-01 : f32
    %28 = vector.broadcast %cst_20 : f32 to vector<8x512xf32>
    %29 = arith.mulf %28, %27 : vector<8x512xf32>
    %30 = arith.select %8, %27, %29 : vector<8x512xi1>, vector<8x512xf32>
    %31 = math.tanh %30 : vector<8x512xf32>
    %cst_21 = arith.constant 5.000000e-01 : f32
    %32 = vector.broadcast %cst_21 : f32 to vector<8x512xf32>
    %33 = arith.mulf %32, %31 : vector<8x512xf32>
    %cst_22 = arith.constant 5.000000e-01 : f32
    %34 = vector.broadcast %cst_22 : f32 to vector<8x512xf32>
    %35 = arith.addf %33, %34 : vector<8x512xf32>
    %36 = arith.select %8, %31, %35 : vector<8x512xi1>, vector<8x512xf32>
    %37 = vector.extract_strided_slice %36 {offsets = [0, 0], sizes = [8, 128], strides = [1, 1]} : vector<8x512xf32> to vector<8x128xf32>
    %38 = vector.extract_strided_slice %36 {offsets = [0, 128], sizes = [8, 128], strides = [1, 1]} : vector<8x512xf32> to vector<8x128xf32>
    %39 = vector.extract_strided_slice %36 {offsets = [0, 256], sizes = [8, 128], strides = [1, 1]} : vector<8x512xf32> to vector<8x128xf32>
    %40 = vector.extract_strided_slice %36 {offsets = [0, 384], sizes = [8, 128], strides = [1, 1]} : vector<8x512xf32> to vector<8x128xf32>
    %41 = arith.mulf %38, %21 : vector<8x128xf32>
    %42 = arith.mulf %37, %39 : vector<8x128xf32>
    %43 = arith.addf %41, %42 : vector<8x128xf32>
    %44 = math.tanh %43 : vector<8x128xf32>
    %45 = arith.mulf %40, %44 : vector<8x128xf32>
    %46 = arith.index_cast %23 : i32 to index
    %c0_23 = arith.constant 0 : index
    %47 = vector.load %arg16[%46, %c0_23] : memref<64x128xf32, #tpu.memory_space<vmem>>, vector<8x128xf32>
    tpu.vector_store %arg16[%46, %c0_23], %45 {strides = array<i32>} : memref<64x128xf32, #tpu.memory_space<vmem>>, vector<8x128xf32>,
    %c1_i32 = arith.constant 1 : i32
    %c8_i32_24 = arith.constant 8 : i32
    %48 = arith.muli %c1_i32, %c8_i32_24 : i32
    %49 = tpu.assume_multiple %48, 8 : i32
    %50 = arith.index_cast %49 : i32 to index
    %c0_25 = arith.constant 0 : index
    %51 = vector.load %arg15[%50, %c0_25] : memref<64x512xf32, #tpu.memory_space<vmem>>, vector<8x512xf32>
    %cst_26 = arith.constant dense<0.000000e+00> : vector<8x512xf32>
    %52 = tpu.matmul %45, %9, %cst_26 {dimension_numbers = #tpu.dot_dimension_numbers<[1], [0], [0], [1], [0, 0, 1, 1], [], []>} : vector<8x128xf32>, vector<128x512xf32>, vector<8x512xf32> -> vector<8x512xf32>
    %53 = arith.addf %51, %52 : vector<8x512xf32>
    %cst_27 = arith.constant 5.000000e-01 : f32
    %54 = vector.broadcast %cst_27 : f32 to vector<8x512xf32>
    %55 = arith.mulf %54, %53 : vector<8x512xf32>
    %56 = arith.select %8, %53, %55 : vector<8x512xi1>, vector<8x512xf32>
    %57 = math.tanh %56 : vector<8x512xf32>
    %cst_28 = arith.constant 5.000000e-01 : f32
    %58 = vector.broadcast %cst_28 : f32 to vector<8x512xf32>
    %59 = arith.mulf %58, %57 : vector<8x512xf32>
    %cst_29 = arith.constant 5.000000e-01 : f32
    %60 = vector.broadcast %cst_29 : f32 to vector<8x512xf32>
    %61 = arith.addf %59, %60 : vector<8x512xf32>
    %62 = arith.select %8, %57, %61 : vector<8x512xi1>, vector<8x512xf32>
    %63 = vector.extract_strided_slice %62 {offsets = [0, 0], sizes = [8, 128], strides = [1, 1]} : vector<8x512xf32> to vector<8x128xf32>
    %64 = vector.extract_strided_slice %62 {offsets = [0, 128], sizes = [8, 128], strides = [1, 1]} : vector<8x512xf32> to vector<8x128xf32>
    %65 = vector.extract_strided_slice %62 {offsets = [0, 256], sizes = [8, 128], strides = [1, 1]} : vector<8x512xf32> to vector<8x128xf32>
    %66 = vector.extract_strided_slice %62 {offsets = [0, 384], sizes = [8, 128], strides = [1, 1]} : vector<8x512xf32> to vector<8x128xf32>
    %67 = arith.mulf %64, %43 : vector<8x128xf32>
    %68 = arith.mulf %63, %65 : vector<8x128xf32>
    %69 = arith.addf %67, %68 : vector<8x128xf32>
    %70 = math.tanh %69 : vector<8x128xf32>
    %71 = arith.mulf %66, %70 : vector<8x128xf32>
    %72 = arith.index_cast %49 : i32 to index
    %c0_30 = arith.constant 0 : index
    %73 = vector.load %arg16[%72, %c0_30] : memref<64x128xf32, #tpu.memory_space<vmem>>, vector<8x128xf32>
    tpu.vector_store %arg16[%72, %c0_30], %71 {strides = array<i32>} : memref<64x128xf32, #tpu.memory_space<vmem>>, vector<8x128xf32>,
    %c2_i32 = arith.constant 2 : i32
    %c8_i32_31 = arith.constant 8 : i32
    %74 = arith.muli %c2_i32, %c8_i32_31 : i32
    %75 = tpu.assume_multiple %74, 8 : i32
    %76 = arith.index_cast %75 : i32 to index
    %c0_32 = arith.constant 0 : index
    %77 = vector.load %arg15[%76, %c0_32] : memref<64x512xf32, #tpu.memory_space<vmem>>, vector<8x512xf32>
    %cst_33 = arith.constant dense<0.000000e+00> : vector<8x512xf32>
    %78 = tpu.matmul %71, %9, %cst_33 {dimension_numbers = #tpu.dot_dimension_numbers<[1], [0], [0], [1], [0, 0, 1, 1], [], []>} : vector<8x128xf32>, vector<128x512xf32>, vector<8x512xf32> -> vector<8x512xf32>
    %79 = arith.addf %77, %78 : vector<8x512xf32>
    %cst_34 = arith.constant 5.000000e-01 : f32
    %80 = vector.broadcast %cst_34 : f32 to vector<8x512xf32>
    %81 = arith.mulf %80, %79 : vector<8x512xf32>
    %82 = arith.select %8, %79, %81 : vector<8x512xi1>, vector<8x512xf32>
    %83 = math.tanh %82 : vector<8x512xf32>
    %cst_35 = arith.constant 5.000000e-01 : f32
    %84 = vector.broadcast %cst_35 : f32 to vector<8x512xf32>
    %85 = arith.mulf %84, %83 : vector<8x512xf32>
    %cst_36 = arith.constant 5.000000e-01 : f32
    %86 = vector.broadcast %cst_36 : f32 to vector<8x512xf32>
    %87 = arith.addf %85, %86 : vector<8x512xf32>
    %88 = arith.select %8, %83, %87 : vector<8x512xi1>, vector<8x512xf32>
    %89 = vector.extract_strided_slice %88 {offsets = [0, 0], sizes = [8, 128], strides = [1, 1]} : vector<8x512xf32> to vector<8x128xf32>
    %90 = vector.extract_strided_slice %88 {offsets = [0, 128], sizes = [8, 128], strides = [1, 1]} : vector<8x512xf32> to vector<8x128xf32>
    %91 = vector.extract_strided_slice %88 {offsets = [0, 256], sizes = [8, 128], strides = [1, 1]} : vector<8x512xf32> to vector<8x128xf32>
    %92 = vector.extract_strided_slice %88 {offsets = [0, 384], sizes = [8, 128], strides = [1, 1]} : vector<8x512xf32> to vector<8x128xf32>
    %93 = arith.mulf %90, %69 : vector<8x128xf32>
    %94 = arith.mulf %89, %91 : vector<8x128xf32>
    %95 = arith.addf %93, %94 : vector<8x128xf32>
    %96 = math.tanh %95 : vector<8x128xf32>
    %97 = arith.mulf %92, %96 : vector<8x128xf32>
    %98 = arith.index_cast %75 : i32 to index
    %c0_37 = arith.constant 0 : index
    %99 = vector.load %arg16[%98, %c0_37] : memref<64x128xf32, #tpu.memory_space<vmem>>, vector<8x128xf32>
    tpu.vector_store %arg16[%98, %c0_37], %97 {strides = array<i32>} : memref<64x128xf32, #tpu.memory_space<vmem>>, vector<8x128xf32>,
    %c3_i32 = arith.constant 3 : i32
    %c8_i32_38 = arith.constant 8 : i32
    %100 = arith.muli %c3_i32, %c8_i32_38 : i32
    %101 = tpu.assume_multiple %100, 8 : i32
    %102 = arith.index_cast %101 : i32 to index
    %c0_39 = arith.constant 0 : index
    %103 = vector.load %arg15[%102, %c0_39] : memref<64x512xf32, #tpu.memory_space<vmem>>, vector<8x512xf32>
    %cst_40 = arith.constant dense<0.000000e+00> : vector<8x512xf32>
    %104 = tpu.matmul %97, %9, %cst_40 {dimension_numbers = #tpu.dot_dimension_numbers<[1], [0], [0], [1], [0, 0, 1, 1], [], []>} : vector<8x128xf32>, vector<128x512xf32>, vector<8x512xf32> -> vector<8x512xf32>
    %105 = arith.addf %103, %104 : vector<8x512xf32>
    %cst_41 = arith.constant 5.000000e-01 : f32
    %106 = vector.broadcast %cst_41 : f32 to vector<8x512xf32>
    %107 = arith.mulf %106, %105 : vector<8x512xf32>
    %108 = arith.select %8, %105, %107 : vector<8x512xi1>, vector<8x512xf32>
    %109 = math.tanh %108 : vector<8x512xf32>
    %cst_42 = arith.constant 5.000000e-01 : f32
    %110 = vector.broadcast %cst_42 : f32 to vector<8x512xf32>
    %111 = arith.mulf %110, %109 : vector<8x512xf32>
    %cst_43 = arith.constant 5.000000e-01 : f32
    %112 = vector.broadcast %cst_43 : f32 to vector<8x512xf32>
    %113 = arith.addf %111, %112 : vector<8x512xf32>
    %114 = arith.select %8, %109, %113 : vector<8x512xi1>, vector<8x512xf32>
    %115 = vector.extract_strided_slice %114 {offsets = [0, 0], sizes = [8, 128], strides = [1, 1]} : vector<8x512xf32> to vector<8x128xf32>
    %116 = vector.extract_strided_slice %114 {offsets = [0, 128], sizes = [8, 128], strides = [1, 1]} : vector<8x512xf32> to vector<8x128xf32>
    %117 = vector.extract_strided_slice %114 {offsets = [0, 256], sizes = [8, 128], strides = [1, 1]} : vector<8x512xf32> to vector<8x128xf32>
    %118 = vector.extract_strided_slice %114 {offsets = [0, 384], sizes = [8, 128], strides = [1, 1]} : vector<8x512xf32> to vector<8x128xf32>
    %119 = arith.mulf %116, %95 : vector<8x128xf32>
    %120 = arith.mulf %115, %117 : vector<8x128xf32>
    %121 = arith.addf %119, %120 : vector<8x128xf32>
    %122 = math.tanh %121 : vector<8x128xf32>
    %123 = arith.mulf %118, %122 : vector<8x128xf32>
    %124 = arith.index_cast %101 : i32 to index
    %c0_44 = arith.constant 0 : index
    %125 = vector.load %arg16[%124, %c0_44] : memref<64x128xf32, #tpu.memory_space<vmem>>, vector<8x128xf32>
    tpu.vector_store %arg16[%124, %c0_44], %123 {strides = array<i32>} : memref<64x128xf32, #tpu.memory_space<vmem>>, vector<8x128xf32>,
    %c4_i32 = arith.constant 4 : i32
    %c8_i32_45 = arith.constant 8 : i32
    %126 = arith.muli %c4_i32, %c8_i32_45 : i32
    %127 = tpu.assume_multiple %126, 8 : i32
    %128 = arith.index_cast %127 : i32 to index
    %c0_46 = arith.constant 0 : index
    %129 = vector.load %arg15[%128, %c0_46] : memref<64x512xf32, #tpu.memory_space<vmem>>, vector<8x512xf32>
    %cst_47 = arith.constant dense<0.000000e+00> : vector<8x512xf32>
    %130 = tpu.matmul %123, %9, %cst_47 {dimension_numbers = #tpu.dot_dimension_numbers<[1], [0], [0], [1], [0, 0, 1, 1], [], []>} : vector<8x128xf32>, vector<128x512xf32>, vector<8x512xf32> -> vector<8x512xf32>
    %131 = arith.addf %129, %130 : vector<8x512xf32>
    %cst_48 = arith.constant 5.000000e-01 : f32
    %132 = vector.broadcast %cst_48 : f32 to vector<8x512xf32>
    %133 = arith.mulf %132, %131 : vector<8x512xf32>
    %134 = arith.select %8, %131, %133 : vector<8x512xi1>, vector<8x512xf32>
    %135 = math.tanh %134 : vector<8x512xf32>
    %cst_49 = arith.constant 5.000000e-01 : f32
    %136 = vector.broadcast %cst_49 : f32 to vector<8x512xf32>
    %137 = arith.mulf %136, %135 : vector<8x512xf32>
    %cst_50 = arith.constant 5.000000e-01 : f32
    %138 = vector.broadcast %cst_50 : f32 to vector<8x512xf32>
    %139 = arith.addf %137, %138 : vector<8x512xf32>
    %140 = arith.select %8, %135, %139 : vector<8x512xi1>, vector<8x512xf32>
    %141 = vector.extract_strided_slice %140 {offsets = [0, 0], sizes = [8, 128], strides = [1, 1]} : vector<8x512xf32> to vector<8x128xf32>
    %142 = vector.extract_strided_slice %140 {offsets = [0, 128], sizes = [8, 128], strides = [1, 1]} : vector<8x512xf32> to vector<8x128xf32>
    %143 = vector.extract_strided_slice %140 {offsets = [0, 256], sizes = [8, 128], strides = [1, 1]} : vector<8x512xf32> to vector<8x128xf32>
    %144 = vector.extract_strided_slice %140 {offsets = [0, 384], sizes = [8, 128], strides = [1, 1]} : vector<8x512xf32> to vector<8x128xf32>
    %145 = arith.mulf %142, %121 : vector<8x128xf32>
    %146 = arith.mulf %141, %143 : vector<8x128xf32>
    %147 = arith.addf %145, %146 : vector<8x128xf32>
    %148 = math.tanh %147 : vector<8x128xf32>
    %149 = arith.mulf %144, %148 : vector<8x128xf32>
    %150 = arith.index_cast %127 : i32 to index
    %c0_51 = arith.constant 0 : index
    %151 = vector.load %arg16[%150, %c0_51] : memref<64x128xf32, #tpu.memory_space<vmem>>, vector<8x128xf32>
    tpu.vector_store %arg16[%150, %c0_51], %149 {strides = array<i32>} : memref<64x128xf32, #tpu.memory_space<vmem>>, vector<8x128xf32>,
    %c5_i32 = arith.constant 5 : i32
    %c8_i32_52 = arith.constant 8 : i32
    %152 = arith.muli %c5_i32, %c8_i32_52 : i32
    %153 = tpu.assume_multiple %152, 8 : i32
    %154 = arith.index_cast %153 : i32 to index
    %c0_53 = arith.constant 0 : index
    %155 = vector.load %arg15[%154, %c0_53] : memref<64x512xf32, #tpu.memory_space<vmem>>, vector<8x512xf32>
    %cst_54 = arith.constant dense<0.000000e+00> : vector<8x512xf32>
    %156 = tpu.matmul %149, %9, %cst_54 {dimension_numbers = #tpu.dot_dimension_numbers<[1], [0], [0], [1], [0, 0, 1, 1], [], []>} : vector<8x128xf32>, vector<128x512xf32>, vector<8x512xf32> -> vector<8x512xf32>
    %157 = arith.addf %155, %156 : vector<8x512xf32>
    %cst_55 = arith.constant 5.000000e-01 : f32
    %158 = vector.broadcast %cst_55 : f32 to vector<8x512xf32>
    %159 = arith.mulf %158, %157 : vector<8x512xf32>
    %160 = arith.select %8, %157, %159 : vector<8x512xi1>, vector<8x512xf32>
    %161 = math.tanh %160 : vector<8x512xf32>
    %cst_56 = arith.constant 5.000000e-01 : f32
    %162 = vector.broadcast %cst_56 : f32 to vector<8x512xf32>
    %163 = arith.mulf %162, %161 : vector<8x512xf32>
    %cst_57 = arith.constant 5.000000e-01 : f32
    %164 = vector.broadcast %cst_57 : f32 to vector<8x512xf32>
    %165 = arith.addf %163, %164 : vector<8x512xf32>
    %166 = arith.select %8, %161, %165 : vector<8x512xi1>, vector<8x512xf32>
    %167 = vector.extract_strided_slice %166 {offsets = [0, 0], sizes = [8, 128], strides = [1, 1]} : vector<8x512xf32> to vector<8x128xf32>
    %168 = vector.extract_strided_slice %166 {offsets = [0, 128], sizes = [8, 128], strides = [1, 1]} : vector<8x512xf32> to vector<8x128xf32>
    %169 = vector.extract_strided_slice %166 {offsets = [0, 256], sizes = [8, 128], strides = [1, 1]} : vector<8x512xf32> to vector<8x128xf32>
    %170 = vector.extract_strided_slice %166 {offsets = [0, 384], sizes = [8, 128], strides = [1, 1]} : vector<8x512xf32> to vector<8x128xf32>
    %171 = arith.mulf %168, %147 : vector<8x128xf32>
    %172 = arith.mulf %167, %169 : vector<8x128xf32>
    %173 = arith.addf %171, %172 : vector<8x128xf32>
    %174 = math.tanh %173 : vector<8x128xf32>
    %175 = arith.mulf %170, %174 : vector<8x128xf32>
    %176 = arith.index_cast %153 : i32 to index
    %c0_58 = arith.constant 0 : index
    %177 = vector.load %arg16[%176, %c0_58] : memref<64x128xf32, #tpu.memory_space<vmem>>, vector<8x128xf32>
    tpu.vector_store %arg16[%176, %c0_58], %175 {strides = array<i32>} : memref<64x128xf32, #tpu.memory_space<vmem>>, vector<8x128xf32>,
    %c6_i32 = arith.constant 6 : i32
    %c8_i32_59 = arith.constant 8 : i32
    %178 = arith.muli %c6_i32, %c8_i32_59 : i32
    %179 = tpu.assume_multiple %178, 8 : i32
    %180 = arith.index_cast %179 : i32 to index
    %c0_60 = arith.constant 0 : index
    %181 = vector.load %arg15[%180, %c0_60] : memref<64x512xf32, #tpu.memory_space<vmem>>, vector<8x512xf32>
    %cst_61 = arith.constant dense<0.000000e+00> : vector<8x512xf32>
    %182 = tpu.matmul %175, %9, %cst_61 {dimension_numbers = #tpu.dot_dimension_numbers<[1], [0], [0], [1], [0, 0, 1, 1], [], []>} : vector<8x128xf32>, vector<128x512xf32>, vector<8x512xf32> -> vector<8x512xf32>
    %183 = arith.addf %181, %182 : vector<8x512xf32>
    %cst_62 = arith.constant 5.000000e-01 : f32
    %184 = vector.broadcast %cst_62 : f32 to vector<8x512xf32>
    %185 = arith.mulf %184, %183 : vector<8x512xf32>
    %186 = arith.select %8, %183, %185 : vector<8x512xi1>, vector<8x512xf32>
    %187 = math.tanh %186 : vector<8x512xf32>
    %cst_63 = arith.constant 5.000000e-01 : f32
    %188 = vector.broadcast %cst_63 : f32 to vector<8x512xf32>
    %189 = arith.mulf %188, %187 : vector<8x512xf32>
    %cst_64 = arith.constant 5.000000e-01 : f32
    %190 = vector.broadcast %cst_64 : f32 to vector<8x512xf32>
    %191 = arith.addf %189, %190 : vector<8x512xf32>
    %192 = arith.select %8, %187, %191 : vector<8x512xi1>, vector<8x512xf32>
    %193 = vector.extract_strided_slice %192 {offsets = [0, 0], sizes = [8, 128], strides = [1, 1]} : vector<8x512xf32> to vector<8x128xf32>
    %194 = vector.extract_strided_slice %192 {offsets = [0, 128], sizes = [8, 128], strides = [1, 1]} : vector<8x512xf32> to vector<8x128xf32>
    %195 = vector.extract_strided_slice %192 {offsets = [0, 256], sizes = [8, 128], strides = [1, 1]} : vector<8x512xf32> to vector<8x128xf32>
    %196 = vector.extract_strided_slice %192 {offsets = [0, 384], sizes = [8, 128], strides = [1, 1]} : vector<8x512xf32> to vector<8x128xf32>
    %197 = arith.mulf %194, %173 : vector<8x128xf32>
    %198 = arith.mulf %193, %195 : vector<8x128xf32>
    %199 = arith.addf %197, %198 : vector<8x128xf32>
    %200 = math.tanh %199 : vector<8x128xf32>
    %201 = arith.mulf %196, %200 : vector<8x128xf32>
    %202 = arith.index_cast %179 : i32 to index
    %c0_65 = arith.constant 0 : index
    %203 = vector.load %arg16[%202, %c0_65] : memref<64x128xf32, #tpu.memory_space<vmem>>, vector<8x128xf32>
    tpu.vector_store %arg16[%202, %c0_65], %201 {strides = array<i32>} : memref<64x128xf32, #tpu.memory_space<vmem>>, vector<8x128xf32>,
    %c7_i32 = arith.constant 7 : i32
    %c8_i32_66 = arith.constant 8 : i32
    %204 = arith.muli %c7_i32, %c8_i32_66 : i32
    %205 = tpu.assume_multiple %204, 8 : i32
    %206 = arith.index_cast %205 : i32 to index
    %c0_67 = arith.constant 0 : index
    %207 = vector.load %arg15[%206, %c0_67] : memref<64x512xf32, #tpu.memory_space<vmem>>, vector<8x512xf32>
    %cst_68 = arith.constant dense<0.000000e+00> : vector<8x512xf32>
    %208 = tpu.matmul %201, %9, %cst_68 {dimension_numbers = #tpu.dot_dimension_numbers<[1], [0], [0], [1], [0, 0, 1, 1], [], []>} : vector<8x128xf32>, vector<128x512xf32>, vector<8x512xf32> -> vector<8x512xf32>
    %209 = arith.addf %207, %208 : vector<8x512xf32>
    %cst_69 = arith.constant 5.000000e-01 : f32
    %210 = vector.broadcast %cst_69 : f32 to vector<8x512xf32>
    %211 = arith.mulf %210, %209 : vector<8x512xf32>
    %212 = arith.select %8, %209, %211 : vector<8x512xi1>, vector<8x512xf32>
    %213 = math.tanh %212 : vector<8x512xf32>
    %cst_70 = arith.constant 5.000000e-01 : f32
    %214 = vector.broadcast %cst_70 : f32 to vector<8x512xf32>
    %215 = arith.mulf %214, %213 : vector<8x512xf32>
    %cst_71 = arith.constant 5.000000e-01 : f32
    %216 = vector.broadcast %cst_71 : f32 to vector<8x512xf32>
    %217 = arith.addf %215, %216 : vector<8x512xf32>
    %218 = arith.select %8, %213, %217 : vector<8x512xi1>, vector<8x512xf32>
    %219 = vector.extract_strided_slice %218 {offsets = [0, 0], sizes = [8, 128], strides = [1, 1]} : vector<8x512xf32> to vector<8x128xf32>
    %220 = vector.extract_strided_slice %218 {offsets = [0, 128], sizes = [8, 128], strides = [1, 1]} : vector<8x512xf32> to vector<8x128xf32>
    %221 = vector.extract_strided_slice %218 {offsets = [0, 256], sizes = [8, 128], strides = [1, 1]} : vector<8x512xf32> to vector<8x128xf32>
    %222 = vector.extract_strided_slice %218 {offsets = [0, 384], sizes = [8, 128], strides = [1, 1]} : vector<8x512xf32> to vector<8x128xf32>
    %223 = arith.mulf %220, %199 : vector<8x128xf32>
    %224 = arith.mulf %219, %221 : vector<8x128xf32>
    %225 = arith.addf %223, %224 : vector<8x128xf32>
    %226 = math.tanh %225 : vector<8x128xf32>
    %227 = arith.mulf %222, %226 : vector<8x128xf32>
    %228 = arith.index_cast %205 : i32 to index
    %c0_72 = arith.constant 0 : index
    %229 = vector.load %arg16[%228, %c0_72] : memref<64x128xf32, #tpu.memory_space<vmem>>, vector<8x128xf32>
    tpu.vector_store %arg16[%228, %c0_72], %227 {strides = array<i32>} : memref<64x128xf32, #tpu.memory_space<vmem>>, vector<8x128xf32>,
    %c8_i32_73 = arith.constant 8 : i32
    %c0_74 = arith.constant 0 : index
    %c0_75 = arith.constant 0 : index
    %c0_76 = arith.constant 0 : index
    %230 = vector.load %arg17[%c0_74, %c0_75, %c0_76] : memref<3x8x128xf32, #tpu.memory_space<vmem>>, vector<1x8x128xf32>
    %231 = vector.shape_cast %230 : vector<1x8x128xf32> to vector<8x128xf32>
    %232 = vector.shape_cast %227 : vector<8x128xf32> to vector<1x8x128xf32>
    tpu.vector_store %arg17[%c0_74, %c0_75, %c0_76], %232 {strides = array<i32>} : memref<3x8x128xf32, #tpu.memory_space<vmem>>, vector<1x8x128xf32>,
    %c0_77 = arith.constant 0 : index
    %c0_78 = arith.constant 0 : index
    %c0_79 = arith.constant 0 : index
    %233 = vector.load %arg18[%c0_77, %c0_78, %c0_79] : memref<3x8x128xf32, #tpu.memory_space<vmem>>, vector<1x8x128xf32>
    %234 = vector.shape_cast %233 : vector<1x8x128xf32> to vector<8x128xf32>
    %235 = vector.shape_cast %225 : vector<8x128xf32> to vector<1x8x128xf32>
    tpu.vector_store %arg18[%c0_77, %c0_78, %c0_79], %235 {strides = array<i32>} : memref<3x8x128xf32, #tpu.memory_space<vmem>>, vector<1x8x128xf32>,
    %c0_80 = arith.constant 0 : index
    %c0_81 = arith.constant 0 : index
    %236 = vector.load %arg7[%c0_80, %c0_81] : memref<128x512xf32, #tpu.memory_space<vmem>>, vector<128x512xf32>
    %c0_82 = arith.constant 0 : index
    %c0_83 = arith.constant 0 : index
    %237 = vector.load %arg8[%c0_82, %c0_83] : memref<1x512xf32, #tpu.memory_space<vmem>>, vector<1x512xf32>
    %c0_84 = arith.constant 0 : index
    %c0_85 = arith.constant 0 : index
    %238 = vector.load %arg16[%c0_84, %c0_85] : memref<64x128xf32, #tpu.memory_space<vmem>>, vector<64x128xf32>
    %c0_86 = arith.constant 0 : index
    %c0_87 = arith.constant 0 : index
    %239 = vector.load %arg6[%c0_86, %c0_87] : memref<128x512xf32, #tpu.memory_space<vmem>>, vector<128x512xf32>
    %cst_88 = arith.constant dense<0.000000e+00> : vector<64x512xf32>
    %240 = tpu.matmul %238, %239, %cst_88 {dimension_numbers = #tpu.dot_dimension_numbers<[1], [0], [0], [1], [0, 0, 1, 1], [], []>} : vector<64x128xf32>, vector<128x512xf32>, vector<64x512xf32> -> vector<64x512xf32>
    %241 = vector.broadcast %237 : vector<1x512xf32> to vector<64x512xf32>
    %242 = arith.addf %240, %241 : vector<64x512xf32>
    %c0_89 = arith.constant 0 : index
    %c0_90 = arith.constant 0 : index
    %243 = vector.load %arg15[%c0_89, %c0_90] : memref<64x512xf32, #tpu.memory_space<vmem>>, vector<64x512xf32>
    tpu.vector_store %arg15[%c0_89, %c0_90], %242 {strides = array<i32>} : memref<64x512xf32, #tpu.memory_space<vmem>>, vector<64x512xf32>,
    %c1 = arith.constant 1 : index
    %c0_91 = arith.constant 0 : index
    %c0_92 = arith.constant 0 : index
    %244 = vector.load %arg17[%c1, %c0_91, %c0_92] : memref<3x8x128xf32, #tpu.memory_space<vmem>>, vector<1x8x128xf32>
    %245 = vector.shape_cast %244 : vector<1x8x128xf32> to vector<8x128xf32>
    %c1_93 = arith.constant 1 : index
    %c0_94 = arith.constant 0 : index
    %c0_95 = arith.constant 0 : index
    %246 = vector.load %arg18[%c1_93, %c0_94, %c0_95] : memref<3x8x128xf32, #tpu.memory_space<vmem>>, vector<1x8x128xf32>
    %247 = vector.shape_cast %246 : vector<1x8x128xf32> to vector<8x128xf32>
    %c0_i32_96 = arith.constant 0 : i32
    %c8_i32_97 = arith.constant 8 : i32
    %248 = arith.muli %c0_i32_96, %c8_i32_97 : i32
    %249 = tpu.assume_multiple %248, 8 : i32
    %250 = arith.index_cast %249 : i32 to index
    %c0_98 = arith.constant 0 : index
    %251 = vector.load %arg15[%250, %c0_98] : memref<64x512xf32, #tpu.memory_space<vmem>>, vector<8x512xf32>
    %cst_99 = arith.constant dense<0.000000e+00> : vector<8x512xf32>
    %252 = tpu.matmul %245, %236, %cst_99 {dimension_numbers = #tpu.dot_dimension_numbers<[1], [0], [0], [1], [0, 0, 1, 1], [], []>} : vector<8x128xf32>, vector<128x512xf32>, vector<8x512xf32> -> vector<8x512xf32>
    %253 = arith.addf %251, %252 : vector<8x512xf32>
    %cst_100 = arith.constant 5.000000e-01 : f32
    %254 = vector.broadcast %cst_100 : f32 to vector<8x512xf32>
    %255 = arith.mulf %254, %253 : vector<8x512xf32>
    %256 = arith.select %8, %253, %255 : vector<8x512xi1>, vector<8x512xf32>
    %257 = math.tanh %256 : vector<8x512xf32>
    %cst_101 = arith.constant 5.000000e-01 : f32
    %258 = vector.broadcast %cst_101 : f32 to vector<8x512xf32>
    %259 = arith.mulf %258, %257 : vector<8x512xf32>
    %cst_102 = arith.constant 5.000000e-01 : f32
    %260 = vector.broadcast %cst_102 : f32 to vector<8x512xf32>
    %261 = arith.addf %259, %260 : vector<8x512xf32>
    %262 = arith.select %8, %257, %261 : vector<8x512xi1>, vector<8x512xf32>
    %263 = vector.extract_strided_slice %262 {offsets = [0, 0], sizes = [8, 128], strides = [1, 1]} : vector<8x512xf32> to vector<8x128xf32>
    %264 = vector.extract_strided_slice %262 {offsets = [0, 128], sizes = [8, 128], strides = [1, 1]} : vector<8x512xf32> to vector<8x128xf32>
    %265 = vector.extract_strided_slice %262 {offsets = [0, 256], sizes = [8, 128], strides = [1, 1]} : vector<8x512xf32> to vector<8x128xf32>
    %266 = vector.extract_strided_slice %262 {offsets = [0, 384], sizes = [8, 128], strides = [1, 1]} : vector<8x512xf32> to vector<8x128xf32>
    %267 = arith.mulf %264, %247 : vector<8x128xf32>
    %268 = arith.mulf %263, %265 : vector<8x128xf32>
    %269 = arith.addf %267, %268 : vector<8x128xf32>
    %270 = math.tanh %269 : vector<8x128xf32>
    %271 = arith.mulf %266, %270 : vector<8x128xf32>
    %272 = arith.index_cast %249 : i32 to index
    %c0_103 = arith.constant 0 : index
    %273 = vector.load %arg16[%272, %c0_103] : memref<64x128xf32, #tpu.memory_space<vmem>>, vector<8x128xf32>
    tpu.vector_store %arg16[%272, %c0_103], %271 {strides = array<i32>} : memref<64x128xf32, #tpu.memory_space<vmem>>, vector<8x128xf32>,
    %c1_i32_104 = arith.constant 1 : i32
    %c8_i32_105 = arith.constant 8 : i32
    %274 = arith.muli %c1_i32_104, %c8_i32_105 : i32
    %275 = tpu.assume_multiple %274, 8 : i32
    %276 = arith.index_cast %275 : i32 to index
    %c0_106 = arith.constant 0 : index
    %277 = vector.load %arg15[%276, %c0_106] : memref<64x512xf32, #tpu.memory_space<vmem>>, vector<8x512xf32>
    %cst_107 = arith.constant dense<0.000000e+00> : vector<8x512xf32>
    %278 = tpu.matmul %271, %236, %cst_107 {dimension_numbers = #tpu.dot_dimension_numbers<[1], [0], [0], [1], [0, 0, 1, 1], [], []>} : vector<8x128xf32>, vector<128x512xf32>, vector<8x512xf32> -> vector<8x512xf32>
    %279 = arith.addf %277, %278 : vector<8x512xf32>
    %cst_108 = arith.constant 5.000000e-01 : f32
    %280 = vector.broadcast %cst_108 : f32 to vector<8x512xf32>
    %281 = arith.mulf %280, %279 : vector<8x512xf32>
    %282 = arith.select %8, %279, %281 : vector<8x512xi1>, vector<8x512xf32>
    %283 = math.tanh %282 : vector<8x512xf32>
    %cst_109 = arith.constant 5.000000e-01 : f32
    %284 = vector.broadcast %cst_109 : f32 to vector<8x512xf32>
    %285 = arith.mulf %284, %283 : vector<8x512xf32>
    %cst_110 = arith.constant 5.000000e-01 : f32
    %286 = vector.broadcast %cst_110 : f32 to vector<8x512xf32>
    %287 = arith.addf %285, %286 : vector<8x512xf32>
    %288 = arith.select %8, %283, %287 : vector<8x512xi1>, vector<8x512xf32>
    %289 = vector.extract_strided_slice %288 {offsets = [0, 0], sizes = [8, 128], strides = [1, 1]} : vector<8x512xf32> to vector<8x128xf32>
    %290 = vector.extract_strided_slice %288 {offsets = [0, 128], sizes = [8, 128], strides = [1, 1]} : vector<8x512xf32> to vector<8x128xf32>
    %291 = vector.extract_strided_slice %288 {offsets = [0, 256], sizes = [8, 128], strides = [1, 1]} : vector<8x512xf32> to vector<8x128xf32>
    %292 = vector.extract_strided_slice %288 {offsets = [0, 384], sizes = [8, 128], strides = [1, 1]} : vector<8x512xf32> to vector<8x128xf32>
    %293 = arith.mulf %290, %269 : vector<8x128xf32>
    %294 = arith.mulf %289, %291 : vector<8x128xf32>
    %295 = arith.addf %293, %294 : vector<8x128xf32>
    %296 = math.tanh %295 : vector<8x128xf32>
    %297 = arith.mulf %292, %296 : vector<8x128xf32>
    %298 = arith.index_cast %275 : i32 to index
    %c0_111 = arith.constant 0 : index
    %299 = vector.load %arg16[%298, %c0_111] : memref<64x128xf32, #tpu.memory_space<vmem>>, vector<8x128xf32>
    tpu.vector_store %arg16[%298, %c0_111], %297 {strides = array<i32>} : memref<64x128xf32, #tpu.memory_space<vmem>>, vector<8x128xf32>,
    %c2_i32_112 = arith.constant 2 : i32
    %c8_i32_113 = arith.constant 8 : i32
    %300 = arith.muli %c2_i32_112, %c8_i32_113 : i32
    %301 = tpu.assume_multiple %300, 8 : i32
    %302 = arith.index_cast %301 : i32 to index
    %c0_114 = arith.constant 0 : index
    %303 = vector.load %arg15[%302, %c0_114] : memref<64x512xf32, #tpu.memory_space<vmem>>, vector<8x512xf32>
    %cst_115 = arith.constant dense<0.000000e+00> : vector<8x512xf32>
    %304 = tpu.matmul %297, %236, %cst_115 {dimension_numbers = #tpu.dot_dimension_numbers<[1], [0], [0], [1], [0, 0, 1, 1], [], []>} : vector<8x128xf32>, vector<128x512xf32>, vector<8x512xf32> -> vector<8x512xf32>
    %305 = arith.addf %303, %304 : vector<8x512xf32>
    %cst_116 = arith.constant 5.000000e-01 : f32
    %306 = vector.broadcast %cst_116 : f32 to vector<8x512xf32>
    %307 = arith.mulf %306, %305 : vector<8x512xf32>
    %308 = arith.select %8, %305, %307 : vector<8x512xi1>, vector<8x512xf32>
    %309 = math.tanh %308 : vector<8x512xf32>
    %cst_117 = arith.constant 5.000000e-01 : f32
    %310 = vector.broadcast %cst_117 : f32 to vector<8x512xf32>
    %311 = arith.mulf %310, %309 : vector<8x512xf32>
    %cst_118 = arith.constant 5.000000e-01 : f32
    %312 = vector.broadcast %cst_118 : f32 to vector<8x512xf32>
    %313 = arith.addf %311, %312 : vector<8x512xf32>
    %314 = arith.select %8, %309, %313 : vector<8x512xi1>, vector<8x512xf32>
    %315 = vector.extract_strided_slice %314 {offsets = [0, 0], sizes = [8, 128], strides = [1, 1]} : vector<8x512xf32> to vector<8x128xf32>
    %316 = vector.extract_strided_slice %314 {offsets = [0, 128], sizes = [8, 128], strides = [1, 1]} : vector<8x512xf32> to vector<8x128xf32>
    %317 = vector.extract_strided_slice %314 {offsets = [0, 256], sizes = [8, 128], strides = [1, 1]} : vector<8x512xf32> to vector<8x128xf32>
    %318 = vector.extract_strided_slice %314 {offsets = [0, 384], sizes = [8, 128], strides = [1, 1]} : vector<8x512xf32> to vector<8x128xf32>
    %319 = arith.mulf %316, %295 : vector<8x128xf32>
    %320 = arith.mulf %315, %317 : vector<8x128xf32>
    %321 = arith.addf %319, %320 : vector<8x128xf32>
    %322 = math.tanh %321 : vector<8x128xf32>
    %323 = arith.mulf %318, %322 : vector<8x128xf32>
    %324 = arith.index_cast %301 : i32 to index
    %c0_119 = arith.constant 0 : index
    %325 = vector.load %arg16[%324, %c0_119] : memref<64x128xf32, #tpu.memory_space<vmem>>, vector<8x128xf32>
    tpu.vector_store %arg16[%324, %c0_119], %323 {strides = array<i32>} : memref<64x128xf32, #tpu.memory_space<vmem>>, vector<8x128xf32>,
    %c3_i32_120 = arith.constant 3 : i32
    %c8_i32_121 = arith.constant 8 : i32
    %326 = arith.muli %c3_i32_120, %c8_i32_121 : i32
    %327 = tpu.assume_multiple %326, 8 : i32
    %328 = arith.index_cast %327 : i32 to index
    %c0_122 = arith.constant 0 : index
    %329 = vector.load %arg15[%328, %c0_122] : memref<64x512xf32, #tpu.memory_space<vmem>>, vector<8x512xf32>
    %cst_123 = arith.constant dense<0.000000e+00> : vector<8x512xf32>
    %330 = tpu.matmul %323, %236, %cst_123 {dimension_numbers = #tpu.dot_dimension_numbers<[1], [0], [0], [1], [0, 0, 1, 1], [], []>} : vector<8x128xf32>, vector<128x512xf32>, vector<8x512xf32> -> vector<8x512xf32>
    %331 = arith.addf %329, %330 : vector<8x512xf32>
    %cst_124 = arith.constant 5.000000e-01 : f32
    %332 = vector.broadcast %cst_124 : f32 to vector<8x512xf32>
    %333 = arith.mulf %332, %331 : vector<8x512xf32>
    %334 = arith.select %8, %331, %333 : vector<8x512xi1>, vector<8x512xf32>
    %335 = math.tanh %334 : vector<8x512xf32>
    %cst_125 = arith.constant 5.000000e-01 : f32
    %336 = vector.broadcast %cst_125 : f32 to vector<8x512xf32>
    %337 = arith.mulf %336, %335 : vector<8x512xf32>
    %cst_126 = arith.constant 5.000000e-01 : f32
    %338 = vector.broadcast %cst_126 : f32 to vector<8x512xf32>
    %339 = arith.addf %337, %338 : vector<8x512xf32>
    %340 = arith.select %8, %335, %339 : vector<8x512xi1>, vector<8x512xf32>
    %341 = vector.extract_strided_slice %340 {offsets = [0, 0], sizes = [8, 128], strides = [1, 1]} : vector<8x512xf32> to vector<8x128xf32>
    %342 = vector.extract_strided_slice %340 {offsets = [0, 128], sizes = [8, 128], strides = [1, 1]} : vector<8x512xf32> to vector<8x128xf32>
    %343 = vector.extract_strided_slice %340 {offsets = [0, 256], sizes = [8, 128], strides = [1, 1]} : vector<8x512xf32> to vector<8x128xf32>
    %344 = vector.extract_strided_slice %340 {offsets = [0, 384], sizes = [8, 128], strides = [1, 1]} : vector<8x512xf32> to vector<8x128xf32>
    %345 = arith.mulf %342, %321 : vector<8x128xf32>
    %346 = arith.mulf %341, %343 : vector<8x128xf32>
    %347 = arith.addf %345, %346 : vector<8x128xf32>
    %348 = math.tanh %347 : vector<8x128xf32>
    %349 = arith.mulf %344, %348 : vector<8x128xf32>
    %350 = arith.index_cast %327 : i32 to index
    %c0_127 = arith.constant 0 : index
    %351 = vector.load %arg16[%350, %c0_127] : memref<64x128xf32, #tpu.memory_space<vmem>>, vector<8x128xf32>
    tpu.vector_store %arg16[%350, %c0_127], %349 {strides = array<i32>} : memref<64x128xf32, #tpu.memory_space<vmem>>, vector<8x128xf32>,
    %c4_i32_128 = arith.constant 4 : i32
    %c8_i32_129 = arith.constant 8 : i32
    %352 = arith.muli %c4_i32_128, %c8_i32_129 : i32
    %353 = tpu.assume_multiple %352, 8 : i32
    %354 = arith.index_cast %353 : i32 to index
    %c0_130 = arith.constant 0 : index
    %355 = vector.load %arg15[%354, %c0_130] : memref<64x512xf32, #tpu.memory_space<vmem>>, vector<8x512xf32>
    %cst_131 = arith.constant dense<0.000000e+00> : vector<8x512xf32>
    %356 = tpu.matmul %349, %236, %cst_131 {dimension_numbers = #tpu.dot_dimension_numbers<[1], [0], [0], [1], [0, 0, 1, 1], [], []>} : vector<8x128xf32>, vector<128x512xf32>, vector<8x512xf32> -> vector<8x512xf32>
    %357 = arith.addf %355, %356 : vector<8x512xf32>
    %cst_132 = arith.constant 5.000000e-01 : f32
    %358 = vector.broadcast %cst_132 : f32 to vector<8x512xf32>
    %359 = arith.mulf %358, %357 : vector<8x512xf32>
    %360 = arith.select %8, %357, %359 : vector<8x512xi1>, vector<8x512xf32>
    %361 = math.tanh %360 : vector<8x512xf32>
    %cst_133 = arith.constant 5.000000e-01 : f32
    %362 = vector.broadcast %cst_133 : f32 to vector<8x512xf32>
    %363 = arith.mulf %362, %361 : vector<8x512xf32>
    %cst_134 = arith.constant 5.000000e-01 : f32
    %364 = vector.broadcast %cst_134 : f32 to vector<8x512xf32>
    %365 = arith.addf %363, %364 : vector<8x512xf32>
    %366 = arith.select %8, %361, %365 : vector<8x512xi1>, vector<8x512xf32>
    %367 = vector.extract_strided_slice %366 {offsets = [0, 0], sizes = [8, 128], strides = [1, 1]} : vector<8x512xf32> to vector<8x128xf32>
    %368 = vector.extract_strided_slice %366 {offsets = [0, 128], sizes = [8, 128], strides = [1, 1]} : vector<8x512xf32> to vector<8x128xf32>
    %369 = vector.extract_strided_slice %366 {offsets = [0, 256], sizes = [8, 128], strides = [1, 1]} : vector<8x512xf32> to vector<8x128xf32>
    %370 = vector.extract_strided_slice %366 {offsets = [0, 384], sizes = [8, 128], strides = [1, 1]} : vector<8x512xf32> to vector<8x128xf32>
    %371 = arith.mulf %368, %347 : vector<8x128xf32>
    %372 = arith.mulf %367, %369 : vector<8x128xf32>
    %373 = arith.addf %371, %372 : vector<8x128xf32>
    %374 = math.tanh %373 : vector<8x128xf32>
    %375 = arith.mulf %370, %374 : vector<8x128xf32>
    %376 = arith.index_cast %353 : i32 to index
    %c0_135 = arith.constant 0 : index
    %377 = vector.load %arg16[%376, %c0_135] : memref<64x128xf32, #tpu.memory_space<vmem>>, vector<8x128xf32>
    tpu.vector_store %arg16[%376, %c0_135], %375 {strides = array<i32>} : memref<64x128xf32, #tpu.memory_space<vmem>>, vector<8x128xf32>,
    %c5_i32_136 = arith.constant 5 : i32
    %c8_i32_137 = arith.constant 8 : i32
    %378 = arith.muli %c5_i32_136, %c8_i32_137 : i32
    %379 = tpu.assume_multiple %378, 8 : i32
    %380 = arith.index_cast %379 : i32 to index
    %c0_138 = arith.constant 0 : index
    %381 = vector.load %arg15[%380, %c0_138] : memref<64x512xf32, #tpu.memory_space<vmem>>, vector<8x512xf32>
    %cst_139 = arith.constant dense<0.000000e+00> : vector<8x512xf32>
    %382 = tpu.matmul %375, %236, %cst_139 {dimension_numbers = #tpu.dot_dimension_numbers<[1], [0], [0], [1], [0, 0, 1, 1], [], []>} : vector<8x128xf32>, vector<128x512xf32>, vector<8x512xf32> -> vector<8x512xf32>
    %383 = arith.addf %381, %382 : vector<8x512xf32>
    %cst_140 = arith.constant 5.000000e-01 : f32
    %384 = vector.broadcast %cst_140 : f32 to vector<8x512xf32>
    %385 = arith.mulf %384, %383 : vector<8x512xf32>
    %386 = arith.select %8, %383, %385 : vector<8x512xi1>, vector<8x512xf32>
    %387 = math.tanh %386 : vector<8x512xf32>
    %cst_141 = arith.constant 5.000000e-01 : f32
    %388 = vector.broadcast %cst_141 : f32 to vector<8x512xf32>
    %389 = arith.mulf %388, %387 : vector<8x512xf32>
    %cst_142 = arith.constant 5.000000e-01 : f32
    %390 = vector.broadcast %cst_142 : f32 to vector<8x512xf32>
    %391 = arith.addf %389, %390 : vector<8x512xf32>
    %392 = arith.select %8, %387, %391 : vector<8x512xi1>, vector<8x512xf32>
    %393 = vector.extract_strided_slice %392 {offsets = [0, 0], sizes = [8, 128], strides = [1, 1]} : vector<8x512xf32> to vector<8x128xf32>
    %394 = vector.extract_strided_slice %392 {offsets = [0, 128], sizes = [8, 128], strides = [1, 1]} : vector<8x512xf32> to vector<8x128xf32>
    %395 = vector.extract_strided_slice %392 {offsets = [0, 256], sizes = [8, 128], strides = [1, 1]} : vector<8x512xf32> to vector<8x128xf32>
    %396 = vector.extract_strided_slice %392 {offsets = [0, 384], sizes = [8, 128], strides = [1, 1]} : vector<8x512xf32> to vector<8x128xf32>
    %397 = arith.mulf %394, %373 : vector<8x128xf32>
    %398 = arith.mulf %393, %395 : vector<8x128xf32>
    %399 = arith.addf %397, %398 : vector<8x128xf32>
    %400 = math.tanh %399 : vector<8x128xf32>
    %401 = arith.mulf %396, %400 : vector<8x128xf32>
    %402 = arith.index_cast %379 : i32 to index
    %c0_143 = arith.constant 0 : index
    %403 = vector.load %arg16[%402, %c0_143] : memref<64x128xf32, #tpu.memory_space<vmem>>, vector<8x128xf32>
    tpu.vector_store %arg16[%402, %c0_143], %401 {strides = array<i32>} : memref<64x128xf32, #tpu.memory_space<vmem>>, vector<8x128xf32>,
    %c6_i32_144 = arith.constant 6 : i32
    %c8_i32_145 = arith.constant 8 : i32
    %404 = arith.muli %c6_i32_144, %c8_i32_145 : i32
    %405 = tpu.assume_multiple %404, 8 : i32
    %406 = arith.index_cast %405 : i32 to index
    %c0_146 = arith.constant 0 : index
    %407 = vector.load %arg15[%406, %c0_146] : memref<64x512xf32, #tpu.memory_space<vmem>>, vector<8x512xf32>
    %cst_147 = arith.constant dense<0.000000e+00> : vector<8x512xf32>
    %408 = tpu.matmul %401, %236, %cst_147 {dimension_numbers = #tpu.dot_dimension_numbers<[1], [0], [0], [1], [0, 0, 1, 1], [], []>} : vector<8x128xf32>, vector<128x512xf32>, vector<8x512xf32> -> vector<8x512xf32>
    %409 = arith.addf %407, %408 : vector<8x512xf32>
    %cst_148 = arith.constant 5.000000e-01 : f32
    %410 = vector.broadcast %cst_148 : f32 to vector<8x512xf32>
    %411 = arith.mulf %410, %409 : vector<8x512xf32>
    %412 = arith.select %8, %409, %411 : vector<8x512xi1>, vector<8x512xf32>
    %413 = math.tanh %412 : vector<8x512xf32>
    %cst_149 = arith.constant 5.000000e-01 : f32
    %414 = vector.broadcast %cst_149 : f32 to vector<8x512xf32>
    %415 = arith.mulf %414, %413 : vector<8x512xf32>
    %cst_150 = arith.constant 5.000000e-01 : f32
    %416 = vector.broadcast %cst_150 : f32 to vector<8x512xf32>
    %417 = arith.addf %415, %416 : vector<8x512xf32>
    %418 = arith.select %8, %413, %417 : vector<8x512xi1>, vector<8x512xf32>
    %419 = vector.extract_strided_slice %418 {offsets = [0, 0], sizes = [8, 128], strides = [1, 1]} : vector<8x512xf32> to vector<8x128xf32>
    %420 = vector.extract_strided_slice %418 {offsets = [0, 128], sizes = [8, 128], strides = [1, 1]} : vector<8x512xf32> to vector<8x128xf32>
    %421 = vector.extract_strided_slice %418 {offsets = [0, 256], sizes = [8, 128], strides = [1, 1]} : vector<8x512xf32> to vector<8x128xf32>
    %422 = vector.extract_strided_slice %418 {offsets = [0, 384], sizes = [8, 128], strides = [1, 1]} : vector<8x512xf32> to vector<8x128xf32>
    %423 = arith.mulf %420, %399 : vector<8x128xf32>
    %424 = arith.mulf %419, %421 : vector<8x128xf32>
    %425 = arith.addf %423, %424 : vector<8x128xf32>
    %426 = math.tanh %425 : vector<8x128xf32>
    %427 = arith.mulf %422, %426 : vector<8x128xf32>
    %428 = arith.index_cast %405 : i32 to index
    %c0_151 = arith.constant 0 : index
    %429 = vector.load %arg16[%428, %c0_151] : memref<64x128xf32, #tpu.memory_space<vmem>>, vector<8x128xf32>
    tpu.vector_store %arg16[%428, %c0_151], %427 {strides = array<i32>} : memref<64x128xf32, #tpu.memory_space<vmem>>, vector<8x128xf32>,
    %c7_i32_152 = arith.constant 7 : i32
    %c8_i32_153 = arith.constant 8 : i32
    %430 = arith.muli %c7_i32_152, %c8_i32_153 : i32
    %431 = tpu.assume_multiple %430, 8 : i32
    %432 = arith.index_cast %431 : i32 to index
    %c0_154 = arith.constant 0 : index
    %433 = vector.load %arg15[%432, %c0_154] : memref<64x512xf32, #tpu.memory_space<vmem>>, vector<8x512xf32>
    %cst_155 = arith.constant dense<0.000000e+00> : vector<8x512xf32>
    %434 = tpu.matmul %427, %236, %cst_155 {dimension_numbers = #tpu.dot_dimension_numbers<[1], [0], [0], [1], [0, 0, 1, 1], [], []>} : vector<8x128xf32>, vector<128x512xf32>, vector<8x512xf32> -> vector<8x512xf32>
    %435 = arith.addf %433, %434 : vector<8x512xf32>
    %cst_156 = arith.constant 5.000000e-01 : f32
    %436 = vector.broadcast %cst_156 : f32 to vector<8x512xf32>
    %437 = arith.mulf %436, %435 : vector<8x512xf32>
    %438 = arith.select %8, %435, %437 : vector<8x512xi1>, vector<8x512xf32>
    %439 = math.tanh %438 : vector<8x512xf32>
    %cst_157 = arith.constant 5.000000e-01 : f32
    %440 = vector.broadcast %cst_157 : f32 to vector<8x512xf32>
    %441 = arith.mulf %440, %439 : vector<8x512xf32>
    %cst_158 = arith.constant 5.000000e-01 : f32
    %442 = vector.broadcast %cst_158 : f32 to vector<8x512xf32>
    %443 = arith.addf %441, %442 : vector<8x512xf32>
    %444 = arith.select %8, %439, %443 : vector<8x512xi1>, vector<8x512xf32>
    %445 = vector.extract_strided_slice %444 {offsets = [0, 0], sizes = [8, 128], strides = [1, 1]} : vector<8x512xf32> to vector<8x128xf32>
    %446 = vector.extract_strided_slice %444 {offsets = [0, 128], sizes = [8, 128], strides = [1, 1]} : vector<8x512xf32> to vector<8x128xf32>
    %447 = vector.extract_strided_slice %444 {offsets = [0, 256], sizes = [8, 128], strides = [1, 1]} : vector<8x512xf32> to vector<8x128xf32>
    %448 = vector.extract_strided_slice %444 {offsets = [0, 384], sizes = [8, 128], strides = [1, 1]} : vector<8x512xf32> to vector<8x128xf32>
    %449 = arith.mulf %446, %425 : vector<8x128xf32>
    %450 = arith.mulf %445, %447 : vector<8x128xf32>
    %451 = arith.addf %449, %450 : vector<8x128xf32>
    %452 = math.tanh %451 : vector<8x128xf32>
    %453 = arith.mulf %448, %452 : vector<8x128xf32>
    %454 = arith.index_cast %431 : i32 to index
    %c0_159 = arith.constant 0 : index
    %455 = vector.load %arg16[%454, %c0_159] : memref<64x128xf32, #tpu.memory_space<vmem>>, vector<8x128xf32>
    tpu.vector_store %arg16[%454, %c0_159], %453 {strides = array<i32>} : memref<64x128xf32, #tpu.memory_space<vmem>>, vector<8x128xf32>,
    %c8_i32_160 = arith.constant 8 : i32
    %c1_161 = arith.constant 1 : index
    %c0_162 = arith.constant 0 : index
    %c0_163 = arith.constant 0 : index
    %456 = vector.load %arg17[%c1_161, %c0_162, %c0_163] : memref<3x8x128xf32, #tpu.memory_space<vmem>>, vector<1x8x128xf32>
    %457 = vector.shape_cast %456 : vector<1x8x128xf32> to vector<8x128xf32>
    %458 = vector.shape_cast %453 : vector<8x128xf32> to vector<1x8x128xf32>
    tpu.vector_store %arg17[%c1_161, %c0_162, %c0_163], %458 {strides = array<i32>} : memref<3x8x128xf32, #tpu.memory_space<vmem>>, vector<1x8x128xf32>,
    %c1_164 = arith.constant 1 : index
    %c0_165 = arith.constant 0 : index
    %c0_166 = arith.constant 0 : index
    %459 = vector.load %arg18[%c1_164, %c0_165, %c0_166] : memref<3x8x128xf32, #tpu.memory_space<vmem>>, vector<1x8x128xf32>
    %460 = vector.shape_cast %459 : vector<1x8x128xf32> to vector<8x128xf32>
    %461 = vector.shape_cast %451 : vector<8x128xf32> to vector<1x8x128xf32>
    tpu.vector_store %arg18[%c1_164, %c0_165, %c0_166], %461 {strides = array<i32>} : memref<3x8x128xf32, #tpu.memory_space<vmem>>, vector<1x8x128xf32>,
    %c0_167 = arith.constant 0 : index
    %c0_168 = arith.constant 0 : index
    %462 = vector.load %arg10[%c0_167, %c0_168] : memref<128x512xf32, #tpu.memory_space<vmem>>, vector<128x512xf32>
    %c0_169 = arith.constant 0 : index
    %c0_170 = arith.constant 0 : index
    %463 = vector.load %arg11[%c0_169, %c0_170] : memref<1x512xf32, #tpu.memory_space<vmem>>, vector<1x512xf32>
    %c0_171 = arith.constant 0 : index
    %c0_172 = arith.constant 0 : index
    %464 = vector.load %arg16[%c0_171, %c0_172] : memref<64x128xf32, #tpu.memory_space<vmem>>, vector<64x128xf32>
    %c0_173 = arith.constant 0 : index
    %c0_174 = arith.constant 0 : index
    %465 = vector.load %arg9[%c0_173, %c0_174] : memref<128x512xf32, #tpu.memory_space<vmem>>, vector<128x512xf32>
    %cst_175 = arith.constant dense<0.000000e+00> : vector<64x512xf32>
    %466 = tpu.matmul %464, %465, %cst_175 {dimension_numbers = #tpu.dot_dimension_numbers<[1], [0], [0], [1], [0, 0, 1, 1], [], []>} : vector<64x128xf32>, vector<128x512xf32>, vector<64x512xf32> -> vector<64x512xf32>
    %467 = vector.broadcast %463 : vector<1x512xf32> to vector<64x512xf32>
    %468 = arith.addf %466, %467 : vector<64x512xf32>
    %c0_176 = arith.constant 0 : index
    %c0_177 = arith.constant 0 : index
    %469 = vector.load %arg15[%c0_176, %c0_177] : memref<64x512xf32, #tpu.memory_space<vmem>>, vector<64x512xf32>
    tpu.vector_store %arg15[%c0_176, %c0_177], %468 {strides = array<i32>} : memref<64x512xf32, #tpu.memory_space<vmem>>, vector<64x512xf32>,
    %c2 = arith.constant 2 : index
    %c0_178 = arith.constant 0 : index
    %c0_179 = arith.constant 0 : index
    %470 = vector.load %arg17[%c2, %c0_178, %c0_179] : memref<3x8x128xf32, #tpu.memory_space<vmem>>, vector<1x8x128xf32>
    %471 = vector.shape_cast %470 : vector<1x8x128xf32> to vector<8x128xf32>
    %c2_180 = arith.constant 2 : index
    %c0_181 = arith.constant 0 : index
    %c0_182 = arith.constant 0 : index
    %472 = vector.load %arg18[%c2_180, %c0_181, %c0_182] : memref<3x8x128xf32, #tpu.memory_space<vmem>>, vector<1x8x128xf32>
    %473 = vector.shape_cast %472 : vector<1x8x128xf32> to vector<8x128xf32>
    %c0_i32_183 = arith.constant 0 : i32
    %c8_i32_184 = arith.constant 8 : i32
    %474 = arith.muli %c0_i32_183, %c8_i32_184 : i32
    %475 = tpu.assume_multiple %474, 8 : i32
    %476 = arith.index_cast %475 : i32 to index
    %c0_185 = arith.constant 0 : index
    %477 = vector.load %arg15[%476, %c0_185] : memref<64x512xf32, #tpu.memory_space<vmem>>, vector<8x512xf32>
    %cst_186 = arith.constant dense<0.000000e+00> : vector<8x512xf32>
    %478 = tpu.matmul %471, %462, %cst_186 {dimension_numbers = #tpu.dot_dimension_numbers<[1], [0], [0], [1], [0, 0, 1, 1], [], []>} : vector<8x128xf32>, vector<128x512xf32>, vector<8x512xf32> -> vector<8x512xf32>
    %479 = arith.addf %477, %478 : vector<8x512xf32>
    %cst_187 = arith.constant 5.000000e-01 : f32
    %480 = vector.broadcast %cst_187 : f32 to vector<8x512xf32>
    %481 = arith.mulf %480, %479 : vector<8x512xf32>
    %482 = arith.select %8, %479, %481 : vector<8x512xi1>, vector<8x512xf32>
    %483 = math.tanh %482 : vector<8x512xf32>
    %cst_188 = arith.constant 5.000000e-01 : f32
    %484 = vector.broadcast %cst_188 : f32 to vector<8x512xf32>
    %485 = arith.mulf %484, %483 : vector<8x512xf32>
    %cst_189 = arith.constant 5.000000e-01 : f32
    %486 = vector.broadcast %cst_189 : f32 to vector<8x512xf32>
    %487 = arith.addf %485, %486 : vector<8x512xf32>
    %488 = arith.select %8, %483, %487 : vector<8x512xi1>, vector<8x512xf32>
    %489 = vector.extract_strided_slice %488 {offsets = [0, 0], sizes = [8, 128], strides = [1, 1]} : vector<8x512xf32> to vector<8x128xf32>
    %490 = vector.extract_strided_slice %488 {offsets = [0, 128], sizes = [8, 128], strides = [1, 1]} : vector<8x512xf32> to vector<8x128xf32>
    %491 = vector.extract_strided_slice %488 {offsets = [0, 256], sizes = [8, 128], strides = [1, 1]} : vector<8x512xf32> to vector<8x128xf32>
    %492 = vector.extract_strided_slice %488 {offsets = [0, 384], sizes = [8, 128], strides = [1, 1]} : vector<8x512xf32> to vector<8x128xf32>
    %493 = arith.mulf %490, %473 : vector<8x128xf32>
    %494 = arith.mulf %489, %491 : vector<8x128xf32>
    %495 = arith.addf %493, %494 : vector<8x128xf32>
    %496 = math.tanh %495 : vector<8x128xf32>
    %497 = arith.mulf %492, %496 : vector<8x128xf32>
    %c1_i32_190 = arith.constant 1 : i32
    %c8_i32_191 = arith.constant 8 : i32
    %498 = arith.muli %c1_i32_190, %c8_i32_191 : i32
    %499 = tpu.assume_multiple %498, 8 : i32
    %500 = arith.index_cast %499 : i32 to index
    %c0_192 = arith.constant 0 : index
    %501 = vector.load %arg15[%500, %c0_192] : memref<64x512xf32, #tpu.memory_space<vmem>>, vector<8x512xf32>
    %cst_193 = arith.constant dense<0.000000e+00> : vector<8x512xf32>
    %502 = tpu.matmul %497, %462, %cst_193 {dimension_numbers = #tpu.dot_dimension_numbers<[1], [0], [0], [1], [0, 0, 1, 1], [], []>} : vector<8x128xf32>, vector<128x512xf32>, vector<8x512xf32> -> vector<8x512xf32>
    %503 = arith.addf %501, %502 : vector<8x512xf32>
    %cst_194 = arith.constant 5.000000e-01 : f32
    %504 = vector.broadcast %cst_194 : f32 to vector<8x512xf32>
    %505 = arith.mulf %504, %503 : vector<8x512xf32>
    %506 = arith.select %8, %503, %505 : vector<8x512xi1>, vector<8x512xf32>
    %507 = math.tanh %506 : vector<8x512xf32>
    %cst_195 = arith.constant 5.000000e-01 : f32
    %508 = vector.broadcast %cst_195 : f32 to vector<8x512xf32>
    %509 = arith.mulf %508, %507 : vector<8x512xf32>
    %cst_196 = arith.constant 5.000000e-01 : f32
    %510 = vector.broadcast %cst_196 : f32 to vector<8x512xf32>
    %511 = arith.addf %509, %510 : vector<8x512xf32>
    %512 = arith.select %8, %507, %511 : vector<8x512xi1>, vector<8x512xf32>
    %513 = vector.extract_strided_slice %512 {offsets = [0, 0], sizes = [8, 128], strides = [1, 1]} : vector<8x512xf32> to vector<8x128xf32>
    %514 = vector.extract_strided_slice %512 {offsets = [0, 128], sizes = [8, 128], strides = [1, 1]} : vector<8x512xf32> to vector<8x128xf32>
    %515 = vector.extract_strided_slice %512 {offsets = [0, 256], sizes = [8, 128], strides = [1, 1]} : vector<8x512xf32> to vector<8x128xf32>
    %516 = vector.extract_strided_slice %512 {offsets = [0, 384], sizes = [8, 128], strides = [1, 1]} : vector<8x512xf32> to vector<8x128xf32>
    %517 = arith.mulf %514, %495 : vector<8x128xf32>
    %518 = arith.mulf %513, %515 : vector<8x128xf32>
    %519 = arith.addf %517, %518 : vector<8x128xf32>
    %520 = math.tanh %519 : vector<8x128xf32>
    %521 = arith.mulf %516, %520 : vector<8x128xf32>
    %c2_i32_197 = arith.constant 2 : i32
    %c8_i32_198 = arith.constant 8 : i32
    %522 = arith.muli %c2_i32_197, %c8_i32_198 : i32
    %523 = tpu.assume_multiple %522, 8 : i32
    %524 = arith.index_cast %523 : i32 to index
    %c0_199 = arith.constant 0 : index
    %525 = vector.load %arg15[%524, %c0_199] : memref<64x512xf32, #tpu.memory_space<vmem>>, vector<8x512xf32>
    %cst_200 = arith.constant dense<0.000000e+00> : vector<8x512xf32>
    %526 = tpu.matmul %521, %462, %cst_200 {dimension_numbers = #tpu.dot_dimension_numbers<[1], [0], [0], [1], [0, 0, 1, 1], [], []>} : vector<8x128xf32>, vector<128x512xf32>, vector<8x512xf32> -> vector<8x512xf32>
    %527 = arith.addf %525, %526 : vector<8x512xf32>
    %cst_201 = arith.constant 5.000000e-01 : f32
    %528 = vector.broadcast %cst_201 : f32 to vector<8x512xf32>
    %529 = arith.mulf %528, %527 : vector<8x512xf32>
    %530 = arith.select %8, %527, %529 : vector<8x512xi1>, vector<8x512xf32>
    %531 = math.tanh %530 : vector<8x512xf32>
    %cst_202 = arith.constant 5.000000e-01 : f32
    %532 = vector.broadcast %cst_202 : f32 to vector<8x512xf32>
    %533 = arith.mulf %532, %531 : vector<8x512xf32>
    %cst_203 = arith.constant 5.000000e-01 : f32
    %534 = vector.broadcast %cst_203 : f32 to vector<8x512xf32>
    %535 = arith.addf %533, %534 : vector<8x512xf32>
    %536 = arith.select %8, %531, %535 : vector<8x512xi1>, vector<8x512xf32>
    %537 = vector.extract_strided_slice %536 {offsets = [0, 0], sizes = [8, 128], strides = [1, 1]} : vector<8x512xf32> to vector<8x128xf32>
    %538 = vector.extract_strided_slice %536 {offsets = [0, 128], sizes = [8, 128], strides = [1, 1]} : vector<8x512xf32> to vector<8x128xf32>
    %539 = vector.extract_strided_slice %536 {offsets = [0, 256], sizes = [8, 128], strides = [1, 1]} : vector<8x512xf32> to vector<8x128xf32>
    %540 = vector.extract_strided_slice %536 {offsets = [0, 384], sizes = [8, 128], strides = [1, 1]} : vector<8x512xf32> to vector<8x128xf32>
    %541 = arith.mulf %538, %519 : vector<8x128xf32>
    %542 = arith.mulf %537, %539 : vector<8x128xf32>
    %543 = arith.addf %541, %542 : vector<8x128xf32>
    %544 = math.tanh %543 : vector<8x128xf32>
    %545 = arith.mulf %540, %544 : vector<8x128xf32>
    %c3_i32_204 = arith.constant 3 : i32
    %c8_i32_205 = arith.constant 8 : i32
    %546 = arith.muli %c3_i32_204, %c8_i32_205 : i32
    %547 = tpu.assume_multiple %546, 8 : i32
    %548 = arith.index_cast %547 : i32 to index
    %c0_206 = arith.constant 0 : index
    %549 = vector.load %arg15[%548, %c0_206] : memref<64x512xf32, #tpu.memory_space<vmem>>, vector<8x512xf32>
    %cst_207 = arith.constant dense<0.000000e+00> : vector<8x512xf32>
    %550 = tpu.matmul %545, %462, %cst_207 {dimension_numbers = #tpu.dot_dimension_numbers<[1], [0], [0], [1], [0, 0, 1, 1], [], []>} : vector<8x128xf32>, vector<128x512xf32>, vector<8x512xf32> -> vector<8x512xf32>
    %551 = arith.addf %549, %550 : vector<8x512xf32>
    %cst_208 = arith.constant 5.000000e-01 : f32
    %552 = vector.broadcast %cst_208 : f32 to vector<8x512xf32>
    %553 = arith.mulf %552, %551 : vector<8x512xf32>
    %554 = arith.select %8, %551, %553 : vector<8x512xi1>, vector<8x512xf32>
    %555 = math.tanh %554 : vector<8x512xf32>
    %cst_209 = arith.constant 5.000000e-01 : f32
    %556 = vector.broadcast %cst_209 : f32 to vector<8x512xf32>
    %557 = arith.mulf %556, %555 : vector<8x512xf32>
    %cst_210 = arith.constant 5.000000e-01 : f32
    %558 = vector.broadcast %cst_210 : f32 to vector<8x512xf32>
    %559 = arith.addf %557, %558 : vector<8x512xf32>
    %560 = arith.select %8, %555, %559 : vector<8x512xi1>, vector<8x512xf32>
    %561 = vector.extract_strided_slice %560 {offsets = [0, 0], sizes = [8, 128], strides = [1, 1]} : vector<8x512xf32> to vector<8x128xf32>
    %562 = vector.extract_strided_slice %560 {offsets = [0, 128], sizes = [8, 128], strides = [1, 1]} : vector<8x512xf32> to vector<8x128xf32>
    %563 = vector.extract_strided_slice %560 {offsets = [0, 256], sizes = [8, 128], strides = [1, 1]} : vector<8x512xf32> to vector<8x128xf32>
    %564 = vector.extract_strided_slice %560 {offsets = [0, 384], sizes = [8, 128], strides = [1, 1]} : vector<8x512xf32> to vector<8x128xf32>
    %565 = arith.mulf %562, %543 : vector<8x128xf32>
    %566 = arith.mulf %561, %563 : vector<8x128xf32>
    %567 = arith.addf %565, %566 : vector<8x128xf32>
    %568 = math.tanh %567 : vector<8x128xf32>
    %569 = arith.mulf %564, %568 : vector<8x128xf32>
    %c4_i32_211 = arith.constant 4 : i32
    %c8_i32_212 = arith.constant 8 : i32
    %570 = arith.muli %c4_i32_211, %c8_i32_212 : i32
    %571 = tpu.assume_multiple %570, 8 : i32
    %572 = arith.index_cast %571 : i32 to index
    %c0_213 = arith.constant 0 : index
    %573 = vector.load %arg15[%572, %c0_213] : memref<64x512xf32, #tpu.memory_space<vmem>>, vector<8x512xf32>
    %cst_214 = arith.constant dense<0.000000e+00> : vector<8x512xf32>
    %574 = tpu.matmul %569, %462, %cst_214 {dimension_numbers = #tpu.dot_dimension_numbers<[1], [0], [0], [1], [0, 0, 1, 1], [], []>} : vector<8x128xf32>, vector<128x512xf32>, vector<8x512xf32> -> vector<8x512xf32>
    %575 = arith.addf %573, %574 : vector<8x512xf32>
    %cst_215 = arith.constant 5.000000e-01 : f32
    %576 = vector.broadcast %cst_215 : f32 to vector<8x512xf32>
    %577 = arith.mulf %576, %575 : vector<8x512xf32>
    %578 = arith.select %8, %575, %577 : vector<8x512xi1>, vector<8x512xf32>
    %579 = math.tanh %578 : vector<8x512xf32>
    %cst_216 = arith.constant 5.000000e-01 : f32
    %580 = vector.broadcast %cst_216 : f32 to vector<8x512xf32>
    %581 = arith.mulf %580, %579 : vector<8x512xf32>
    %cst_217 = arith.constant 5.000000e-01 : f32
    %582 = vector.broadcast %cst_217 : f32 to vector<8x512xf32>
    %583 = arith.addf %581, %582 : vector<8x512xf32>
    %584 = arith.select %8, %579, %583 : vector<8x512xi1>, vector<8x512xf32>
    %585 = vector.extract_strided_slice %584 {offsets = [0, 0], sizes = [8, 128], strides = [1, 1]} : vector<8x512xf32> to vector<8x128xf32>
    %586 = vector.extract_strided_slice %584 {offsets = [0, 128], sizes = [8, 128], strides = [1, 1]} : vector<8x512xf32> to vector<8x128xf32>
    %587 = vector.extract_strided_slice %584 {offsets = [0, 256], sizes = [8, 128], strides = [1, 1]} : vector<8x512xf32> to vector<8x128xf32>
    %588 = vector.extract_strided_slice %584 {offsets = [0, 384], sizes = [8, 128], strides = [1, 1]} : vector<8x512xf32> to vector<8x128xf32>
    %589 = arith.mulf %586, %567 : vector<8x128xf32>
    %590 = arith.mulf %585, %587 : vector<8x128xf32>
    %591 = arith.addf %589, %590 : vector<8x128xf32>
    %592 = math.tanh %591 : vector<8x128xf32>
    %593 = arith.mulf %588, %592 : vector<8x128xf32>
    %c5_i32_218 = arith.constant 5 : i32
    %c8_i32_219 = arith.constant 8 : i32
    %594 = arith.muli %c5_i32_218, %c8_i32_219 : i32
    %595 = tpu.assume_multiple %594, 8 : i32
    %596 = arith.index_cast %595 : i32 to index
    %c0_220 = arith.constant 0 : index
    %597 = vector.load %arg15[%596, %c0_220] : memref<64x512xf32, #tpu.memory_space<vmem>>, vector<8x512xf32>
    %cst_221 = arith.constant dense<0.000000e+00> : vector<8x512xf32>
    %598 = tpu.matmul %593, %462, %cst_221 {dimension_numbers = #tpu.dot_dimension_numbers<[1], [0], [0], [1], [0, 0, 1, 1], [], []>} : vector<8x128xf32>, vector<128x512xf32>, vector<8x512xf32> -> vector<8x512xf32>
    %599 = arith.addf %597, %598 : vector<8x512xf32>
    %cst_222 = arith.constant 5.000000e-01 : f32
    %600 = vector.broadcast %cst_222 : f32 to vector<8x512xf32>
    %601 = arith.mulf %600, %599 : vector<8x512xf32>
    %602 = arith.select %8, %599, %601 : vector<8x512xi1>, vector<8x512xf32>
    %603 = math.tanh %602 : vector<8x512xf32>
    %cst_223 = arith.constant 5.000000e-01 : f32
    %604 = vector.broadcast %cst_223 : f32 to vector<8x512xf32>
    %605 = arith.mulf %604, %603 : vector<8x512xf32>
    %cst_224 = arith.constant 5.000000e-01 : f32
    %606 = vector.broadcast %cst_224 : f32 to vector<8x512xf32>
    %607 = arith.addf %605, %606 : vector<8x512xf32>
    %608 = arith.select %8, %603, %607 : vector<8x512xi1>, vector<8x512xf32>
    %609 = vector.extract_strided_slice %608 {offsets = [0, 0], sizes = [8, 128], strides = [1, 1]} : vector<8x512xf32> to vector<8x128xf32>
    %610 = vector.extract_strided_slice %608 {offsets = [0, 128], sizes = [8, 128], strides = [1, 1]} : vector<8x512xf32> to vector<8x128xf32>
    %611 = vector.extract_strided_slice %608 {offsets = [0, 256], sizes = [8, 128], strides = [1, 1]} : vector<8x512xf32> to vector<8x128xf32>
    %612 = vector.extract_strided_slice %608 {offsets = [0, 384], sizes = [8, 128], strides = [1, 1]} : vector<8x512xf32> to vector<8x128xf32>
    %613 = arith.mulf %610, %591 : vector<8x128xf32>
    %614 = arith.mulf %609, %611 : vector<8x128xf32>
    %615 = arith.addf %613, %614 : vector<8x128xf32>
    %616 = math.tanh %615 : vector<8x128xf32>
    %617 = arith.mulf %612, %616 : vector<8x128xf32>
    %c6_i32_225 = arith.constant 6 : i32
    %c8_i32_226 = arith.constant 8 : i32
    %618 = arith.muli %c6_i32_225, %c8_i32_226 : i32
    %619 = tpu.assume_multiple %618, 8 : i32
    %620 = arith.index_cast %619 : i32 to index
    %c0_227 = arith.constant 0 : index
    %621 = vector.load %arg15[%620, %c0_227] : memref<64x512xf32, #tpu.memory_space<vmem>>, vector<8x512xf32>
    %cst_228 = arith.constant dense<0.000000e+00> : vector<8x512xf32>
    %622 = tpu.matmul %617, %462, %cst_228 {dimension_numbers = #tpu.dot_dimension_numbers<[1], [0], [0], [1], [0, 0, 1, 1], [], []>} : vector<8x128xf32>, vector<128x512xf32>, vector<8x512xf32> -> vector<8x512xf32>
    %623 = arith.addf %621, %622 : vector<8x512xf32>
    %cst_229 = arith.constant 5.000000e-01 : f32
    %624 = vector.broadcast %cst_229 : f32 to vector<8x512xf32>
    %625 = arith.mulf %624, %623 : vector<8x512xf32>
    %626 = arith.select %8, %623, %625 : vector<8x512xi1>, vector<8x512xf32>
    %627 = math.tanh %626 : vector<8x512xf32>
    %cst_230 = arith.constant 5.000000e-01 : f32
    %628 = vector.broadcast %cst_230 : f32 to vector<8x512xf32>
    %629 = arith.mulf %628, %627 : vector<8x512xf32>
    %cst_231 = arith.constant 5.000000e-01 : f32
    %630 = vector.broadcast %cst_231 : f32 to vector<8x512xf32>
    %631 = arith.addf %629, %630 : vector<8x512xf32>
    %632 = arith.select %8, %627, %631 : vector<8x512xi1>, vector<8x512xf32>
    %633 = vector.extract_strided_slice %632 {offsets = [0, 0], sizes = [8, 128], strides = [1, 1]} : vector<8x512xf32> to vector<8x128xf32>
    %634 = vector.extract_strided_slice %632 {offsets = [0, 128], sizes = [8, 128], strides = [1, 1]} : vector<8x512xf32> to vector<8x128xf32>
    %635 = vector.extract_strided_slice %632 {offsets = [0, 256], sizes = [8, 128], strides = [1, 1]} : vector<8x512xf32> to vector<8x128xf32>
    %636 = vector.extract_strided_slice %632 {offsets = [0, 384], sizes = [8, 128], strides = [1, 1]} : vector<8x512xf32> to vector<8x128xf32>
    %637 = arith.mulf %634, %615 : vector<8x128xf32>
    %638 = arith.mulf %633, %635 : vector<8x128xf32>
    %639 = arith.addf %637, %638 : vector<8x128xf32>
    %640 = math.tanh %639 : vector<8x128xf32>
    %641 = arith.mulf %636, %640 : vector<8x128xf32>
    %c7_i32_232 = arith.constant 7 : i32
    %c8_i32_233 = arith.constant 8 : i32
    %642 = arith.muli %c7_i32_232, %c8_i32_233 : i32
    %643 = tpu.assume_multiple %642, 8 : i32
    %644 = arith.index_cast %643 : i32 to index
    %c0_234 = arith.constant 0 : index
    %645 = vector.load %arg15[%644, %c0_234] : memref<64x512xf32, #tpu.memory_space<vmem>>, vector<8x512xf32>
    %cst_235 = arith.constant dense<0.000000e+00> : vector<8x512xf32>
    %646 = tpu.matmul %641, %462, %cst_235 {dimension_numbers = #tpu.dot_dimension_numbers<[1], [0], [0], [1], [0, 0, 1, 1], [], []>} : vector<8x128xf32>, vector<128x512xf32>, vector<8x512xf32> -> vector<8x512xf32>
    %647 = arith.addf %645, %646 : vector<8x512xf32>
    %cst_236 = arith.constant 5.000000e-01 : f32
    %648 = vector.broadcast %cst_236 : f32 to vector<8x512xf32>
    %649 = arith.mulf %648, %647 : vector<8x512xf32>
    %650 = arith.select %8, %647, %649 : vector<8x512xi1>, vector<8x512xf32>
    %651 = math.tanh %650 : vector<8x512xf32>
    %cst_237 = arith.constant 5.000000e-01 : f32
    %652 = vector.broadcast %cst_237 : f32 to vector<8x512xf32>
    %653 = arith.mulf %652, %651 : vector<8x512xf32>
    %cst_238 = arith.constant 5.000000e-01 : f32
    %654 = vector.broadcast %cst_238 : f32 to vector<8x512xf32>
    %655 = arith.addf %653, %654 : vector<8x512xf32>
    %656 = arith.select %8, %651, %655 : vector<8x512xi1>, vector<8x512xf32>
    %657 = vector.extract_strided_slice %656 {offsets = [0, 0], sizes = [8, 128], strides = [1, 1]} : vector<8x512xf32> to vector<8x128xf32>
    %658 = vector.extract_strided_slice %656 {offsets = [0, 128], sizes = [8, 128], strides = [1, 1]} : vector<8x512xf32> to vector<8x128xf32>
    %659 = vector.extract_strided_slice %656 {offsets = [0, 256], sizes = [8, 128], strides = [1, 1]} : vector<8x512xf32> to vector<8x128xf32>
    %660 = vector.extract_strided_slice %656 {offsets = [0, 384], sizes = [8, 128], strides = [1, 1]} : vector<8x512xf32> to vector<8x128xf32>
    %661 = arith.mulf %658, %639 : vector<8x128xf32>
    %662 = arith.mulf %657, %659 : vector<8x128xf32>
    %663 = arith.addf %661, %662 : vector<8x128xf32>
    %664 = math.tanh %663 : vector<8x128xf32>
    %665 = arith.mulf %660, %664 : vector<8x128xf32>
    %c8_i32_239 = arith.constant 8 : i32
    %c2_240 = arith.constant 2 : index
    %c0_241 = arith.constant 0 : index
    %c0_242 = arith.constant 0 : index
    %666 = vector.load %arg17[%c2_240, %c0_241, %c0_242] : memref<3x8x128xf32, #tpu.memory_space<vmem>>, vector<1x8x128xf32>
    %667 = vector.shape_cast %666 : vector<1x8x128xf32> to vector<8x128xf32>
    %668 = vector.shape_cast %665 : vector<8x128xf32> to vector<1x8x128xf32>
    tpu.vector_store %arg17[%c2_240, %c0_241, %c0_242], %668 {strides = array<i32>} : memref<3x8x128xf32, #tpu.memory_space<vmem>>, vector<1x8x128xf32>,
    %c2_243 = arith.constant 2 : index
    %c0_244 = arith.constant 0 : index
    %c0_245 = arith.constant 0 : index
    %669 = vector.load %arg18[%c2_243, %c0_244, %c0_245] : memref<3x8x128xf32, #tpu.memory_space<vmem>>, vector<1x8x128xf32>
    %670 = vector.shape_cast %669 : vector<1x8x128xf32> to vector<8x128xf32>
    %671 = vector.shape_cast %663 : vector<8x128xf32> to vector<1x8x128xf32>
    tpu.vector_store %arg18[%c2_243, %c0_244, %c0_245], %671 {strides = array<i32>} : memref<3x8x128xf32, #tpu.memory_space<vmem>>, vector<1x8x128xf32>,
    %c0_i32_246 = arith.constant 0 : i32
    %672 = arith.cmpi eq, %arg1, %c0_i32_246 : i32
    %673 = arith.extui %672 : i1 to i32
    %c0_i32_247 = arith.constant 0 : i32
    %674 = arith.cmpi ne, %673, %c0_i32_247 : i32
    scf.if %674 {
      %c2_248 = arith.constant 2 : index
      %c0_249 = arith.constant 0 : index
      %c0_250 = arith.constant 0 : index
      %675 = vector.load %arg17[%c2_248, %c0_249, %c0_250] : memref<3x8x128xf32, #tpu.memory_space<vmem>>, vector<1x8x128xf32>
      %676 = vector.shape_cast %675 : vector<1x8x128xf32> to vector<8x128xf32>
      %c0_251 = arith.constant 0 : index
      %c0_252 = arith.constant 0 : index
      %677 = vector.load %arg12[%c0_251, %c0_252] : memref<128x5xf32, #tpu.memory_space<vmem>>, vector<128x5xf32>
      %cst_253 = arith.constant dense<0.000000e+00> : vector<8x5xf32>
      %678 = tpu.matmul %676, %677, %cst_253 {dimension_numbers = #tpu.dot_dimension_numbers<[1], [0], [0], [1], [0, 0, 1, 1], [], []>} : vector<8x128xf32>, vector<128x5xf32>, vector<8x5xf32> -> vector<8x5xf32>
      %c0_254 = arith.constant 0 : index
      %c0_255 = arith.constant 0 : index
      %679 = vector.load %arg13[%c0_254, %c0_255] : memref<1x5xf32, #tpu.memory_space<vmem>>, vector<1x5xf32>
      %680 = vector.broadcast %679 : vector<1x5xf32> to vector<8x5xf32>
      %681 = arith.addf %678, %680 : vector<8x5xf32>
      %c0_256 = arith.constant 0 : index
      %c0_257 = arith.constant 0 : index
      %682 = vector.load %arg14[%c0_256, %c0_257] : memref<8x5xf32, #tpu.memory_space<vmem>>, vector<8x5xf32>
      tpu.vector_store %arg14[%c0_256, %c0_257], %681 {strides = array<i32>} : memref<8x5xf32, #tpu.memory_space<vmem>>, vector<8x5xf32>,
    } else {
    }
    return
  }
  func.func @transform_0(%arg0: i32, %arg1: i32) -> (i32, i32, i32) {
    %c0_i32 = arith.constant 0 : i32
    %c0_i32_0 = arith.constant 0 : i32
    return %arg0, %arg1, %c0_i32 : i32, i32, i32
  }
  func.func @transform_1(%arg0: i32, %arg1: i32) -> (i32, i32) {
    %c0_i32 = arith.constant 0 : i32
    %c0_i32_0 = arith.constant 0 : i32
    %c0_i32_1 = arith.constant 0 : i32
    return %c0_i32, %c0_i32_0 : i32, i32
  }
  func.func @transform_2(%arg0: i32, %arg1: i32) -> (i32, i32) {
    %c0_i32 = arith.constant 0 : i32
    %c0_i32_0 = arith.constant 0 : i32
    %c0_i32_1 = arith.constant 0 : i32
    return %c0_i32, %c0_i32_0 : i32, i32
  }
  func.func @transform_3(%arg0: i32, %arg1: i32) -> (i32, i32) {
    %c0_i32 = arith.constant 0 : i32
    %c0_i32_0 = arith.constant 0 : i32
    %c0_i32_1 = arith.constant 0 : i32
    return %c0_i32, %c0_i32_0 : i32, i32
  }
  func.func @transform_4(%arg0: i32, %arg1: i32) -> (i32, i32) {
    %c0_i32 = arith.constant 0 : i32
    %c0_i32_0 = arith.constant 0 : i32
    %c0_i32_1 = arith.constant 0 : i32
    return %c0_i32, %c0_i32_0 : i32, i32
  }
  func.func @transform_5(%arg0: i32, %arg1: i32) -> (i32, i32) {
    %c0_i32 = arith.constant 0 : i32
    %c0_i32_0 = arith.constant 0 : i32
    %c0_i32_1 = arith.constant 0 : i32
    return %c0_i32, %c0_i32_0 : i32, i32
  }
  func.func @transform_6(%arg0: i32, %arg1: i32) -> (i32, i32) {
    %c0_i32 = arith.constant 0 : i32
    %c0_i32_0 = arith.constant 0 : i32
    %c0_i32_1 = arith.constant 0 : i32
    return %c0_i32, %c0_i32_0 : i32, i32
  }
  func.func @transform_7(%arg0: i32, %arg1: i32) -> (i32, i32) {
    %c0_i32 = arith.constant 0 : i32
    %c0_i32_0 = arith.constant 0 : i32
    %c0_i32_1 = arith.constant 0 : i32
    return %c0_i32, %c0_i32_0 : i32, i32
  }
  func.func @transform_8(%arg0: i32, %arg1: i32) -> (i32, i32) {
    %c0_i32 = arith.constant 0 : i32
    %c0_i32_0 = arith.constant 0 : i32
    %c0_i32_1 = arith.constant 0 : i32
    return %c0_i32, %c0_i32_0 : i32, i32
  }
  func.func @transform_9(%arg0: i32, %arg1: i32) -> (i32, i32) {
    %c0_i32 = arith.constant 0 : i32
    %c0_i32_0 = arith.constant 0 : i32
    %c0_i32_1 = arith.constant 0 : i32
    return %c0_i32, %c0_i32_0 : i32, i32
  }
  func.func @transform_10(%arg0: i32, %arg1: i32) -> (i32, i32) {
    %c0_i32 = arith.constant 0 : i32
    %c0_i32_0 = arith.constant 0 : i32
    %c0_i32_1 = arith.constant 0 : i32
    return %c0_i32, %c0_i32_0 : i32, i32
  }
  func.func @transform_11(%arg0: i32, %arg1: i32) -> (i32, i32) {
    %c0_i32 = arith.constant 0 : i32
    %c0_i32_0 = arith.constant 0 : i32
    %c0_i32_1 = arith.constant 0 : i32
    return %c0_i32, %c0_i32_0 : i32, i32
  }
  func.func @transform_12(%arg0: i32, %arg1: i32) -> (i32, i32) {
    %c0_i32 = arith.constant 0 : i32
    %c0_i32_0 = arith.constant 0 : i32
    return %arg0, %c0_i32 : i32, i32
  }
}

</mosaic_0001>

<bundles_post_ra>
// kernel: tpu_custom_call.1
= control target key start
LH: loop header
LB: loop body
LE: loop exit
PB: predicated region body
PF: predicated region fallthrough
CT: control target
= control target key end

     0   :  { %17 = vsyncpa [#allocation7], 0  ;;  %s9856_s0 = inlined_call_operand.vmem [shape: f32[1,64,16], index: 0, kind: input, shape index: {}]   ;;  %s9857_s1 = inlined_call_operand.vmem [shape: f32[16,512], index: 1, kind: input, shape index: {}]   ;;  %s9858_s2 = inlined_call_operand.hbm [shape: f32[128,512], index: 2, kind: input, shape index: {}]   ;;  %s9859_s3 = inlined_call_operand.vmem [shape: f32[1,512], index: 3, kind: input, shape index: {}]   ;;  %s9860_s4 = inlined_call_operand.hbm [shape: f32[128,512], index: 4, kind: input, shape index: {}]   ;;  %s9861_s5 = inlined_call_operand.hbm [shape: f32[128,512], index: 5, kind: input, shape index: {}]   ;;  %s9862_s6 = inlined_call_operand.vmem [shape: f32[1,512], index: 6, kind: input, shape index: {}]   ;;  %s9863_s7 = inlined_call_operand.hbm [shape: f32[128,512], index: 7, kind: input, shape index: {}]   ;;  %s9864_s8 = inlined_call_operand.hbm [shape: f32[128,512], index: 8, kind: input, shape index: {}]   ;;  %s9865_s9 = inlined_call_operand.vmem [shape: f32[1,512], index: 9, kind: input, shape index: {}]   ;;  %s9866_s10 = inlined_call_operand.vmem [shape: f32[128,5], index: 10, kind: input, shape index: {}]   ;;  %s9867_s11 = inlined_call_operand.vmem [shape: f32[1,5], index: 11, kind: input, shape index: {}]   ;;  %s9868_s12 = inlined_call_operand.hbm [shape: f32[8,5], index: 12, kind: output, shape index: {}]  }
   0x1   :  { %18 = vsyncpa [#allocation10], 0 }
   0x2   :  { %19 = vsyncpa [#allocation13], 0 }
   0x3   :  { %20 = vsyncpa [#allocation8], 0  ;;  %s8184_s21 = smov [#allocation9]   ;;  %s8185_s23 = smov [#allocation12]  }
   0x4   :  { %s44_s22 = sshll.u32 %s8184_s21, 4  ;;  %s70_s24 = sshll.u32 %s8185_s23, 4  ;;  %s45_s22 = int_to_ptr.vmem [resolvable:$true] %s44_s22  ;;  %s8260_s24 = int_to_ptr.vmem [resolvable:$true] %s70_s24 }
   0x5   :  { %s8044_s27 = scalar_lea.hbm %s9860_s4, 8192 }
   0x6   :  { %p8045_p0 = scmp.ne.s32.totalorder %s9860_s4, %s8044_s27  ;;  %p8048_p1 = scmp.lt.u32.totalorder %s8044_s27, %s9860_s4 }
   0x8   :  { %p8050_p2 = pnand %p8048_p1, %p8045_p0 }
   0xa   :  { %8053 = shalt.err (!%p8050_p2)
}
   0xb   :  { %s8054_s14 = scalar_lea.vmem %s45_s22, 8192  ;;  %p8059_p4 = scmp.lt.s32.totalorder %s45_s22, %s45_s22 }
   0xc   :  { %p8055_p3 = scmp.ne.s32.totalorder %s45_s22, %s8054_s14  ;;  %p8060_p5 = scmp.lt.s32.totalorder %s8054_s14, %s8054_s14 }
   0xe   :  { %p8061_p6 = por %p8060_p5, %p8059_p4 }
  0x10   :  { %p8062_p7 = pnand %p8061_p6, %p8055_p3 }
  0x12   :  { %8065 = shalt.err (!%p8062_p7)
}
  0x13   :  { %s8186_s15 = smov 512   ;;  %s8187_s16 = smov 32  }
  0x14   :  { %50 = dma.hbm_to_vmem [thread:$0]  %s9860_s4, 8192, %s45_s22, [#allocation10], %s8186_s15, %s8186_s15, %s8187_s16  }
  0x15   :  { %s8066_s21 = scalar_lea.hbm %s9863_s7, 8192 }
  0x16   :  { %p8067_p8 = scmp.ne.s32.totalorder %s9863_s7, %s8066_s21  ;;  %p8070_p9 = scmp.lt.u32.totalorder %s8066_s21, %s9863_s7 }
  0x18   :  { %p8072_p10 = pnand %p8070_p9, %p8067_p8 }
  0x1a   :  { %8075 = shalt.err (!%p8072_p10)
}
  0x1b   :  { %s8076_s28 = scalar_lea.vmem %s8260_s24, 8192  ;;  %p8081_p12 = scmp.lt.s32.totalorder %s8260_s24, %s8260_s24 }
  0x1c   :  { %p8077_p11 = scmp.ne.s32.totalorder %s8260_s24, %s8076_s28  ;;  %p8082_p13 = scmp.lt.s32.totalorder %s8076_s28, %s8076_s28 }
  0x1e   :  { %p8083_p0 = por %p8082_p13, %p8081_p12 }
  0x20   :  { %p8084_p1 = pnand %p8083_p0, %p8077_p11 }
  0x22   :  { %8087 = shalt.err (!%p8084_p1)
}
  0x23   :  { %76 = dma.hbm_to_vmem [thread:$0]  %s9863_s7, 8192, %s8260_s24, [#allocation13], %s8186_s15, %s8186_s15, %s8187_s16  }
  0x24   :  { %s8188_s29 = smov [#allocation6]   ;;  %s8189_s13 = smov [#allocation11]  }
  0x25   :  { %s30_s30 = sshll.u32 %s8188_s29, 4  ;;  %s56_s14 = sshll.u32 %s8189_s13, 4  ;;  %s31_s30 = int_to_ptr.vmem [resolvable:$true] %s30_s30  ;;  %s8297_s14 = int_to_ptr.vmem [resolvable:$true] %s56_s14 }
  0x26   :  { %s8088_s19 = scalar_lea.hbm %s9858_s2, 8192 }
  0x27   :  { %p8089_p2 = scmp.ne.s32.totalorder %s9858_s2, %s8088_s19  ;;  %p8092_p3 = scmp.lt.u32.totalorder %s8088_s19, %s9858_s2 }
  0x29   :  { %p8094_p4 = pnand %p8092_p3, %p8089_p2 }
  0x2b   :  { %8097 = shalt.err (!%p8094_p4)
}
  0x2c   :  { %s8098_s7 = scalar_lea.vmem %s31_s30, 8192  ;;  %p8103_p6 = scmp.lt.s32.totalorder %s31_s30, %s31_s30 }
  0x2d   :  { %p8099_p5 = scmp.ne.s32.totalorder %s31_s30, %s8098_s7  ;;  %p8104_p7 = scmp.lt.s32.totalorder %s8098_s7, %s8098_s7 }
  0x2f   :  { %p8105_p8 = por %p8104_p7, %p8103_p6 }
  0x31   :  { %p8106_p9 = pnand %p8105_p8, %p8099_p5 }
  0x33   :  { %8109 = shalt.err (!%p8106_p9)
}
  0x34   :  { %36 = dma.hbm_to_vmem [thread:$0]  %s9858_s2, 8192, %s31_s30, [#allocation7], %s8186_s15, %s8186_s15, %s8187_s16  }
  0x35   :  { %s8110_s4 = scalar_lea.hbm %s9861_s5, 8192 }
  0x36   :  { %p8111_p10 = scmp.ne.s32.totalorder %s9861_s5, %s8110_s4  ;;  %p8114_p11 = scmp.lt.u32.totalorder %s8110_s4, %s9861_s5 }
  0x38   :  { %p8116_p12 = pnand %p8114_p11, %p8111_p10 }
  0x3a   :  { %8119 = shalt.err (!%p8116_p12)
}
  0x3b   :  { %s8120_s18 = scalar_lea.vmem %s8297_s14, 8192  ;;  %p8125_p0 = scmp.lt.s32.totalorder %s8297_s14, %s8297_s14 }
  0x3c   :  { %p8121_p13 = scmp.ne.s32.totalorder %s8297_s14, %s8120_s18  ;;  %p8126_p1 = scmp.lt.s32.totalorder %s8120_s18, %s8120_s18 }
  0x3e   :  { %p8127_p2 = por %p8126_p1, %p8125_p0 }
  0x40   :  { %p8128_p3 = pnand %p8127_p2, %p8121_p13 }
  0x42   :  { %8131 = shalt.err (!%p8128_p3)
}
  0x43   :  { %62 = dma.hbm_to_vmem [thread:$0]  %s9861_s5, 8192, %s8297_s14, [#allocation10], %s8186_s15, %s8186_s15, %s8187_s16  }
  0x44   :  { %s8190_s19 = smov [#allocation14]   ;;  %s8132_s25 = scalar_lea.hbm %s9864_s8, 8192 }
  0x45   :  { %s82_s20 = sshll.u32 %s8190_s19, 4  ;;  %p8133_p4 = scmp.ne.s32.totalorder %s9864_s8, %s8132_s25  ;;  %s83_s20 = int_to_ptr.vmem [resolvable:$true] %s82_s20 }
  0x46   :  { %p8136_p5 = scmp.lt.u32.totalorder %s8132_s25, %s9864_s8 }
  0x48   :  { %p8138_p6 = pnand %p8136_p5, %p8133_p4 }
  0x4a   :  { %8141 = shalt.err (!%p8138_p6)
}
  0x4b   :  { %s8142_s28 = scalar_lea.vmem %s83_s20, 8192  ;;  %p8147_p8 = scmp.lt.s32.totalorder %s83_s20, %s83_s20 }
  0x4c   :  { %p8143_p7 = scmp.ne.s32.totalorder %s83_s20, %s8142_s28  ;;  %p8148_p9 = scmp.lt.s32.totalorder %s8142_s28, %s8142_s28 }
  0x4e   :  { %p8149_p10 = por %p8148_p9, %p8147_p8 }
  0x50   :  { %p8150_p11 = pnand %p8149_p10, %p8143_p7 }
  0x52   :  { %8153 = shalt.err (!%p8150_p11)
}
  0x53   :  { %88 = dma.hbm_to_vmem [thread:$0]  %s9864_s8, 8192, %s83_s20, [#allocation13], %s8186_s15, %s8186_s15, %s8187_s16  }
  0x54   :  { %8176 = dma.done.wait [#allocation7], 8192  }
  0x55   :  { %8177 = vsyncadd [#allocation7], 4294959104 }
  0x56   :  { %8178 = dma.done.wait [#allocation10], 16384  }
  0x57   :  { %8179 = vsyncadd [#allocation10], 4294950912 }
  0x58   :  { %8180 = dma.done.wait [#allocation13], 16384  }
  0x59   :  { %8181 = vsyncadd [#allocation13], 4294950912  ;;  %v8191_v0 = vmov 0.0   ;;  %v211_v1 = vld [vmem:[%s9857_s1 + $0x8] sm:$0xff]  ;;  %v213_v3 = vld [vmem:[%s9857_s1 + $0x18] sm:$0xff]  ;;  %vm239_vm0 = vcmask 130048  }
  0x5a   :  { %328 = vmatprep.mubr.f32.mxu0 %v8191_v0  ;;  %441 = vmatprep.mubr.f32.mxu1 %v8191_v0  ;;  %v215_v2 = vld [vmem:[%s9857_s1 + $0x28] sm:$0xff]  ;;  %v217_v5 = vld [vmem:[%s9857_s1 + $0x38] sm:$0xff]  ;;  %v210_v6 = vld [vmem:[%s9857_s1] sm:$0xff]  ;;  %vm8193_vm1 = vmmov 0   ;;  %s8194_s25 = smov [#allocation15]   ;;  %vm5810_vm2 = vcmask 39936  }
  0x5b   :  { %v5905_v4 = vpack.c.bf16 %v215_v2, %v211_v1  ;;  %v214_v7 = vld [vmem:[%s9857_s1 + $0x20] sm:$0xff]  ;;  %v5909_v8 = vpack.c.bf16 %v217_v5, %v213_v3  ;;  %v212_v10 = vld [vmem:[%s9857_s1 + $0x10] sm:$0xff]  ;;  %v138_v14 = vld [vmem:[#allocation6 + $0x8] sm:$0xff]  ;;  %s5818_s7 = sshll.u32 %s8194_s25, 4  ;;  %s5819_s7 = int_to_ptr.vmem [resolvable:$true] %s5818_s7 }
  0x5c   :  { %v5907_v9 = vpack.c.bf16 %v214_v7, %v210_v6  ;;  %v216_v11 = vld [vmem:[%s9857_s1 + $0x30] sm:$0xff]  ;;  %v202_v12 = vld [vmem:[%s9856_s0] sm:$0xff]  ;;  %v142_v15 = vld [vmem:[#allocation6 + $0x28] sm:$0xff]  ;;  %s8154_s24 = scalar_lea.vmem %s5819_s7, 128  ;;  %p8159_p13 = scmp.lt.s32.totalorder %s5819_s7, %s5819_s7 }
  0x5d   :  { %5906 = vmatprep.subr.bf16.mxu0 %v5905_v4  ;;  %v5911_v13 = vpack.c.bf16 %v216_v11, %v212_v10  ;;  %v140_v16 = vld [vmem:[#allocation6 + $0x18] sm:$0xff]  ;;  %5910 = vmatprep.subr.bf16.mxu1 %v5909_v8  ;;  %v8378_v17 = vpack.c.bf16 %v142_v15, %v138_v14  ;;  %v137_v19 = vld [vmem:[#allocation6] sm:$0xff]  ;;  %v139_v23 = vld [vmem:[#allocation6 + $0x10] sm:$0xff]  ;;  %p8155_p12 = scmp.ne.s32.totalorder %s5819_s7, %s8154_s24  ;;  %p8160_p0 = scmp.lt.s32.totalorder %s8154_s24, %s8154_s24 }
  0x5e   :  { %5908 = vmatpush1.bf16.msra.mxu0 %v5907_v9  ;;  %v144_v18 = vld [vmem:[#allocation6 + $0x38] sm:$0xff]  ;;  %v141_v20 = vld [vmem:[#allocation6 + $0x20] sm:$0xff]  ;;  %v143_v24 = vld [vmem:[#allocation6 + $0x30] sm:$0xff] }
  0x5f   :  { %5912 = vmatpush1.bf16.msra.mxu1 %v5911_v13  ;;  %v8380_v21 = vpack.c.bf16 %v144_v18, %v140_v16  ;;  %v8382_v22 = vpack.c.bf16 %v141_v20, %v137_v19  ;;  %5914 = vmatprep.subr.bf16.mxu0 %v8378_v17  ;;  %v8385_v25 = vpack.c.bf16 %v143_v24, %v139_v23  ;;  %v146_v26 = vld [vmem:[#allocation6 + $0x48] sm:$0xff]  ;;  %v148_v28 = vld [vmem:[#allocation6 + $0x58] sm:$0xff]  ;;  %v145_v31 = vld [vmem:[#allocation6 + $0x40] sm:$0xff]  ;;  %p8161_p1 = por %p8160_p0, %p8159_p13 }
  0x60   :  { %v150_v27 = vld [vmem:[#allocation6 + $0x68] sm:$0xff]  ;;  %v152_v30 = vld [vmem:[#allocation6 + $0x78] sm:$0xff]  ;;  %v149_v32 = vld [vmem:[#allocation6 + $0x60] sm:$0xff] }
  0x61   :  { %5836 = vmatmul.mubr.msk.f32.vlgmr.msra.gmra.mrb[0].mxu0 %vm239_vm0, %v202_v12  ;;  %5946 = vmatprep.subr.bf16.mxu1 %v8380_v21  ;;  %v8389_v29 = vpack.c.bf16 %v150_v27, %v146_v26  ;;  %v203_v33 = vld [vmem:[%s9856_s0 + $0x8] sm:$0xff]  ;;  %v8396_v34 = vpack.c.bf16 %v152_v30, %v148_v28  ;;  %v8398_v35 = vpack.c.bf16 %v149_v32, %v145_v31  ;;  %v147_v36 = vld [vmem:[#allocation6 + $0x50] sm:$0xff]  ;;  %v156_v41 = vld [vmem:[#allocation6 + $0x98] sm:$0xff]  ;;  %p8162_p2 = pnand %p8161_p1, %p8155_p12 }
  0x62   :  { %5844 = vmatmul.mubr.msk.f32.vlgmr.msra.gmra.mrb[0].mxu1 %vm239_vm0, %v202_v12  ;;  %5916 = vmatpush1.bf16.msra.mxu0 %v8382_v22  ;;  %v151_v37 = vld [vmem:[#allocation6 + $0x70] sm:$0xff]  ;;  %v154_v39 = vld [vmem:[#allocation6 + $0x88] sm:$0xff]  ;;  %v160_v43 = vld [vmem:[#allocation6 + $0xb8] sm:$0xff] }
  0x63   :  { %5948 = vmatpush1.bf16.msra.mxu1 %v8385_v25  ;;  %334 = vmatprep.mubr.f32.mxu0 %v8191_v0  ;;  %v8402_v38 = vpack.c.bf16 %v151_v37, %v147_v36  ;;  %v158_v40 = vld [vmem:[#allocation6 + $0xa8] sm:$0xff]  ;;  %v153_v44 = vld [vmem:[#allocation6 + $0x80] sm:$0xff]  ;;  %v204_v46 = vld [vmem:[%s9856_s0 + $0x10] sm:$0xff]  ;;  %v8413_v47 = vpack.c.bf16 %v160_v43, %v156_v41 }
  0x64   :  { %447 = vmatprep.mubr.f32.mxu1 %v8191_v0  ;;  %5918 = vmatprep.subr.bf16.mxu0 %v8389_v29  ;;  %v8406_v42 = vpack.c.bf16 %v158_v40, %v154_v39  ;;  %v157_v45 = vld [vmem:[#allocation6 + $0xa0] sm:$0xff]  ;;  %v155_v48 = vld [vmem:[#allocation6 + $0x90] sm:$0xff]  ;;  %v162_v51 = vld [vmem:[#allocation6 + $0xc8] sm:$0xff] }
  0x65   :  { %5837 = vmatmul.mubr.msk.f32.gmra.mrb[2].mxu0 %vm239_vm0, %v203_v33  ;;  %5950 = vmatprep.subr.bf16.mxu1 %v8396_v34  ;;  %v159_v49 = vld [vmem:[#allocation6 + $0xb0] sm:$0xff]  ;;  %v8417_v50 = vpack.c.bf16 %v157_v45, %v153_v44  ;;  %v166_v52 = vld [vmem:[#allocation6 + $0xe8] sm:$0xff]  ;;  %v164_v53 = vld [vmem:[#allocation6 + $0xd8] sm:$0xff] }
  0x66   :  { %5845 = vmatmul.mubr.msk.f32.gmra.mrb[2].mxu1 %vm239_vm0, %v203_v33  ;;  %5920 = vmatpush1.bf16.msra.mxu0 %v8398_v35  ;;  %v8421_v54 = vpack.c.bf16 %v159_v49, %v155_v48  ;;  %v168_v55 = vld [vmem:[#allocation6 + $0xf8] sm:$0xff]  ;;  %v161_v56 = vld [vmem:[#allocation6 + $0xc0] sm:$0xff]  ;;  %v8425_v58 = vpack.c.bf16 %v166_v52, %v162_v51  ;;  %v163_v59 = vld [vmem:[#allocation6 + $0xd0] sm:$0xff] }
  0x67   :  { %5952 = vmatpush1.bf16.msra.mxu1 %v8402_v38  ;;  %340 = vmatprep.mubr.f32.mxu0 %v8191_v0  ;;  %v165_v57 = vld [vmem:[#allocation6 + $0xe0] sm:$0xff]  ;;  %v167_v60 = vld [vmem:[#allocation6 + $0xf0] sm:$0xff]  ;;  %v8429_v61 = vpack.c.bf16 %v168_v55, %v164_v53  ;;  %v170_v62 = vld [vmem:[#allocation6 + $0x108] sm:$0xff] }
  0x68   :  { %453 = vmatprep.mubr.f32.mxu1 %v8191_v0  ;;  %5922 = vmatprep.subr.bf16.mxu0 %v8406_v42  ;;  %v174_v63 = vld [vmem:[#allocation6 + $0x128] sm:$0xff]  ;;  %v205_v1 = vld [vmem:[%s9856_s0 + $0x18] sm:$0xff]  ;;  %v8436_v2 = vpack.c.bf16 %v165_v57, %v161_v56  ;;  %v8440_v5 = vpack.c.bf16 %v167_v60, %v163_v59  ;;  %v169_v6 = vld [vmem:[#allocation6 + $0x100] sm:$0xff] }
  0x69   :  { %5838 = vmatmul.mubr.msk.f32.gmra.mrb[4].mxu0 %vm239_vm0, %v204_v46  ;;  %5954 = vmatprep.subr.bf16.mxu1 %v8413_v47  ;;  %v172_v3 = vld [vmem:[#allocation6 + $0x118] sm:$0xff]  ;;  %v173_v7 = vld [vmem:[#allocation6 + $0x120] sm:$0xff]  ;;  %v8444_v8 = vpack.c.bf16 %v174_v63, %v170_v62  ;;  %v171_v9 = vld [vmem:[#allocation6 + $0x110] sm:$0xff] }
  0x6a   :  { %5846 = vmatmul.mubr.msk.f32.gmra.mrb[4].mxu1 %vm239_vm0, %v204_v46  ;;  %5924 = vmatpush1.bf16.msra.mxu0 %v8417_v50  ;;  %v176_v4 = vld [vmem:[#allocation6 + $0x138] sm:$0xff]  ;;  %v175_v10 = vld [vmem:[#allocation6 + $0x130] sm:$0xff]  ;;  %v178_v12 = vld [vmem:[#allocation6 + $0x148] sm:$0xff]  ;;  %v8455_v15 = vpack.c.bf16 %v173_v7, %v169_v6  ;;  %v219_v7 = vlaneseq }
  0x6b   :  { %5956 = vmatpush1.bf16.msra.mxu1 %v8421_v54  ;;  %346 = vmatprep.mubr.f32.mxu0 %v8191_v0  ;;  %v8448_v11 = vpack.c.bf16 %v176_v4, %v172_v3  ;;  %v182_v13 = vld [vmem:[#allocation6 + $0x168] sm:$0xff]  ;;  %v206_v14 = vld [vmem:[%s9856_s0 + $0x20] sm:$0xff]  ;;  %v180_v16 = vld [vmem:[#allocation6 + $0x158] sm:$0xff]  ;;  %v8459_v19 = vpack.c.bf16 %v175_v10, %v171_v9 }
  0x6c   :  { %459 = vmatprep.mubr.f32.mxu1 %v8191_v0  ;;  %5926 = vmatprep.subr.bf16.mxu0 %v8425_v58  ;;  %v184_v18 = vld [vmem:[#allocation6 + $0x178] sm:$0xff]  ;;  %v177_v20 = vld [vmem:[#allocation6 + $0x140] sm:$0xff]  ;;  %v8463_v24 = vpack.c.bf16 %v182_v13, %v178_v12  ;;  %v179_v26 = vld [vmem:[#allocation6 + $0x150] sm:$0xff]  ;;  %v220_v9 = vshrl.u32 %v219_v7, 7 }
  0x6d   :  { %5839 = vmatmul.mubr.msk.f32.gmra.mrb[6].mxu0 %vm239_vm0, %v205_v1  ;;  %5958 = vmatprep.subr.bf16.mxu1 %v8429_v61  ;;  %v181_v23 = vld [vmem:[#allocation6 + $0x160] sm:$0xff]  ;;  %v183_v27 = vld [vmem:[#allocation6 + $0x170] sm:$0xff]  ;;  %v8467_v28 = vpack.c.bf16 %v184_v18, %v180_v16  ;;  %v186_v30 = vld [vmem:[#allocation6 + $0x188] sm:$0xff] }
  0x6e   :  { %5847 = vmatmul.mubr.msk.f32.gmra.mrb[6].mxu1 %vm239_vm0, %v205_v1  ;;  %5928 = vmatpush1.bf16.msra.mxu0 %v8436_v2  ;;  %v190_v31 = vld [vmem:[#allocation6 + $0x1a8] sm:$0xff]  ;;  %v8474_v33 = vpack.c.bf16 %v181_v23, %v177_v20  ;;  %v188_v36 = vld [vmem:[#allocation6 + $0x198] sm:$0xff]  ;;  %v8478_v39 = vpack.c.bf16 %v183_v27, %v179_v26  ;;  %v185_v40 = vld [vmem:[#allocation6 + $0x180] sm:$0xff]  ;;  %v8565_v10 = vsub.s32 0, %v220_v9  ;;  %v8570_v13 = vsub.s32 1, %v220_v9 }
  0x6f   :  { %5960 = vmatpush1.bf16.msra.mxu1 %v8440_v5  ;;  %352 = vmatprep.mubr.f32.mxu0 %v8191_v0  ;;  %v207_v32 = vld [vmem:[%s9856_s0 + $0x28] sm:$0xff]  ;;  %v192_v37 = vld [vmem:[#allocation6 + $0x1b8] sm:$0xff]  ;;  %v189_v41 = vld [vmem:[#allocation6 + $0x1a0] sm:$0xff]  ;;  %v8482_v43 = vpack.c.bf16 %v190_v31, %v186_v30  ;;  %v8575_v16 = vsub.s32 2, %v220_v9  ;;  %v8584_v31 = vsub.s32 3, %v220_v9 }
  0x70   :  { %465 = vmatprep.mubr.f32.mxu1 %v8191_v0  ;;  %5930 = vmatprep.subr.bf16.mxu0 %v8444_v8  ;;  %v187_v44 = vld [vmem:[#allocation6 + $0x190] sm:$0xff]  ;;  %v8486_v46 = vpack.c.bf16 %v192_v37, %v188_v36  ;;  %v194_v48 = vld [vmem:[#allocation6 + $0x1c8] sm:$0xff]  ;;  %v8493_v52 = vpack.c.bf16 %v189_v41, %v185_v40  ;;  %v196_v53 = vld [vmem:[#allocation6 + $0x1d8] sm:$0xff] }
  0x71   :  { %5840 = vmatmul.mubr.msk.f32.gmra.mrb[8].mxu0 %vm239_vm0, %v206_v14  ;;  %5962 = vmatprep.subr.bf16.mxu1 %v8448_v11  ;;  %v191_v45 = vld [vmem:[#allocation6 + $0x1b0] sm:$0xff]  ;;  %v198_v49 = vld [vmem:[#allocation6 + $0x1e8] sm:$0xff]  ;;  %v200_v55 = vld [vmem:[#allocation6 + $0x1f8] sm:$0xff] }
  0x72   :  { %5848 = vmatmul.mubr.msk.f32.gmra.mrb[8].mxu1 %vm239_vm0, %v206_v14  ;;  %5932 = vmatpush1.bf16.msra.mxu0 %v8455_v15  ;;  %v208_v51 = vld [vmem:[%s9856_s0 + $0x30] sm:$0xff]  ;;  %v8497_v56 = vpack.c.bf16 %v191_v45, %v187_v44  ;;  %v193_v57 = vld [vmem:[#allocation6 + $0x1c0] sm:$0xff]  ;;  %v8501_v60 = vpack.c.bf16 %v198_v49, %v194_v48  ;;  %v8505_v1 = vpack.c.bf16 %v200_v55, %v196_v53  ;;  %v209_v3 = vld [vmem:[%s9856_s0 + $0x38] sm:$0xff] }
  0x73   :  { %5964 = vmatpush1.bf16.msra.mxu1 %v8459_v19  ;;  %358 = vmatprep.mubr.f32.mxu0 %v8191_v0  ;;  %v197_v59 = vld [vmem:[#allocation6 + $0x1e0] sm:$0xff]  ;;  %v195_v62 = vld [vmem:[#allocation6 + $0x1d0] sm:$0xff] }
  0x74   :  { %471 = vmatprep.mubr.f32.mxu1 %v8191_v0  ;;  %5934 = vmatprep.subr.bf16.mxu0 %v8463_v24  ;;  %v199_v63 = vld [vmem:[#allocation6 + $0x1f0] sm:$0xff]  ;;  %v8512_v4 = vpack.c.bf16 %v197_v59, %v193_v57  ;;  %v201_v12 = vld [vmem:[%s9859_s3] sm:$0xf] }
  0x75   :  { %5841 = vmatmul.mubr.msk.f32.gmra.mrb[10].mxu0 %vm239_vm0, %v207_v32  ;;  %5966 = vmatprep.subr.bf16.mxu1 %v8467_v28  ;;  %v8516_v6 = vpack.c.bf16 %v199_v63, %v195_v62  ;;  %v8573_v14 = vrot.slane %v201_v12, %v8565_v10  ;;  %v8578_v18 = vrot.slane %v201_v12, %v8570_v13 }
  0x76   :  { %5849 = vmatmul.mubr.msk.f32.gmra.mrb[10].mxu1 %vm239_vm0, %v207_v32  ;;  %5936 = vmatpush1.bf16.msra.mxu0 %v8474_v33  ;;  %v8582_v26 = vrot.slane %v201_v12, %v8575_v16  ;;  %v8589_v44 = vrot.slane %v201_v12, %v8584_v31 }
  0x77   :  { %5968 = vmatpush1.bf16.msra.mxu1 %v8478_v39  ;;  %364 = vmatprep.mubr.f32.mxu0 %v8191_v0 }
  0x78   :  { %477 = vmatprep.mubr.f32.mxu1 %v8191_v0  ;;  %5938 = vmatprep.subr.bf16.mxu0 %v8482_v43 }
  0x79   :  { %5842 = vmatmul.mubr.msk.f32.gmra.mrb[12].mxu0 %vm239_vm0, %v208_v51  ;;  %5970 = vmatprep.subr.bf16.mxu1 %v8486_v46 }
  0x7a   :  { %5850 = vmatmul.mubr.msk.f32.gmra.mrb[12].mxu1 %vm239_vm0, %v208_v51  ;;  %5940 = vmatpush1.bf16.msra.mxu0 %v8493_v52 }
  0x7b   :  { %5972 = vmatpush1.bf16.msra.mxu1 %v8497_v56  ;;  %370 = vmatprep.mubr.f32.mxu0 %v8191_v0 }
  0x7c   :  { %483 = vmatprep.mubr.f32.mxu1 %v8191_v0  ;;  %5942 = vmatprep.subr.bf16.mxu0 %v8501_v60 }
  0x7d   :  { %5843 = vmatmul.mubr.msk.f32.gmra.mrb[14].mxu0 %vm239_vm0, %v209_v3  ;;  %5974 = vmatprep.subr.bf16.mxu1 %v8505_v1 }
  0x7e   :  { %5851 = vmatmul.mubr.msk.f32.gmra.mrb[14].mxu1 %vm239_vm0, %v209_v3  ;;  %5944 = vmatpush1.bf16.msra.mxu0 %v8512_v4 }
  0x7f   :  { %5976 = vmatpush1.bf16.msra.mxu1 %v8516_v6  ;;  %595 = vmatprep.mubr.f32.mxu0 %v8191_v0 }
  0x80   :  { %666 = vmatprep.mubr.f32.mxu1 %v8191_v0  ;;  %5978 = vmatprep.subr.bf16.mxu0 %v8378_v17 }
  0x81   :  { %596 = vmatmul.mubr.f32.vlgmr.msra.gmra.mrb[0].mxu0 %v8191_v0  ;;  %6010 = vmatprep.subr.bf16.mxu1 %v8380_v21 }
  0x82   :  { %667 = vmatmul.mubr.f32.vlgmr.msra.gmra.mrb[0].mxu1 %v8191_v0  ;;  %5980 = vmatpush1.bf16.msra.mxu0 %v8382_v22 }
  0x83   :  { %6012 = vmatpush1.bf16.msra.mxu1 %v8385_v25  ;;  %5982 = vmatprep.subr.bf16.mxu0 %v8389_v29 }
  0x84   :  { %6014 = vmatprep.subr.bf16.mxu1 %v8396_v34  ;;  %778 = vmatprep.mubr.f32.mxu0 %v8191_v0 }
  0x85   :  { %849 = vmatprep.mubr.f32.mxu1 %v8191_v0 }
  0x86   :  { %5984 = vmatpush1.bf16.msra.mxu0 %v8398_v35 }
  0x87   :  { %6016 = vmatpush1.bf16.msra.mxu1 %v8402_v38  ;;  %5986 = vmatprep.subr.bf16.mxu0 %v8406_v42 }
  0x88   :  { %6018 = vmatprep.subr.bf16.mxu1 %v8413_v47 }
  0x8a   :  { %5988 = vmatpush1.bf16.msra.mxu0 %v8417_v50 }
  0x8b   :  { %6020 = vmatpush1.bf16.msra.mxu1 %v8421_v54  ;;  %5990 = vmatprep.subr.bf16.mxu0 %v8425_v58 }
  0x8c   :  { %6022 = vmatprep.subr.bf16.mxu1 %v8429_v61 }
  0x8e   :  { %5992 = vmatpush1.bf16.msra.mxu0 %v8436_v2 }
  0x8f   :  { %6024 = vmatpush1.bf16.msra.mxu1 %v8440_v5  ;;  %5994 = vmatprep.subr.bf16.mxu0 %v8444_v8 }
  0x90   :  { %6026 = vmatprep.subr.bf16.mxu1 %v8448_v11 }
  0x92   :  { %5996 = vmatpush1.bf16.msra.mxu0 %v8455_v15 }
  0x93   :  { %6028 = vmatpush1.bf16.msra.mxu1 %v8459_v19  ;;  %5998 = vmatprep.subr.bf16.mxu0 %v8463_v24 }
  0x94   :  { %6030 = vmatprep.subr.bf16.mxu1 %v8467_v28 }
  0x96   :  { %6000 = vmatpush1.bf16.msra.mxu0 %v8474_v33 }
  0x97   :  { %6032 = vmatpush1.bf16.msra.mxu1 %v8478_v39  ;;  %6002 = vmatprep.subr.bf16.mxu0 %v8482_v43 }
  0x98   :  { %6034 = vmatprep.subr.bf16.mxu1 %v8486_v46 }
  0x9a   :  { %6004 = vmatpush1.bf16.msra.mxu0 %v8493_v52 }
  0x9b   :  { %6036 = vmatpush1.bf16.msra.mxu1 %v8497_v56  ;;  %6006 = vmatprep.subr.bf16.mxu0 %v8501_v60 }
  0x9c   :  { %6038 = vmatprep.subr.bf16.mxu1 %v8505_v1 }
  0x9e   :  { %6008 = vmatpush1.bf16.msra.mxu0 %v8512_v4 }
  0x9f   :  { %6040 = vmatpush1.bf16.msra.mxu1 %v8516_v6  ;;  %6042 = vmatprep.subr.bf16.mxu0 %v8378_v17 }
  0xa0   :  { %6074 = vmatprep.subr.bf16.mxu1 %v8380_v21 }
 0x154   :  { %v597_v20 = vpop.f32.mrb[0].mxu0 }
 0x155   :  { %v7601_v23 = vadd.f32 %v597_v20, %v8573_v14  ;;  %v668_v27 = vpop.f32.mrb[0].mxu1  ;;  %v599_v30 = vpop.f32.mrb[1].mxu0 }
 0x156   :  { %v7602_v32 = vadd.f32 %v599_v30, %v8578_v18  ;;  %v670_v36 = vpop.f32.mrb[1].mxu1  ;;  %v7617_v41 = vadd.f32 %v668_v27, %v8582_v26 }
 0x157   :  { %v677_v37 = vmul.f32 0.5, %v7601_v23  ;;  %v7618_v45 = vadd.f32 %v670_v36, %v8589_v44 }
 0x158   :  { %v678_v40 = vmul.f32 0.5, %v7602_v32 }
 0x159   :  { %7804 = vtanh.f32 %v677_v37  ;;  %v680_v48 = vmul.f32 0.5, %v7618_v45 }
 0x15a   :  { %7806 = vtanh.f32 %v678_v40 }
 0x15b   :  { %7808 = vtanh.f32 %v7617_v41 }
 0x15c   :  { %7810 = vtanh.f32 %v680_v48 }
 0x163   :  { %v7805_v49 = vpop.eup %7804 }
 0x164   :  { %v7807_v51 = vpop.eup %7806  ;;  %v689_v53 = vmul.f32 0.5, %v7805_v49 }
 0x165   :  { %v690_v55 = vmul.f32 0.5, %v7807_v51  ;;  %v7809_v59 = vpop.eup %7808 }
 0x166   :  { %v693_v57 = vadd.f32 0.5, %v689_v53  ;;  %v7811_v9 = vpop.eup %7810 }
 0x167   :  { %v694_v62 = vadd.f32 0.5, %v690_v55  ;;  %v692_v12 = vmul.f32 0.5, %v7811_v9 }
 0x168   :  { %v702_v63 = vmul.f32 %v7809_v59, %v693_v57 }
 0x169   :  { %v701_v3 = vmul.f32 0.0, %v694_v62  ;;  %v696_v20 = vadd.f32 0.5, %v692_v12 }
 0x16b   :  { %v8592_v7 = vadd.f32 %v702_v63, %v701_v3 }
 0x16d   :  { %7812 = vtanh.f32 %v8592_v7 }
 0x177   :  { %v7813_v23 = vpop.eup %7812 }
 0x178   :  { %v8595_v27 = vmul.f32 %v7813_v23, %v696_v20 }
 0x17a   :  { %779 = vmatmul.mubr.f32.vlgmr.msra.gmra.mrb[2].mxu0 %v8595_v27  ;;  %850 = vmatmul.mubr.f32.vlgmr.msra.gmra.mrb[2].mxu1 %v8595_v27 }
 0x17b   :  { %6044 = vmatpush1.bf16.msra.mxu0 %v8382_v22  ;;  %6076 = vmatpush1.bf16.msra.mxu1 %v8385_v25 }
 0x17c   :  { %6046 = vmatprep.subr.bf16.mxu0 %v8389_v29  ;;  %6078 = vmatprep.subr.bf16.mxu1 %v8396_v34 }
 0x17d   :  { %962 = vmatprep.mubr.f32.mxu0 %v8191_v0  ;;  %1033 = vmatprep.mubr.f32.mxu1 %v8191_v0 }
 0x17f   :  { %6048 = vmatpush1.bf16.msra.mxu0 %v8398_v35  ;;  %6080 = vmatpush1.bf16.msra.mxu1 %v8402_v38 }
 0x180   :  { %6050 = vmatprep.subr.bf16.mxu0 %v8406_v42  ;;  %6082 = vmatprep.subr.bf16.mxu1 %v8413_v47 }
 0x183   :  { %6052 = vmatpush1.bf16.msra.mxu0 %v8417_v50  ;;  %6084 = vmatpush1.bf16.msra.mxu1 %v8421_v54 }
 0x184   :  { %6054 = vmatprep.subr.bf16.mxu0 %v8425_v58  ;;  %6086 = vmatprep.subr.bf16.mxu1 %v8429_v61 }
 0x187   :  { %6056 = vmatpush1.bf16.msra.mxu0 %v8436_v2  ;;  %6088 = vmatpush1.bf16.msra.mxu1 %v8440_v5 }
 0x188   :  { %6058 = vmatprep.subr.bf16.mxu0 %v8444_v8  ;;  %6090 = vmatprep.subr.bf16.mxu1 %v8448_v11 }
 0x18b   :  { %6060 = vmatpush1.bf16.msra.mxu0 %v8455_v15  ;;  %6092 = vmatpush1.bf16.msra.mxu1 %v8459_v19 }
 0x18c   :  { %6062 = vmatprep.subr.bf16.mxu0 %v8463_v24  ;;  %6094 = vmatprep.subr.bf16.mxu1 %v8467_v28 }
 0x18f   :  { %6064 = vmatpush1.bf16.msra.mxu0 %v8474_v33  ;;  %6096 = vmatpush1.bf16.msra.mxu1 %v8478_v39 }
 0x190   :  { %6066 = vmatprep.subr.bf16.mxu0 %v8482_v43  ;;  %6098 = vmatprep.subr.bf16.mxu1 %v8486_v46 }
 0x193   :  { %6068 = vmatpush1.bf16.msra.mxu0 %v8493_v52  ;;  %6100 = vmatpush1.bf16.msra.mxu1 %v8497_v56 }
 0x194   :  { %6070 = vmatprep.subr.bf16.mxu0 %v8501_v60  ;;  %6102 = vmatprep.subr.bf16.mxu1 %v8505_v1 }
 0x197   :  { %6072 = vmatpush1.bf16.msra.mxu0 %v8512_v4  ;;  %6104 = vmatpush1.bf16.msra.mxu1 %v8516_v6 }
 0x198   :  { %6106 = vmatprep.subr.bf16.mxu0 %v8378_v17  ;;  %6138 = vmatprep.subr.bf16.mxu1 %v8380_v21 }
 0x24d   :  { %v780_v30 = vpop.f32.mrb[2].mxu0  ;;  %v851_v32 = vpop.f32.mrb[2].mxu1 }
 0x24e   :  { %v7603_v36 = vadd.f32 %v780_v30, %v8573_v14  ;;  %v782_v37 = vpop.f32.mrb[3].mxu0  ;;  %v853_v40 = vpop.f32.mrb[3].mxu1  ;;  %v7619_v49 = vadd.f32 %v851_v32, %v8582_v26 }
 0x24f   :  { %v7604_v41 = vadd.f32 %v782_v37, %v8578_v18  ;;  %v7620_v51 = vadd.f32 %v853_v40, %v8589_v44 }
 0x250   :  { %v860_v45 = vmul.f32 0.5, %v7603_v36 }
 0x251   :  { %v861_v48 = vmul.f32 0.5, %v7604_v41  ;;  %v863_v53 = vmul.f32 0.5, %v7620_v51 }
 0x252   :  { %7814 = vtanh.f32 %v860_v45 }
 0x253   :  { %7816 = vtanh.f32 %v861_v48 }
 0x254   :  { %7818 = vtanh.f32 %v7619_v49 }
 0x255   :  { %7820 = vtanh.f32 %v863_v53 }
 0x25c   :  { %v7815_v55 = vpop.eup %7814 }
 0x25d   :  { %v7817_v57 = vpop.eup %7816  ;;  %v872_v59 = vmul.f32 0.5, %v7815_v55 }
 0x25e   :  { %v873_v62 = vmul.f32 0.5, %v7817_v57  ;;  %v7819_v3 = vpop.eup %7818 }
 0x25f   :  { %v876_v63 = vadd.f32 0.5, %v872_v59  ;;  %v7821_v30 = vpop.eup %7820 }
 0x260   :  { %v877_v9 = vadd.f32 0.5, %v873_v62  ;;  %v875_v32 = vmul.f32 0.5, %v7821_v30 }
 0x261   :  { %v885_v12 = vmul.f32 %v7819_v3, %v876_v63 }
 0x262   :  { %v884_v20 = vmul.f32 %v877_v9, %v8592_v7  ;;  %v879_v36 = vadd.f32 0.5, %v875_v32 }
 0x264   :  { %v8638_v23 = vadd.f32 %v885_v12, %v884_v20 }
 0x266   :  { %7822 = vtanh.f32 %v8638_v23 }
 0x270   :  { %v7823_v37 = vpop.eup %7822 }
 0x271   :  { %v8641_v40 = vmul.f32 %v7823_v37, %v879_v36 }
 0x273   :  { %963 = vmatmul.mubr.f32.vlgmr.msra.gmra.mrb[4].mxu0 %v8641_v40  ;;  %1034 = vmatmul.mubr.f32.vlgmr.msra.gmra.mrb[4].mxu1 %v8641_v40 }
 0x274   :  { %6108 = vmatpush1.bf16.msra.mxu0 %v8382_v22  ;;  %6140 = vmatpush1.bf16.msra.mxu1 %v8385_v25 }
 0x275   :  { %6110 = vmatprep.subr.bf16.mxu0 %v8389_v29  ;;  %6142 = vmatprep.subr.bf16.mxu1 %v8396_v34 }
 0x276   :  { %1146 = vmatprep.mubr.f32.mxu0 %v8191_v0  ;;  %1217 = vmatprep.mubr.f32.mxu1 %v8191_v0 }
 0x278   :  { %6112 = vmatpush1.bf16.msra.mxu0 %v8398_v35  ;;  %6144 = vmatpush1.bf16.msra.mxu1 %v8402_v38 }
 0x279   :  { %6114 = vmatprep.subr.bf16.mxu0 %v8406_v42  ;;  %6146 = vmatprep.subr.bf16.mxu1 %v8413_v47 }
 0x27c   :  { %6116 = vmatpush1.bf16.msra.mxu0 %v8417_v50  ;;  %6148 = vmatpush1.bf16.msra.mxu1 %v8421_v54 }
 0x27d   :  { %6118 = vmatprep.subr.bf16.mxu0 %v8425_v58  ;;  %6150 = vmatprep.subr.bf16.mxu1 %v8429_v61 }
 0x280   :  { %6120 = vmatpush1.bf16.msra.mxu0 %v8436_v2  ;;  %6152 = vmatpush1.bf16.msra.mxu1 %v8440_v5 }
 0x281   :  { %6122 = vmatprep.subr.bf16.mxu0 %v8444_v8  ;;  %6154 = vmatprep.subr.bf16.mxu1 %v8448_v11 }
 0x284   :  { %6124 = vmatpush1.bf16.msra.mxu0 %v8455_v15  ;;  %6156 = vmatpush1.bf16.msra.mxu1 %v8459_v19 }
 0x285   :  { %6126 = vmatprep.subr.bf16.mxu0 %v8463_v24  ;;  %6158 = vmatprep.subr.bf16.mxu1 %v8467_v28 }
 0x288   :  { %6128 = vmatpush1.bf16.msra.mxu0 %v8474_v33  ;;  %6160 = vmatpush1.bf16.msra.mxu1 %v8478_v39 }
 0x289   :  { %6130 = vmatprep.subr.bf16.mxu0 %v8482_v43  ;;  %6162 = vmatprep.subr.bf16.mxu1 %v8486_v46 }
 0x28c   :  { %6132 = vmatpush1.bf16.msra.mxu0 %v8493_v52  ;;  %6164 = vmatpush1.bf16.msra.mxu1 %v8497_v56 }
 0x28d   :  { %6134 = vmatprep.subr.bf16.mxu0 %v8501_v60  ;;  %6166 = vmatprep.subr.bf16.mxu1 %v8505_v1 }
 0x290   :  { %6136 = vmatpush1.bf16.msra.mxu0 %v8512_v4  ;;  %6168 = vmatpush1.bf16.msra.mxu1 %v8516_v6 }
 0x291   :  { %6170 = vmatprep.subr.bf16.mxu0 %v8378_v17  ;;  %6202 = vmatprep.subr.bf16.mxu1 %v8380_v21 }
 0x346   :  { %v964_v7 = vpop.f32.mrb[4].mxu0  ;;  %v1035_v41 = vpop.f32.mrb[4].mxu1 }
 0x347   :  { %v7605_v45 = vadd.f32 %v964_v7, %v8573_v14  ;;  %v966_v48 = vpop.f32.mrb[5].mxu0  ;;  %v1037_v49 = vpop.f32.mrb[5].mxu1  ;;  %v7621_v57 = vadd.f32 %v1035_v41, %v8582_v26 }
 0x348   :  { %v7606_v51 = vadd.f32 %v966_v48, %v8578_v18  ;;  %v7622_v59 = vadd.f32 %v1037_v49, %v8589_v44 }
 0x349   :  { %v1044_v53 = vmul.f32 0.5, %v7605_v45 }
 0x34a   :  { %v1045_v55 = vmul.f32 0.5, %v7606_v51  ;;  %v1047_v62 = vmul.f32 0.5, %v7622_v59 }
 0x34b   :  { %7824 = vtanh.f32 %v1044_v53 }
 0x34c   :  { %7826 = vtanh.f32 %v1045_v55 }
 0x34d   :  { %7828 = vtanh.f32 %v7621_v57 }
 0x34e   :  { %7830 = vtanh.f32 %v1047_v62 }
 0x355   :  { %v7825_v63 = vpop.eup %7824 }
 0x356   :  { %v7827_v3 = vpop.eup %7826  ;;  %v1056_v9 = vmul.f32 0.5, %v7825_v63 }
 0x357   :  { %v1057_v12 = vmul.f32 0.5, %v7827_v3  ;;  %v7829_v30 = vpop.eup %7828 }
 0x358   :  { %v1060_v20 = vadd.f32 0.5, %v1056_v9  ;;  %v7831_v41 = vpop.eup %7830 }
 0x359   :  { %v1061_v32 = vadd.f32 0.5, %v1057_v12  ;;  %v1059_v45 = vmul.f32 0.5, %v7831_v41 }
 0x35a   :  { %v1069_v36 = vmul.f32 %v7829_v30, %v1060_v20 }
 0x35b   :  { %v1068_v37 = vmul.f32 %v1061_v32, %v8638_v23  ;;  %v1063_v48 = vadd.f32 0.5, %v1059_v45 }
 0x35d   :  { %v8684_v7 = vadd.f32 %v1069_v36, %v1068_v37 }
 0x35f   :  { %7832 = vtanh.f32 %v8684_v7 }
 0x369   :  { %v7833_v49 = vpop.eup %7832 }
 0x36a   :  { %v8687_v51 = vmul.f32 %v7833_v49, %v1063_v48 }
 0x36c   :  { %1147 = vmatmul.mubr.f32.vlgmr.msra.gmra.mrb[6].mxu0 %v8687_v51  ;;  %1218 = vmatmul.mubr.f32.vlgmr.msra.gmra.mrb[6].mxu1 %v8687_v51 }
 0x36d   :  { %6172 = vmatpush1.bf16.msra.mxu0 %v8382_v22  ;;  %6204 = vmatpush1.bf16.msra.mxu1 %v8385_v25 }
 0x36e   :  { %6174 = vmatprep.subr.bf16.mxu0 %v8389_v29  ;;  %6206 = vmatprep.subr.bf16.mxu1 %v8396_v34 }
 0x36f   :  { %1330 = vmatprep.mubr.f32.mxu0 %v8191_v0  ;;  %1401 = vmatprep.mubr.f32.mxu1 %v8191_v0 }
 0x371   :  { %6176 = vmatpush1.bf16.msra.mxu0 %v8398_v35  ;;  %6208 = vmatpush1.bf16.msra.mxu1 %v8402_v38 }
 0x372   :  { %6178 = vmatprep.subr.bf16.mxu0 %v8406_v42  ;;  %6210 = vmatprep.subr.bf16.mxu1 %v8413_v47 }
 0x375   :  { %6180 = vmatpush1.bf16.msra.mxu0 %v8417_v50  ;;  %6212 = vmatpush1.bf16.msra.mxu1 %v8421_v54 }
 0x376   :  { %6182 = vmatprep.subr.bf16.mxu0 %v8425_v58  ;;  %6214 = vmatprep.subr.bf16.mxu1 %v8429_v61 }
 0x379   :  { %6184 = vmatpush1.bf16.msra.mxu0 %v8436_v2  ;;  %6216 = vmatpush1.bf16.msra.mxu1 %v8440_v5 }
 0x37a   :  { %6186 = vmatprep.subr.bf16.mxu0 %v8444_v8  ;;  %6218 = vmatprep.subr.bf16.mxu1 %v8448_v11 }
 0x37d   :  { %6188 = vmatpush1.bf16.msra.mxu0 %v8455_v15  ;;  %6220 = vmatpush1.bf16.msra.mxu1 %v8459_v19 }
 0x37e   :  { %6190 = vmatprep.subr.bf16.mxu0 %v8463_v24  ;;  %6222 = vmatprep.subr.bf16.mxu1 %v8467_v28 }
 0x381   :  { %6192 = vmatpush1.bf16.msra.mxu0 %v8474_v33  ;;  %6224 = vmatpush1.bf16.msra.mxu1 %v8478_v39 }
 0x382   :  { %6194 = vmatprep.subr.bf16.mxu0 %v8482_v43  ;;  %6226 = vmatprep.subr.bf16.mxu1 %v8486_v46 }
 0x385   :  { %6196 = vmatpush1.bf16.msra.mxu0 %v8493_v52  ;;  %6228 = vmatpush1.bf16.msra.mxu1 %v8497_v56 }
 0x386   :  { %6198 = vmatprep.subr.bf16.mxu0 %v8501_v60  ;;  %6230 = vmatprep.subr.bf16.mxu1 %v8505_v1 }
 0x389   :  { %6200 = vmatpush1.bf16.msra.mxu0 %v8512_v4  ;;  %6232 = vmatpush1.bf16.msra.mxu1 %v8516_v6 }
 0x38a   :  { %6234 = vmatprep.subr.bf16.mxu0 %v8378_v17  ;;  %6266 = vmatprep.subr.bf16.mxu1 %v8380_v21 }
 0x43f   :  { %v1148_v23 = vpop.f32.mrb[6].mxu0  ;;  %v1219_v53 = vpop.f32.mrb[6].mxu1 }
 0x440   :  { %v7607_v55 = vadd.f32 %v1148_v23, %v8573_v14  ;;  %v1150_v57 = vpop.f32.mrb[7].mxu0  ;;  %v1221_v59 = vpop.f32.mrb[7].mxu1  ;;  %v7623_v9 = vadd.f32 %v1219_v53, %v8582_v26 }
 0x441   :  { %v7608_v62 = vadd.f32 %v1150_v57, %v8578_v18  ;;  %v7624_v12 = vadd.f32 %v1221_v59, %v8589_v44 }
 0x442   :  { %v1228_v63 = vmul.f32 0.5, %v7607_v55 }
 0x443   :  { %v1229_v3 = vmul.f32 0.5, %v7608_v62  ;;  %v1231_v20 = vmul.f32 0.5, %v7624_v12 }
 0x444   :  { %7834 = vtanh.f32 %v1228_v63 }
 0x445   :  { %7836 = vtanh.f32 %v1229_v3 }
 0x446   :  { %7838 = vtanh.f32 %v7623_v9 }
 0x447   :  { %7840 = vtanh.f32 %v1231_v20 }
 0x44e   :  { %v7835_v30 = vpop.eup %7834 }
 0x44f   :  { %v7837_v32 = vpop.eup %7836  ;;  %v1240_v36 = vmul.f32 0.5, %v7835_v30 }
 0x450   :  { %v1241_v37 = vmul.f32 0.5, %v7837_v32  ;;  %v7839_v45 = vpop.eup %7838 }
 0x451   :  { %v1244_v41 = vadd.f32 0.5, %v1240_v36  ;;  %v7841_v53 = vpop.eup %7840 }
 0x452   :  { %v1245_v48 = vadd.f32 0.5, %v1241_v37  ;;  %v1243_v57 = vmul.f32 0.5, %v7841_v53 }
 0x453   :  { %v1253_v49 = vmul.f32 %v7839_v45, %v1244_v41 }
 0x454   :  { %v1252_v23 = vmul.f32 %v1245_v48, %v8684_v7  ;;  %v1247_v62 = vadd.f32 0.5, %v1243_v57 }
 0x456   :  { %v8730_v55 = vadd.f32 %v1253_v49, %v1252_v23 }
 0x458   :  { %7842 = vtanh.f32 %v8730_v55 }
 0x462   :  { %v7843_v59 = vpop.eup %7842 }
 0x463   :  { %v8733_v63 = vmul.f32 %v7843_v59, %v1247_v62 }
 0x465   :  { %1331 = vmatmul.mubr.f32.vlgmr.msra.gmra.mrb[8].mxu0 %v8733_v63  ;;  %1402 = vmatmul.mubr.f32.vlgmr.msra.gmra.mrb[8].mxu1 %v8733_v63 }
 0x466   :  { %6236 = vmatpush1.bf16.msra.mxu0 %v8382_v22  ;;  %6268 = vmatpush1.bf16.msra.mxu1 %v8385_v25 }
 0x467   :  { %6238 = vmatprep.subr.bf16.mxu0 %v8389_v29  ;;  %6270 = vmatprep.subr.bf16.mxu1 %v8396_v34 }
 0x468   :  { %1514 = vmatprep.mubr.f32.mxu0 %v8191_v0  ;;  %1585 = vmatprep.mubr.f32.mxu1 %v8191_v0 }
 0x46a   :  { %6240 = vmatpush1.bf16.msra.mxu0 %v8398_v35  ;;  %6272 = vmatpush1.bf16.msra.mxu1 %v8402_v38 }
 0x46b   :  { %6242 = vmatprep.subr.bf16.mxu0 %v8406_v42  ;;  %6274 = vmatprep.subr.bf16.mxu1 %v8413_v47 }
 0x46e   :  { %6244 = vmatpush1.bf16.msra.mxu0 %v8417_v50  ;;  %6276 = vmatpush1.bf16.msra.mxu1 %v8421_v54 }
 0x46f   :  { %6246 = vmatprep.subr.bf16.mxu0 %v8425_v58  ;;  %6278 = vmatprep.subr.bf16.mxu1 %v8429_v61 }
 0x472   :  { %6248 = vmatpush1.bf16.msra.mxu0 %v8436_v2  ;;  %6280 = vmatpush1.bf16.msra.mxu1 %v8440_v5 }
 0x473   :  { %6250 = vmatprep.subr.bf16.mxu0 %v8444_v8  ;;  %6282 = vmatprep.subr.bf16.mxu1 %v8448_v11 }
 0x476   :  { %6252 = vmatpush1.bf16.msra.mxu0 %v8455_v15  ;;  %6284 = vmatpush1.bf16.msra.mxu1 %v8459_v19 }
 0x477   :  { %6254 = vmatprep.subr.bf16.mxu0 %v8463_v24  ;;  %6286 = vmatprep.subr.bf16.mxu1 %v8467_v28 }
 0x47a   :  { %6256 = vmatpush1.bf16.msra.mxu0 %v8474_v33  ;;  %6288 = vmatpush1.bf16.msra.mxu1 %v8478_v39 }
 0x47b   :  { %6258 = vmatprep.subr.bf16.mxu0 %v8482_v43  ;;  %6290 = vmatprep.subr.bf16.mxu1 %v8486_v46 }
 0x47e   :  { %6260 = vmatpush1.bf16.msra.mxu0 %v8493_v52  ;;  %6292 = vmatpush1.bf16.msra.mxu1 %v8497_v56 }
 0x47f   :  { %6262 = vmatprep.subr.bf16.mxu0 %v8501_v60  ;;  %6294 = vmatprep.subr.bf16.mxu1 %v8505_v1 }
 0x482   :  { %6264 = vmatpush1.bf16.msra.mxu0 %v8512_v4  ;;  %6296 = vmatpush1.bf16.msra.mxu1 %v8516_v6 }
 0x483   :  { %6298 = vmatprep.subr.bf16.mxu0 %v8378_v17  ;;  %6330 = vmatprep.subr.bf16.mxu1 %v8380_v21 }
 0x538   :  { %v1332_v7 = vpop.f32.mrb[8].mxu0  ;;  %v1403_v3 = vpop.f32.mrb[8].mxu1 }
 0x539   :  { %v7609_v9 = vadd.f32 %v1332_v7, %v8573_v14  ;;  %v1334_v12 = vpop.f32.mrb[9].mxu0  ;;  %v1405_v20 = vpop.f32.mrb[9].mxu1  ;;  %v7625_v37 = vadd.f32 %v1403_v3, %v8582_v26 }
 0x53a   :  { %v7610_v30 = vadd.f32 %v1334_v12, %v8578_v18  ;;  %v7626_v41 = vadd.f32 %v1405_v20, %v8589_v44 }
 0x53b   :  { %v1412_v32 = vmul.f32 0.5, %v7609_v9 }
 0x53c   :  { %v1413_v36 = vmul.f32 0.5, %v7610_v30  ;;  %v1415_v45 = vmul.f32 0.5, %v7626_v41 }
 0x53d   :  { %7844 = vtanh.f32 %v1412_v32 }
 0x53e   :  { %7846 = vtanh.f32 %v1413_v36 }
 0x53f   :  { %7848 = vtanh.f32 %v7625_v37 }
 0x540   :  { %7850 = vtanh.f32 %v1415_v45 }
 0x547   :  { %v7845_v48 = vpop.eup %7844 }
 0x548   :  { %v7847_v49 = vpop.eup %7846  ;;  %v1424_v23 = vmul.f32 0.5, %v7845_v48 }
 0x549   :  { %v1425_v53 = vmul.f32 0.5, %v7847_v49  ;;  %v7849_v62 = vpop.eup %7848 }
 0x54a   :  { %v1428_v57 = vadd.f32 0.5, %v1424_v23  ;;  %v7851_v3 = vpop.eup %7850 }
 0x54b   :  { %v1429_v59 = vadd.f32 0.5, %v1425_v53  ;;  %v1427_v30 = vmul.f32 0.5, %v7851_v3 }
 0x54c   :  { %v1437_v7 = vmul.f32 %v7849_v62, %v1428_v57 }
 0x54d   :  { %v1436_v9 = vmul.f32 %v1429_v59, %v8730_v55  ;;  %v1431_v32 = vadd.f32 0.5, %v1427_v30 }
 0x54f   :  { %v8776_v12 = vadd.f32 %v1437_v7, %v1436_v9 }
 0x551   :  { %7852 = vtanh.f32 %v8776_v12 }
 0x55b   :  { %v7853_v20 = vpop.eup %7852 }
 0x55c   :  { %v8779_v36 = vmul.f32 %v7853_v20, %v1431_v32 }
 0x55e   :  { %1515 = vmatmul.mubr.f32.vlgmr.msra.gmra.mrb[10].mxu0 %v8779_v36  ;;  %1586 = vmatmul.mubr.f32.vlgmr.msra.gmra.mrb[10].mxu1 %v8779_v36 }
 0x55f   :  { %6300 = vmatpush1.bf16.msra.mxu0 %v8382_v22  ;;  %6332 = vmatpush1.bf16.msra.mxu1 %v8385_v25 }
 0x560   :  { %6302 = vmatprep.subr.bf16.mxu0 %v8389_v29  ;;  %6334 = vmatprep.subr.bf16.mxu1 %v8396_v34 }
 0x561   :  { %1698 = vmatprep.mubr.f32.mxu0 %v8191_v0  ;;  %1769 = vmatprep.mubr.f32.mxu1 %v8191_v0 }
 0x563   :  { %6304 = vmatpush1.bf16.msra.mxu0 %v8398_v35  ;;  %6336 = vmatpush1.bf16.msra.mxu1 %v8402_v38 }
 0x564   :  { %6306 = vmatprep.subr.bf16.mxu0 %v8406_v42  ;;  %6338 = vmatprep.subr.bf16.mxu1 %v8413_v47 }
 0x567   :  { %6308 = vmatpush1.bf16.msra.mxu0 %v8417_v50  ;;  %6340 = vmatpush1.bf16.msra.mxu1 %v8421_v54 }
 0x568   :  { %6310 = vmatprep.subr.bf16.mxu0 %v8425_v58  ;;  %6342 = vmatprep.subr.bf16.mxu1 %v8429_v61 }
 0x56b   :  { %6312 = vmatpush1.bf16.msra.mxu0 %v8436_v2  ;;  %6344 = vmatpush1.bf16.msra.mxu1 %v8440_v5 }
 0x56c   :  { %6314 = vmatprep.subr.bf16.mxu0 %v8444_v8  ;;  %6346 = vmatprep.subr.bf16.mxu1 %v8448_v11 }
 0x56f   :  { %6316 = vmatpush1.bf16.msra.mxu0 %v8455_v15  ;;  %6348 = vmatpush1.bf16.msra.mxu1 %v8459_v19 }
 0x570   :  { %6318 = vmatprep.subr.bf16.mxu0 %v8463_v24  ;;  %6350 = vmatprep.subr.bf16.mxu1 %v8467_v28 }
 0x573   :  { %6320 = vmatpush1.bf16.msra.mxu0 %v8474_v33  ;;  %6352 = vmatpush1.bf16.msra.mxu1 %v8478_v39 }
 0x574   :  { %6322 = vmatprep.subr.bf16.mxu0 %v8482_v43  ;;  %6354 = vmatprep.subr.bf16.mxu1 %v8486_v46 }
 0x577   :  { %6324 = vmatpush1.bf16.msra.mxu0 %v8493_v52  ;;  %6356 = vmatpush1.bf16.msra.mxu1 %v8497_v56 }
 0x578   :  { %6326 = vmatprep.subr.bf16.mxu0 %v8501_v60  ;;  %6358 = vmatprep.subr.bf16.mxu1 %v8505_v1 }
 0x57b   :  { %6328 = vmatpush1.bf16.msra.mxu0 %v8512_v4  ;;  %6360 = vmatpush1.bf16.msra.mxu1 %v8516_v6 }
 0x57c   :  { %6362 = vmatprep.subr.bf16.mxu0 %v8378_v17  ;;  %6394 = vmatprep.subr.bf16.mxu1 %v8380_v21 }
 0x631   :  { %v1516_v55 = vpop.f32.mrb[10].mxu0  ;;  %v1587_v37 = vpop.f32.mrb[10].mxu1 }
 0x632   :  { %v7611_v41 = vadd.f32 %v1516_v55, %v8573_v14  ;;  %v1518_v45 = vpop.f32.mrb[11].mxu0  ;;  %v1589_v48 = vpop.f32.mrb[11].mxu1  ;;  %v7627_v57 = vadd.f32 %v1587_v37, %v8582_v26 }
 0x633   :  { %v7612_v49 = vadd.f32 %v1518_v45, %v8578_v18  ;;  %v7628_v62 = vadd.f32 %v1589_v48, %v8589_v44 }
 0x634   :  { %v1596_v23 = vmul.f32 0.5, %v7611_v41 }
 0x635   :  { %v1597_v53 = vmul.f32 0.5, %v7612_v49  ;;  %v1599_v17 = vmul.f32 0.5, %v7628_v62  ;;  %v2079_v62 = vld [vmem:[#allocation9 + $0x48] sm:$0xff] }
 0x636   :  { %7854 = vtanh.f32 %v1596_v23 }
 0x637   :  { %7856 = vtanh.f32 %v1597_v53  ;;  %v2072_v53 = vld [vmem:[#allocation9 + $0x10] sm:$0xff] }
 0x638   :  { %7858 = vtanh.f32 %v7627_v57  ;;  %v2076_v57 = vld [vmem:[#allocation9 + $0x30] sm:$0xff] }
 0x639   :  { %7860 = vtanh.f32 %v1599_v17  ;;  %v2083_v17 = vld [vmem:[#allocation9 + $0x68] sm:$0xff] }
 0x640   :  { %v7855_v59 = vpop.eup %7854 }
 0x641   :  { %v7857_v21 = vpop.eup %7856  ;;  %v1608_v7 = vmul.f32 0.5, %v7855_v59  ;;  %v2081_v59 = vld [vmem:[#allocation9 + $0x58] sm:$0xff] }
 0x642   :  { %v1609_v9 = vmul.f32 0.5, %v7857_v21  ;;  %v7859_v30 = vpop.eup %7858  ;;  %v2085_v21 = vld [vmem:[#allocation9 + $0x78] sm:$0xff] }
 0x643   :  { %v1612_v3 = vadd.f32 0.5, %v1608_v7  ;;  %v7861_v37 = vpop.eup %7860 }
 0x644   :  { %v1613_v32 = vadd.f32 0.5, %v1609_v9  ;;  %v1611_v45 = vmul.f32 0.5, %v7861_v37  ;;  %v6461_v37 = vpack.c.bf16 %v2085_v21, %v2081_v59  ;;  %v2108_v59 = vld [vmem:[#allocation9 + $0x130] sm:$0xff]  ;;  %v2111_v21 = vld [vmem:[#allocation9 + $0x148] sm:$0xff] }
 0x645   :  { %v1621_v20 = vmul.f32 %v7859_v30, %v1612_v3  ;;  %v6459_v30 = vpack.c.bf16 %v2076_v57, %v2072_v53  ;;  %v2106_v53 = vld [vmem:[#allocation9 + $0x120] sm:$0xff] }
 0x646   :  { %v1620_v55 = vmul.f32 %v1613_v32, %v8776_v12  ;;  %v1615_v49 = vadd.f32 0.5, %v1611_v45  ;;  %v2074_v12 = vld [vmem:[#allocation9 + $0x20] sm:$0xff]  ;;  %v2080_v45 = vld [vmem:[#allocation9 + $0x50] sm:$0xff] }
 0x647   :  { %v2078_v32 = vld [vmem:[#allocation9 + $0x40] sm:$0xff] }
 0x648   :  { %v8822_v41 = vadd.f32 %v1621_v20, %v1620_v55  ;;  %v2082_v20 = vld [vmem:[#allocation9 + $0x60] sm:$0xff] }
 0x64a   :  { %7862 = vtanh.f32 %v8822_v41 }
 0x654   :  { %v7863_v48 = vpop.eup %7862 }
 0x655   :  { %v8825_v23 = vmul.f32 %v7863_v48, %v1615_v49  ;;  %v2084_v49 = vld [vmem:[#allocation9 + $0x70] sm:$0xff]  ;;  %v2087_v48 = vld [vmem:[#allocation9 + $0x88] sm:$0xff] }
 0x657   :  { %1699 = vmatmul.mubr.f32.vlgmr.msra.gmra.mrb[12].mxu0 %v8825_v23  ;;  %1770 = vmatmul.mubr.f32.vlgmr.msra.gmra.mrb[12].mxu1 %v8825_v23 }
 0x658   :  { %6364 = vmatpush1.bf16.msra.mxu0 %v8382_v22  ;;  %6396 = vmatpush1.bf16.msra.mxu1 %v8385_v25  ;;  %v2071_v22 = vld [vmem:[#allocation9 + $0x8] sm:$0xff] }
 0x659   :  { %6366 = vmatprep.subr.bf16.mxu0 %v8389_v29  ;;  %6398 = vmatprep.subr.bf16.mxu1 %v8396_v34  ;;  %v2075_v25 = vld [vmem:[#allocation9 + $0x28] sm:$0xff]  ;;  %v2073_v29 = vld [vmem:[#allocation9 + $0x18] sm:$0xff] }
 0x65a   :  { %1882 = vmatprep.mubr.f32.mxu0 %v8191_v0  ;;  %1953 = vmatprep.mubr.f32.mxu1 %v8191_v0  ;;  %v6425_v34 = vpack.c.bf16 %v2075_v25, %v2071_v22  ;;  %v2091_v22 = vld [vmem:[#allocation9 + $0xa8] sm:$0xff]  ;;  %v2089_v25 = vld [vmem:[#allocation9 + $0x98] sm:$0xff] }
 0x65c   :  { %6368 = vmatpush1.bf16.msra.mxu0 %v8398_v35  ;;  %6400 = vmatpush1.bf16.msra.mxu1 %v8402_v38  ;;  %v2077_v35 = vld [vmem:[#allocation9 + $0x38] sm:$0xff] }
 0x65d   :  { %6370 = vmatprep.subr.bf16.mxu0 %v8406_v42  ;;  %6402 = vmatprep.subr.bf16.mxu1 %v8413_v47  ;;  %v6457_v38 = vpack.c.bf16 %v2077_v35, %v2073_v29  ;;  %v2093_v29 = vld [vmem:[#allocation9 + $0xb8] sm:$0xff]  ;;  %v6463_v35 = vpack.c.bf16 %v2084_v49, %v2080_v45  ;;  %v2112_v49 = vld [vmem:[#allocation9 + $0x150] sm:$0xff] }
 0x660   :  { %6372 = vmatpush1.bf16.msra.mxu0 %v8417_v50  ;;  %6404 = vmatpush1.bf16.msra.mxu1 %v8421_v54 }
 0x661   :  { %6374 = vmatprep.subr.bf16.mxu0 %v8425_v58  ;;  %6406 = vmatprep.subr.bf16.mxu1 %v8429_v61 }
 0x664   :  { %6376 = vmatpush1.bf16.msra.mxu0 %v8436_v2  ;;  %6408 = vmatpush1.bf16.msra.mxu1 %v8440_v5 }
 0x665   :  { %6378 = vmatprep.subr.bf16.mxu0 %v8444_v8  ;;  %6410 = vmatprep.subr.bf16.mxu1 %v8448_v11 }
 0x668   :  { %6380 = vmatpush1.bf16.msra.mxu0 %v8455_v15  ;;  %6412 = vmatpush1.bf16.msra.mxu1 %v8459_v19 }
 0x669   :  { %6382 = vmatprep.subr.bf16.mxu0 %v8463_v24  ;;  %6414 = vmatprep.subr.bf16.mxu1 %v8467_v28 }
 0x66c   :  { %6384 = vmatpush1.bf16.msra.mxu0 %v8474_v33  ;;  %6416 = vmatpush1.bf16.msra.mxu1 %v8478_v39 }
 0x66d   :  { %6386 = vmatprep.subr.bf16.mxu0 %v8482_v43  ;;  %6418 = vmatprep.subr.bf16.mxu1 %v8486_v46 }
 0x670   :  { %6388 = vmatpush1.bf16.msra.mxu0 %v8493_v52  ;;  %6420 = vmatpush1.bf16.msra.mxu1 %v8497_v56 }
 0x671   :  { %6390 = vmatprep.subr.bf16.mxu0 %v8501_v60  ;;  %6422 = vmatprep.subr.bf16.mxu1 %v8505_v1 }
 0x674   :  { %6392 = vmatpush1.bf16.msra.mxu0 %v8512_v4  ;;  %6424 = vmatpush1.bf16.msra.mxu1 %v8516_v6  ;;  %v2070_v6 = vld [vmem:[#allocation9] sm:$0xff] }
 0x675   :  { %6426 = vmatprep.subr.bf16.mxu0 %v6425_v34  ;;  %6458 = vmatprep.subr.bf16.mxu1 %v6457_v38  ;;  %v6427_v3 = vpack.c.bf16 %v2074_v12, %v2070_v6  ;;  %v6431_v34 = vpack.c.bf16 %v2082_v20, %v2078_v32  ;;  %v2086_v38 = vld [vmem:[#allocation9 + $0x80] sm:$0xff] }
 0x676   :  { %v2102_v12 = vld [vmem:[#allocation9 + $0x100] sm:$0xff] }
 0x677   :  { %v2110_v20 = vld [vmem:[#allocation9 + $0x140] sm:$0xff] }
 0x72a   :  { %v1700_v42 = vpop.f32.mrb[12].mxu0  ;;  %v1771_v47 = vpop.f32.mrb[12].mxu1 }
 0x72b   :  { %v7613_v50 = vadd.f32 %v1700_v42, %v8573_v14  ;;  %v1702_v54 = vpop.f32.mrb[13].mxu0  ;;  %v1773_v58 = vpop.f32.mrb[13].mxu1  ;;  %v7629_v8 = vadd.f32 %v1771_v47, %v8582_v26  ;;  %v2090_v42 = vld [vmem:[#allocation9 + $0xa0] sm:$0xff]  ;;  %v6433_v47 = vpack.c.bf16 %v2091_v22, %v2087_v48  ;;  %v2116_v48 = vld [vmem:[#allocation9 + $0x170] sm:$0xff]  ;;  %v2119_v22 = vld [vmem:[#allocation9 + $0x188] sm:$0xff] }
 0x72c   :  { %v7614_v61 = vadd.f32 %v1702_v54, %v8578_v18  ;;  %v7630_v11 = vadd.f32 %v1773_v58, %v8589_v44  ;;  %v2088_v54 = vld [vmem:[#allocation9 + $0x90] sm:$0xff] }
 0x72d   :  { %v1780_v2 = vmul.f32 0.5, %v7613_v50  ;;  %v6465_v50 = vpack.c.bf16 %v2093_v29, %v2089_v25  ;;  %v2092_v58 = vld [vmem:[#allocation9 + $0xb0] sm:$0xff]  ;;  %v2123_v25 = vld [vmem:[#allocation9 + $0x1a8] sm:$0xff]  ;;  %v2121_v29 = vld [vmem:[#allocation9 + $0x198] sm:$0xff] }
 0x72e   :  { %v1781_v5 = vmul.f32 0.5, %v7614_v61  ;;  %v1783_v15 = vmul.f32 0.5, %v7630_v11  ;;  %v2095_v61 = vld [vmem:[#allocation9 + $0xc8] sm:$0xff]  ;;  %v6435_v11 = vpack.c.bf16 %v2090_v42, %v2086_v38  ;;  %v6479_v38 = vpack.c.bf16 %v2116_v48, %v2112_v49  ;;  %v2118_v42 = vld [vmem:[#allocation9 + $0x180] sm:$0xff]  ;;  %v2016_v49 = vld [vmem:[#allocation11 + $0x98] sm:$0xff] }
 0x72f   :  { %7864 = vtanh.f32 %v1780_v2  ;;  %v2099_v2 = vld [vmem:[#allocation9 + $0xe8] sm:$0xff] }
 0x730   :  { %7866 = vtanh.f32 %v1781_v5  ;;  %v2097_v5 = vld [vmem:[#allocation9 + $0xd8] sm:$0xff] }
 0x731   :  { %7868 = vtanh.f32 %v7629_v8  ;;  %v2101_v8 = vld [vmem:[#allocation9 + $0xf8] sm:$0xff] }
 0x732   :  { %7870 = vtanh.f32 %v1783_v15  ;;  %v6467_v15 = vpack.c.bf16 %v2092_v58, %v2088_v54  ;;  %v2120_v58 = vld [vmem:[#allocation9 + $0x190] sm:$0xff] }
 0x739   :  { %v7865_v19 = vpop.eup %7864 }
 0x73a   :  { %v7867_v24 = vpop.eup %7866  ;;  %v1792_v28 = vmul.f32 0.5, %v7865_v19  ;;  %v2094_v19 = vld [vmem:[#allocation9 + $0xc0] sm:$0xff] }
 0x73b   :  { %v1793_v33 = vmul.f32 0.5, %v7867_v24  ;;  %v7869_v43 = vpop.eup %7868  ;;  %v2098_v24 = vld [vmem:[#allocation9 + $0xe0] sm:$0xff] }
 0x73c   :  { %v1796_v39 = vadd.f32 0.5, %v1792_v28  ;;  %v7871_v1 = vpop.eup %7870  ;;  %v6437_v28 = vpack.c.bf16 %v2099_v2, %v2095_v61  ;;  %v2124_v61 = vld [vmem:[#allocation9 + $0x1b0] sm:$0xff]  ;;  %v2127_v2 = vld [vmem:[#allocation9 + $0x1c8] sm:$0xff] }
 0x73d   :  { %v1797_v46 = vadd.f32 0.5, %v1793_v33  ;;  %v1795_v4 = vmul.f32 0.5, %v7871_v1  ;;  %v6469_v33 = vpack.c.bf16 %v2101_v8, %v2097_v5  ;;  %v2109_v1 = vld [vmem:[#allocation9 + $0x138] sm:$0xff]  ;;  %v2131_v5 = vld [vmem:[#allocation9 + $0x1e8] sm:$0xff] }
 0x73e   :  { %v1805_v52 = vmul.f32 %v7869_v43, %v1796_v39  ;;  %v2096_v39 = vld [vmem:[#allocation9 + $0xd0] sm:$0xff]  ;;  %v2129_v8 = vld [vmem:[#allocation9 + $0x1d8] sm:$0xff] }
 0x73f   :  { %v1804_v56 = vmul.f32 %v1797_v46, %v8822_v41  ;;  %v1799_v7 = vadd.f32 0.5, %v1795_v4  ;;  %v6429_v41 = vpack.c.bf16 %v2083_v17, %v2079_v62  ;;  %v2100_v43 = vld [vmem:[#allocation9 + $0xf0] sm:$0xff]  ;;  %v2103_v46 = vld [vmem:[#allocation9 + $0x108] sm:$0xff]  ;;  %v6439_v4 = vpack.c.bf16 %v2098_v24, %v2094_v19  ;;  %v2126_v24 = vld [vmem:[#allocation9 + $0x1c0] sm:$0xff] }
 0x740   :  { %v6471_v6 = vpack.c.bf16 %v2100_v43, %v2096_v39  ;;  %v2104_v17 = vld [vmem:[#allocation9 + $0x110] sm:$0xff]  ;;  %v6483_v19 = vpack.c.bf16 %v2124_v61, %v2120_v58  ;;  %v2130_v39 = vld [vmem:[#allocation9 + $0x1e0] sm:$0xff]  ;;  %v2024_v58 = vld [vmem:[#allocation11 + $0xd8] sm:$0xff] }
 0x741   :  { %v8866_v60 = vadd.f32 %v1805_v52, %v1804_v56  ;;  %v2107_v52 = vld [vmem:[#allocation9 + $0x128] sm:$0xff]  ;;  %v2105_v56 = vld [vmem:[#allocation9 + $0x118] sm:$0xff]  ;;  %v6475_v32 = vpack.c.bf16 %v2108_v59, %v2104_v17  ;;  %v2128_v43 = vld [vmem:[#allocation9 + $0x1d0] sm:$0xff] }
 0x742   :  { %v6441_v57 = vpack.c.bf16 %v2107_v52, %v2103_v46  ;;  %v6473_v62 = vpack.c.bf16 %v2109_v1, %v2105_v56  ;;  %v2132_v46 = vld [vmem:[#allocation9 + $0x1f0] sm:$0xff]  ;;  %v6455_v52 = vpack.c.bf16 %v2130_v39, %v2126_v24  ;;  %v1997_v1 = vld [vmem:[#allocation11] sm:$0xff]  ;;  %v2008_v17 = vld [vmem:[#allocation11 + $0x58] sm:$0xff] }
 0x743   :  { %7872 = vtanh.f32 %v8866_v60  ;;  %v6487_v56 = vpack.c.bf16 %v2132_v46, %v2128_v43  ;;  %v2027_v24 = vld [vmem:[#allocation11 + $0xf0] sm:$0xff]  ;;  %v2034_v39 = vld [vmem:[#allocation11 + $0x128] sm:$0xff]  ;;  %v2032_v43 = vld [vmem:[#allocation11 + $0x118] sm:$0xff] }
 0x74d   :  { %v7873_v9 = vpop.eup %7872 }
 0x74e   :  { %v8869_v55 = vmul.f32 %v7873_v9, %v1799_v7  ;;  %v2115_v7 = vld [vmem:[#allocation9 + $0x168] sm:$0xff]  ;;  %v2113_v9 = vld [vmem:[#allocation9 + $0x158] sm:$0xff] }
 0x750   :  { %1883 = vmatmul.mubr.f32.vlgmr.msra.gmra.mrb[14].mxu0 %v8869_v55  ;;  %1954 = vmatmul.mubr.f32.vlgmr.msra.gmra.mrb[14].mxu1 %v8869_v55 }
 0x751   :  { %6428 = vmatpush1.bf16.msra.mxu0 %v6427_v3  ;;  %6460 = vmatpush1.bf16.msra.mxu1 %v6459_v30  ;;  %v2117_v3 = vld [vmem:[#allocation9 + $0x178] sm:$0xff]  ;;  %v6443_v30 = vpack.c.bf16 %v2106_v53, %v2102_v12  ;;  %v1999_v12 = vld [vmem:[#allocation11 + $0x10] sm:$0xff] }
 0x752   :  { %6430 = vmatprep.subr.bf16.mxu0 %v6429_v41  ;;  %6462 = vmatprep.subr.bf16.mxu1 %v6461_v37  ;;  %v2114_v41 = vld [vmem:[#allocation9 + $0x160] sm:$0xff]  ;;  %v6445_v37 = vpack.c.bf16 %v2115_v7, %v2111_v21  ;;  %v6477_v45 = vpack.c.bf16 %v2117_v3, %v2113_v9  ;;  %v2003_v53 = vld [vmem:[#allocation11 + $0x30] sm:$0xff]  ;;  %v2012_v21 = vld [vmem:[#allocation11 + $0x78] sm:$0xff] }
 0x753   :  { %2219 = vmatprep.mubr.f32.mxu0 %v8191_v0  ;;  %2332 = vmatprep.mubr.f32.mxu1 %v8191_v0  ;;  %v2005_v7 = vld [vmem:[#allocation11 + $0x40] sm:$0xff]  ;;  %v8917_v3 = vpack.c.bf16 %v2012_v21, %v2008_v17 }
 0x754   :  { %v2009_v9 = vld [vmem:[#allocation11 + $0x60] sm:$0xff] }
 0x755   :  { %6432 = vmatpush1.bf16.msra.mxu0 %v6431_v34  ;;  %6464 = vmatpush1.bf16.msra.mxu1 %v6463_v35  ;;  %v2125_v34 = vld [vmem:[#allocation9 + $0x1b8] sm:$0xff]  ;;  %v6447_v35 = vpack.c.bf16 %v2114_v41, %v2110_v20  ;;  %v2011_v20 = vld [vmem:[#allocation11 + $0x70] sm:$0xff] }
 0x756   :  { %6434 = vmatprep.subr.bf16.mxu0 %v6433_v47  ;;  %6466 = vmatprep.subr.bf16.mxu1 %v6465_v50  ;;  %v2122_v47 = vld [vmem:[#allocation9 + $0x1a0] sm:$0xff]  ;;  %v6449_v50 = vpack.c.bf16 %v2123_v25, %v2119_v22  ;;  %v6481_v54 = vpack.c.bf16 %v2125_v34, %v2121_v29  ;;  %v2020_v22 = vld [vmem:[#allocation11 + $0xb8] sm:$0xff] }
 0x757   :  { %v2013_v25 = vld [vmem:[#allocation11 + $0x80] sm:$0xff]  ;;  %v8929_v34 = vpack.c.bf16 %v2020_v22, %v2016_v49  ;;  %v2050_v49 = vld [vmem:[#allocation11 + $0x1a8] sm:$0xff] }
 0x758   :  { %v2017_v29 = vld [vmem:[#allocation11 + $0xa0] sm:$0xff] }
 0x759   :  { %6436 = vmatpush1.bf16.msra.mxu0 %v6435_v11  ;;  %6468 = vmatpush1.bf16.msra.mxu1 %v6467_v15  ;;  %v2133_v11 = vld [vmem:[#allocation9 + $0x1f8] sm:$0xff]  ;;  %v6451_v15 = vpack.c.bf16 %v2122_v47, %v2118_v42  ;;  %v2019_v42 = vld [vmem:[#allocation11 + $0xb0] sm:$0xff] }
 0x75a   :  { %6438 = vmatprep.subr.bf16.mxu0 %v6437_v28  ;;  %6470 = vmatprep.subr.bf16.mxu1 %v6469_v33  ;;  %v6453_v28 = vpack.c.bf16 %v2131_v5, %v2127_v2  ;;  %v6485_v33 = vpack.c.bf16 %v2133_v11, %v2129_v8  ;;  %v2028_v2 = vld [vmem:[#allocation11 + $0xf8] sm:$0xff]  ;;  %v2021_v5 = vld [vmem:[#allocation11 + $0xc0] sm:$0xff] }
 0x75b   :  { %v2025_v8 = vld [vmem:[#allocation11 + $0xe0] sm:$0xff]  ;;  %v8941_v11 = vpack.c.bf16 %v2028_v2, %v2024_v58  ;;  %v2047_v58 = vld [vmem:[#allocation11 + $0x190] sm:$0xff] }
 0x75c   :  { %v2051_v2 = vld [vmem:[#allocation11 + $0x1b0] sm:$0xff] }
 0x75d   :  { %6440 = vmatpush1.bf16.msra.mxu0 %v6439_v4  ;;  %6472 = vmatpush1.bf16.msra.mxu1 %v6471_v6 }
 0x75e   :  { %6442 = vmatprep.subr.bf16.mxu0 %v6441_v57  ;;  %6474 = vmatprep.subr.bf16.mxu1 %v6473_v62  ;;  %v2006_v57 = vld [vmem:[#allocation11 + $0x48] sm:$0xff] }
 0x75f   :  { %v2010_v62 = vld [vmem:[#allocation11 + $0x68] sm:$0xff] }
 0x760   :  { %v8915_v59 = vpack.c.bf16 %v2010_v62, %v2006_v57  ;;  %v2040_v57 = vld [vmem:[#allocation11 + $0x158] sm:$0xff] }
 0x761   :  { %6444 = vmatpush1.bf16.msra.mxu0 %v6443_v30  ;;  %6476 = vmatpush1.bf16.msra.mxu1 %v6475_v32  ;;  %v8919_v30 = vpack.c.bf16 %v2009_v9, %v2005_v7  ;;  %v2007_v32 = vld [vmem:[#allocation11 + $0x50] sm:$0xff]  ;;  %v2044_v62 = vld [vmem:[#allocation11 + $0x178] sm:$0xff]  ;;  %v2037_v7 = vld [vmem:[#allocation11 + $0x140] sm:$0xff] }
 0x762   :  { %6446 = vmatprep.subr.bf16.mxu0 %v6445_v37  ;;  %6478 = vmatprep.subr.bf16.mxu1 %v6477_v45  ;;  %v8922_v41 = vpack.c.bf16 %v2011_v20, %v2007_v32  ;;  %v2014_v37 = vld [vmem:[#allocation11 + $0x88] sm:$0xff]  ;;  %v8964_v21 = vpack.c.bf16 %v2044_v62, %v2040_v57  ;;  %v2041_v9 = vld [vmem:[#allocation11 + $0x160] sm:$0xff]  ;;  %v2039_v32 = vld [vmem:[#allocation11 + $0x150] sm:$0xff] }
 0x763   :  { %v2018_v45 = vld [vmem:[#allocation11 + $0xa8] sm:$0xff]  ;;  %v8967_v20 = vpack.c.bf16 %v2041_v9, %v2037_v7 }
 0x764   :  { %v8927_v48 = vpack.c.bf16 %v2018_v45, %v2014_v37  ;;  %v2043_v37 = vld [vmem:[#allocation11 + $0x170] sm:$0xff]  ;;  %v2046_v45 = vld [vmem:[#allocation11 + $0x188] sm:$0xff] }
 0x765   :  { %6448 = vmatpush1.bf16.msra.mxu0 %v6447_v35  ;;  %6480 = vmatpush1.bf16.msra.mxu1 %v6479_v38  ;;  %v8931_v35 = vpack.c.bf16 %v2017_v29, %v2013_v25  ;;  %v2015_v38 = vld [vmem:[#allocation11 + $0x90] sm:$0xff]  ;;  %v8971_v22 = vpack.c.bf16 %v2043_v37, %v2039_v32  ;;  %v8973_v25 = vpack.c.bf16 %v2050_v49, %v2046_v45  ;;  %v2048_v29 = vld [vmem:[#allocation11 + $0x198] sm:$0xff] }
 0x766   :  { %6450 = vmatprep.subr.bf16.mxu0 %v6449_v50  ;;  %6482 = vmatprep.subr.bf16.mxu1 %v6481_v54  ;;  %v8934_v47 = vpack.c.bf16 %v2019_v42, %v2015_v38  ;;  %v2022_v50 = vld [vmem:[#allocation11 + $0xc8] sm:$0xff]  ;;  %v2052_v38 = vld [vmem:[#allocation11 + $0x1b8] sm:$0xff]  ;;  %v2045_v42 = vld [vmem:[#allocation11 + $0x180] sm:$0xff] }
 0x767   :  { %v2026_v54 = vld [vmem:[#allocation11 + $0xe8] sm:$0xff] }
 0x768   :  { %v8939_v61 = vpack.c.bf16 %v2026_v54, %v2022_v50  ;;  %v8975_v50 = vpack.c.bf16 %v2052_v38, %v2048_v29  ;;  %v2049_v54 = vld [vmem:[#allocation11 + $0x1a0] sm:$0xff] }
 0x769   :  { %6452 = vmatpush1.bf16.msra.mxu0 %v6451_v15  ;;  %6484 = vmatpush1.bf16.msra.mxu1 %v6483_v19  ;;  %v8943_v15 = vpack.c.bf16 %v2025_v8, %v2021_v5  ;;  %v2023_v19 = vld [vmem:[#allocation11 + $0xd0] sm:$0xff]  ;;  %v8978_v5 = vpack.c.bf16 %v2049_v54, %v2045_v42  ;;  %v8982_v8 = vpack.c.bf16 %v2051_v2, %v2047_v58 }
 0x76a   :  { %6454 = vmatprep.subr.bf16.mxu0 %v6453_v28  ;;  %6486 = vmatprep.subr.bf16.mxu1 %v6485_v33  ;;  %v8946_v28 = vpack.c.bf16 %v2027_v24, %v2023_v19  ;;  %v2030_v33 = vld [vmem:[#allocation11 + $0x108] sm:$0xff] }
 0x76b   :  { %v8951_v46 = vpack.c.bf16 %v2034_v39, %v2030_v33  ;;  %v2054_v19 = vld [vmem:[#allocation11 + $0x1c8] sm:$0xff]  ;;  %v2056_v33 = vld [vmem:[#allocation11 + $0x1d8] sm:$0xff] }
 0x76c   :  { %v2058_v24 = vld [vmem:[#allocation11 + $0x1e8] sm:$0xff] }
 0x76d   :  { %6456 = vmatpush1.bf16.msra.mxu0 %v6455_v52  ;;  %6488 = vmatpush1.bf16.msra.mxu1 %v6487_v56  ;;  %v2036_v52 = vld [vmem:[#allocation11 + $0x138] sm:$0xff]  ;;  %v2029_v56 = vld [vmem:[#allocation11 + $0x100] sm:$0xff]  ;;  %v8987_v39 = vpack.c.bf16 %v2058_v24, %v2054_v19 }
 0x770   :  { %2220 = vmatmul.mubr.f32.vlgmr.msra.gmra.mrb[16].mxu0 %v8595_v27  ;;  %2333 = vmatmul.mubr.f32.vlgmr.msra.gmra.mrb[16].mxu1 %v8595_v27  ;;  %v1998_v27 = vld [vmem:[#allocation11 + $0x8] sm:$0xff] }
 0x771   :  { %2225 = vmatprep.mubr.f32.mxu0 %v8191_v0  ;;  %2338 = vmatprep.mubr.f32.mxu1 %v8191_v0 }
 0x774   :  { %2226 = vmatmul.mubr.f32.gmra.mrb[18].mxu0 %v8641_v40  ;;  %2339 = vmatmul.mubr.f32.gmra.mrb[18].mxu1 %v8641_v40  ;;  %v2002_v40 = vld [vmem:[#allocation11 + $0x28] sm:$0xff] }
 0x775   :  { %2231 = vmatprep.mubr.f32.mxu0 %v8191_v0  ;;  %2344 = vmatprep.mubr.f32.mxu1 %v8191_v0 }
 0x778   :  { %2232 = vmatmul.mubr.f32.gmra.mrb[20].mxu0 %v8687_v51  ;;  %2345 = vmatmul.mubr.f32.gmra.mrb[20].mxu1 %v8687_v51  ;;  %v2000_v51 = vld [vmem:[#allocation11 + $0x18] sm:$0xff] }
 0x779   :  { %2237 = vmatprep.mubr.f32.mxu0 %v8191_v0  ;;  %2350 = vmatprep.mubr.f32.mxu1 %v8191_v0 }
 0x77c   :  { %2238 = vmatmul.mubr.f32.gmra.mrb[22].mxu0 %v8733_v63  ;;  %2351 = vmatmul.mubr.f32.gmra.mrb[22].mxu1 %v8733_v63  ;;  %v8903_v63 = vpack.c.bf16 %v2002_v40, %v1998_v27  ;;  %v2033_v27 = vld [vmem:[#allocation11 + $0x120] sm:$0xff]  ;;  %v8953_v40 = vpack.c.bf16 %v2036_v52, %v2032_v43  ;;  %v2060_v43 = vld [vmem:[#allocation11 + $0x1f8] sm:$0xff] }
 0x77d   :  { %2243 = vmatprep.mubr.f32.mxu0 %v8191_v0  ;;  %2356 = vmatprep.mubr.f32.mxu1 %v8191_v0  ;;  %v2053_v52 = vld [vmem:[#allocation11 + $0x1c0] sm:$0xff] }
 0x77e   :  { %6490 = vmatprep.subr.bf16.mxu0 %v8903_v63 }
 0x780   :  { %2244 = vmatmul.mubr.f32.gmra.mrb[24].mxu0 %v8779_v36  ;;  %2357 = vmatmul.mubr.f32.gmra.mrb[24].mxu1 %v8779_v36  ;;  %v2004_v36 = vld [vmem:[#allocation11 + $0x38] sm:$0xff] }
 0x781   :  { %2249 = vmatprep.mubr.f32.mxu0 %v8191_v0  ;;  %2362 = vmatprep.mubr.f32.mxu1 %v8191_v0  ;;  %v8905_v4 = vpack.c.bf16 %v2004_v36, %v2000_v51  ;;  %v8955_v51 = vpack.c.bf16 %v2033_v27, %v2029_v56  ;;  %v2031_v36 = vld [vmem:[#allocation11 + $0x110] sm:$0xff]  ;;  %v2057_v56 = vld [vmem:[#allocation11 + $0x1e0] sm:$0xff]  ;;  %v8989_v27 = vpack.c.bf16 %v2060_v43, %v2056_v33 }
 0x783   :  { %6522 = vmatprep.subr.bf16.mxu1 %v8905_v4 }
 0x784   :  { %2250 = vmatmul.mubr.f32.gmra.mrb[26].mxu0 %v8825_v23  ;;  %2363 = vmatmul.mubr.f32.gmra.mrb[26].mxu1 %v8825_v23  ;;  %v2001_v23 = vld [vmem:[#allocation11 + $0x20] sm:$0xff] }
 0x785   :  { %2255 = vmatprep.mubr.f32.mxu0 %v8191_v0  ;;  %2368 = vmatprep.mubr.f32.mxu1 %v8191_v0  ;;  %v8907_v6 = vpack.c.bf16 %v2001_v23, %v1997_v1  ;;  %v2035_v1 = vld [vmem:[#allocation11 + $0x130] sm:$0xff]  ;;  %v2038_v23 = vld [vmem:[#allocation11 + $0x148] sm:$0xff] }
 0x787   :  { %6492 = vmatpush1.bf16.msra.mxu0 %v8907_v6 }
 0x788   :  { %2256 = vmatmul.mubr.f32.gmra.mrb[28].mxu0 %v8869_v55  ;;  %2369 = vmatmul.mubr.f32.gmra.mrb[28].mxu1 %v8869_v55  ;;  %v8910_v55 = vpack.c.bf16 %v2003_v53, %v1999_v12  ;;  %v8958_v12 = vpack.c.bf16 %v2035_v1, %v2031_v36  ;;  %v2042_v53 = vld [vmem:[#allocation11 + $0x168] sm:$0xff]  ;;  %v8991_v36 = vpack.c.bf16 %v2057_v56, %v2053_v52  ;;  %v2055_v1 = vld [vmem:[#allocation11 + $0x1d0] sm:$0xff] }
 0x789   :  { %2261 = vmatprep.mubr.f32.mxu0 %v8191_v0  ;;  %2374 = vmatprep.mubr.f32.mxu1 %v8191_v0  ;;  %v8962_v17 = vpack.c.bf16 %v2042_v53, %v2038_v23  ;;  %v2059_v23 = vld [vmem:[#allocation11 + $0x1f0] sm:$0xff] }
 0x78a   :  { %6524 = vmatpush1.bf16.msra.mxu1 %v8910_v55  ;;  %6494 = vmatprep.subr.bf16.mxu0 %v8915_v59  ;;  %v8994_v53 = vpack.c.bf16 %v2059_v23, %v2055_v1 }
 0x78b   :  { %6526 = vmatprep.subr.bf16.mxu1 %v8917_v3  ;;  %6496 = vmatpush1.bf16.msra.mxu0 %v8919_v30 }
 0x78c   :  { %6498 = vmatprep.subr.bf16.mxu0 %v8927_v48 }
 0x78e   :  { %6528 = vmatpush1.bf16.msra.mxu1 %v8922_v41 }
 0x78f   :  { %6530 = vmatprep.subr.bf16.mxu1 %v8929_v34  ;;  %6500 = vmatpush1.bf16.msra.mxu0 %v8931_v35 }
 0x790   :  { %6502 = vmatprep.subr.bf16.mxu0 %v8939_v61 }
 0x792   :  { %6532 = vmatpush1.bf16.msra.mxu1 %v8934_v47 }
 0x793   :  { %6534 = vmatprep.subr.bf16.mxu1 %v8941_v11  ;;  %6504 = vmatpush1.bf16.msra.mxu0 %v8943_v15 }
 0x794   :  { %6506 = vmatprep.subr.bf16.mxu0 %v8951_v46 }
 0x796   :  { %6536 = vmatpush1.bf16.msra.mxu1 %v8946_v28 }
 0x797   :  { %6538 = vmatprep.subr.bf16.mxu1 %v8953_v40  ;;  %6508 = vmatpush1.bf16.msra.mxu0 %v8955_v51 }
 0x798   :  { %6510 = vmatprep.subr.bf16.mxu0 %v8962_v17 }
 0x79a   :  { %6540 = vmatpush1.bf16.msra.mxu1 %v8958_v12 }
 0x79b   :  { %6542 = vmatprep.subr.bf16.mxu1 %v8964_v21  ;;  %6512 = vmatpush1.bf16.msra.mxu0 %v8967_v20 }
 0x79c   :  { %6514 = vmatprep.subr.bf16.mxu0 %v8973_v25 }
 0x79e   :  { %6544 = vmatpush1.bf16.msra.mxu1 %v8971_v22 }
 0x79f   :  { %6546 = vmatprep.subr.bf16.mxu1 %v8975_v50  ;;  %6516 = vmatpush1.bf16.msra.mxu0 %v8978_v5 }
 0x7a0   :  { %6518 = vmatprep.subr.bf16.mxu0 %v8987_v39 }
 0x7a2   :  { %6548 = vmatpush1.bf16.msra.mxu1 %v8982_v8 }
 0x7a3   :  { %6550 = vmatprep.subr.bf16.mxu1 %v8989_v27  ;;  %6520 = vmatpush1.bf16.msra.mxu0 %v8991_v36 }
 0x7a4   :  { %6554 = vmatprep.subr.bf16.mxu0 %v8903_v63 }
 0x7a6   :  { %6552 = vmatpush1.bf16.msra.mxu1 %v8994_v53 }
 0x7a7   :  { %6586 = vmatprep.subr.bf16.mxu1 %v8905_v4 }
 0x823   :  { %v1884_v57 = vpop.f32.mrb[14].mxu0  ;;  %v1955_v62 = vpop.f32.mrb[14].mxu1 }
 0x824   :  { %v7615_v7 = vadd.f32 %v1884_v57, %v8573_v14  ;;  %v1886_v9 = vpop.f32.mrb[15].mxu0  ;;  %v1957_v32 = vpop.f32.mrb[15].mxu1  ;;  %v7631_v29 = vadd.f32 %v1955_v62, %v8582_v26 }
 0x825   :  { %v7616_v37 = vadd.f32 %v1886_v9, %v8578_v18  ;;  %v7632_v38 = vadd.f32 %v1957_v32, %v8589_v44  ;;  %v2061_v44 = vld [vmem:[%s9862_s6] sm:$0xf] }
 0x826   :  { %v1964_v45 = vmul.f32 0.5, %v7615_v7  ;;  %v9051_v62 = vrot.slane %v2061_v44, %v8570_v13 }
 0x827   :  { %v1965_v49 = vmul.f32 0.5, %v7616_v37  ;;  %v1967_v42 = vmul.f32 0.5, %v7632_v38  ;;  %v9055_v37 = vrot.slane %v2061_v44, %v8575_v16 }
 0x828   :  { %7874 = vtanh.f32 %v1964_v45 }
 0x829   :  { %7876 = vtanh.f32 %v1965_v49 }
 0x82a   :  { %7878 = vtanh.f32 %v7631_v29 }
 0x82b   :  { %7880 = vtanh.f32 %v1967_v42 }
 0x832   :  { %v7875_v54 = vpop.eup %7874 }
 0x833   :  { %v7877_v58 = vpop.eup %7876  ;;  %v1976_v2 = vmul.f32 0.5, %v7875_v54 }
 0x834   :  { %v1977_v19 = vmul.f32 0.5, %v7877_v58  ;;  %v7879_v24 = vpop.eup %7878  ;;  %v9060_v58 = vrot.slane %v2061_v44, %v8584_v31 }
 0x835   :  { %v1980_v14 = vadd.f32 0.5, %v1976_v2  ;;  %v7881_v56 = vpop.eup %7880 }
 0x836   :  { %v1981_v33 = vadd.f32 0.5, %v1977_v19  ;;  %v1979_v26 = vmul.f32 0.5, %v7881_v56 }
 0x837   :  { %v1989_v43 = vmul.f32 %v7879_v24, %v1980_v14 }
 0x838   :  { %v1988_v18 = vmul.f32 %v1981_v33, %v8866_v60  ;;  %v1983_v1 = vadd.f32 0.5, %v1979_v26  ;;  %v9048_v60 = vrot.slane %v2061_v44, %v8565_v10 }
 0x83a   :  { %v1990_v52 = vadd.f32 %v1989_v43, %v1988_v18 }
 0x83c   :  { %7882 = vtanh.f32 %v1990_v52 }
 0x846   :  { %v7883_v23 = vpop.eup %7882 }
 0x847   :  { %v1992_v57 = vmul.f32 %v7883_v23, %v1983_v1 }
 0x849   :  { %2262 = vmatmul.mubr.f32.gmra.mrb[30].mxu0 %v1992_v57  ;;  %2375 = vmatmul.mubr.f32.gmra.mrb[30].mxu1 %v1992_v57 }
 0x84a   :  { %2485 = vmatprep.mubr.f32.mxu0 %v8191_v0  ;;  %2556 = vmatprep.mubr.f32.mxu1 %v8191_v0 }
 0x84d   :  { %2486 = vmatmul.mubr.f32.vlgmr.msra.gmra.mrb[16].mxu0 %v8191_v0  ;;  %2557 = vmatmul.mubr.f32.vlgmr.msra.gmra.mrb[16].mxu1 %v8191_v0 }
 0x84e   :  { %6556 = vmatpush1.bf16.msra.mxu0 %v8907_v6  ;;  %6588 = vmatpush1.bf16.msra.mxu1 %v8910_v55 }
 0x84f   :  { %6558 = vmatprep.subr.bf16.mxu0 %v8915_v59  ;;  %6590 = vmatprep.subr.bf16.mxu1 %v8917_v3 }
 0x850   :  { %2665 = vmatprep.mubr.f32.mxu0 %v8191_v0  ;;  %2736 = vmatprep.mubr.f32.mxu1 %v8191_v0 }
 0x852   :  { %6560 = vmatpush1.bf16.msra.mxu0 %v8919_v30  ;;  %6592 = vmatpush1.bf16.msra.mxu1 %v8922_v41 }
 0x853   :  { %6562 = vmatprep.subr.bf16.mxu0 %v8927_v48  ;;  %6594 = vmatprep.subr.bf16.mxu1 %v8929_v34 }
 0x856   :  { %6564 = vmatpush1.bf16.msra.mxu0 %v8931_v35  ;;  %6596 = vmatpush1.bf16.msra.mxu1 %v8934_v47 }
 0x857   :  { %6566 = vmatprep.subr.bf16.mxu0 %v8939_v61  ;;  %6598 = vmatprep.subr.bf16.mxu1 %v8941_v11 }
 0x85a   :  { %6568 = vmatpush1.bf16.msra.mxu0 %v8943_v15  ;;  %6600 = vmatpush1.bf16.msra.mxu1 %v8946_v28 }
 0x85b   :  { %6570 = vmatprep.subr.bf16.mxu0 %v8951_v46  ;;  %6602 = vmatprep.subr.bf16.mxu1 %v8953_v40 }
 0x85e   :  { %6572 = vmatpush1.bf16.msra.mxu0 %v8955_v51  ;;  %6604 = vmatpush1.bf16.msra.mxu1 %v8958_v12 }
 0x85f   :  { %6574 = vmatprep.subr.bf16.mxu0 %v8962_v17  ;;  %6606 = vmatprep.subr.bf16.mxu1 %v8964_v21 }
 0x862   :  { %6576 = vmatpush1.bf16.msra.mxu0 %v8967_v20  ;;  %6608 = vmatpush1.bf16.msra.mxu1 %v8971_v22 }
 0x863   :  { %6578 = vmatprep.subr.bf16.mxu0 %v8973_v25  ;;  %6610 = vmatprep.subr.bf16.mxu1 %v8975_v50 }
 0x866   :  { %6580 = vmatpush1.bf16.msra.mxu0 %v8978_v5  ;;  %6612 = vmatpush1.bf16.msra.mxu1 %v8982_v8 }
 0x867   :  { %6582 = vmatprep.subr.bf16.mxu0 %v8987_v39  ;;  %6614 = vmatprep.subr.bf16.mxu1 %v8989_v27 }
 0x86a   :  { %6584 = vmatpush1.bf16.msra.mxu0 %v8991_v36  ;;  %6616 = vmatpush1.bf16.msra.mxu1 %v8994_v53 }
 0x86b   :  { %6618 = vmatprep.subr.bf16.mxu0 %v8903_v63  ;;  %6650 = vmatprep.subr.bf16.mxu1 %v8905_v4 }
 0x920   :  { %v2487_v7 = vpop.f32.mrb[16].mxu0  ;;  %v2558_v9 = vpop.f32.mrb[16].mxu1 }
 0x921   :  { %v7633_v32 = vadd.f32 %v2487_v7, %v9048_v60  ;;  %v2489_v45 = vpop.f32.mrb[17].mxu0  ;;  %v2560_v49 = vpop.f32.mrb[17].mxu1  ;;  %v7649_v54 = vadd.f32 %v2558_v9, %v9055_v37 }
 0x922   :  { %v7634_v29 = vadd.f32 %v2489_v45, %v9051_v62  ;;  %v7650_v2 = vadd.f32 %v2560_v49, %v9060_v58 }
 0x923   :  { %v2567_v38 = vmul.f32 0.5, %v7633_v32 }
 0x924   :  { %v2568_v42 = vmul.f32 0.5, %v7634_v29  ;;  %v2570_v19 = vmul.f32 0.5, %v7650_v2 }
 0x925   :  { %7884 = vtanh.f32 %v2567_v38 }
 0x926   :  { %7886 = vtanh.f32 %v2568_v42 }
 0x927   :  { %7888 = vtanh.f32 %v7649_v54 }
 0x928   :  { %7890 = vtanh.f32 %v2570_v19 }
 0x92f   :  { %v7885_v14 = vpop.eup %7884 }
 0x930   :  { %v7887_v24 = vpop.eup %7886  ;;  %v2579_v33 = vmul.f32 0.5, %v7885_v14 }
 0x931   :  { %v2580_v43 = vmul.f32 0.5, %v7887_v24  ;;  %v7889_v52 = vpop.eup %7888 }
 0x932   :  { %v2583_v18 = vadd.f32 0.5, %v2579_v33  ;;  %v7891_v57 = vpop.eup %7890 }
 0x933   :  { %v2584_v56 = vadd.f32 0.5, %v2580_v43  ;;  %v2582_v44 = vmul.f32 0.5, %v7891_v57 }
 0x934   :  { %v2592_v26 = vmul.f32 %v7889_v52, %v2583_v18 }
 0x935   :  { %v2591_v1 = vmul.f32 0.0, %v2584_v56  ;;  %v2586_v7 = vadd.f32 0.5, %v2582_v44 }
 0x937   :  { %v9063_v23 = vadd.f32 %v2592_v26, %v2591_v1 }
 0x939   :  { %7892 = vtanh.f32 %v9063_v23 }
 0x943   :  { %v7893_v9 = vpop.eup %7892 }
 0x944   :  { %v9066_v32 = vmul.f32 %v7893_v9, %v2586_v7 }
 0x946   :  { %2666 = vmatmul.mubr.f32.vlgmr.msra.gmra.mrb[18].mxu0 %v9066_v32  ;;  %2737 = vmatmul.mubr.f32.vlgmr.msra.gmra.mrb[18].mxu1 %v9066_v32 }
 0x947   :  { %6620 = vmatpush1.bf16.msra.mxu0 %v8907_v6  ;;  %6652 = vmatpush1.bf16.msra.mxu1 %v8910_v55 }
 0x948   :  { %6622 = vmatprep.subr.bf16.mxu0 %v8915_v59  ;;  %6654 = vmatprep.subr.bf16.mxu1 %v8917_v3 }
 0x949   :  { %2845 = vmatprep.mubr.f32.mxu0 %v8191_v0  ;;  %2916 = vmatprep.mubr.f32.mxu1 %v8191_v0 }
 0x94b   :  { %6624 = vmatpush1.bf16.msra.mxu0 %v8919_v30  ;;  %6656 = vmatpush1.bf16.msra.mxu1 %v8922_v41 }
 0x94c   :  { %6626 = vmatprep.subr.bf16.mxu0 %v8927_v48  ;;  %6658 = vmatprep.subr.bf16.mxu1 %v8929_v34 }
 0x94f   :  { %6628 = vmatpush1.bf16.msra.mxu0 %v8931_v35  ;;  %6660 = vmatpush1.bf16.msra.mxu1 %v8934_v47 }
 0x950   :  { %6630 = vmatprep.subr.bf16.mxu0 %v8939_v61  ;;  %6662 = vmatprep.subr.bf16.mxu1 %v8941_v11 }
 0x953   :  { %6632 = vmatpush1.bf16.msra.mxu0 %v8943_v15  ;;  %6664 = vmatpush1.bf16.msra.mxu1 %v8946_v28 }
 0x954   :  { %6634 = vmatprep.subr.bf16.mxu0 %v8951_v46  ;;  %6666 = vmatprep.subr.bf16.mxu1 %v8953_v40 }
 0x957   :  { %6636 = vmatpush1.bf16.msra.mxu0 %v8955_v51  ;;  %6668 = vmatpush1.bf16.msra.mxu1 %v8958_v12 }
 0x958   :  { %6638 = vmatprep.subr.bf16.mxu0 %v8962_v17  ;;  %6670 = vmatprep.subr.bf16.mxu1 %v8964_v21 }
 0x95b   :  { %6640 = vmatpush1.bf16.msra.mxu0 %v8967_v20  ;;  %6672 = vmatpush1.bf16.msra.mxu1 %v8971_v22 }
 0x95c   :  { %6642 = vmatprep.subr.bf16.mxu0 %v8973_v25  ;;  %6674 = vmatprep.subr.bf16.mxu1 %v8975_v50 }
 0x95f   :  { %6644 = vmatpush1.bf16.msra.mxu0 %v8978_v5  ;;  %6676 = vmatpush1.bf16.msra.mxu1 %v8982_v8 }
 0x960   :  { %6646 = vmatprep.subr.bf16.mxu0 %v8987_v39  ;;  %6678 = vmatprep.subr.bf16.mxu1 %v8989_v27 }
 0x963   :  { %6648 = vmatpush1.bf16.msra.mxu0 %v8991_v36  ;;  %6680 = vmatpush1.bf16.msra.mxu1 %v8994_v53 }
 0x964   :  { %6682 = vmatprep.subr.bf16.mxu0 %v8903_v63  ;;  %6714 = vmatprep.subr.bf16.mxu1 %v8905_v4 }
 0xa19   :  { %v2667_v45 = vpop.f32.mrb[18].mxu0  ;;  %v2738_v49 = vpop.f32.mrb[18].mxu1 }
 0xa1a   :  { %v7635_v29 = vadd.f32 %v2667_v45, %v9048_v60  ;;  %v2669_v38 = vpop.f32.mrb[19].mxu0  ;;  %v2740_v42 = vpop.f32.mrb[19].mxu1  ;;  %v7651_v14 = vadd.f32 %v2738_v49, %v9055_v37 }
 0xa1b   :  { %v7636_v54 = vadd.f32 %v2669_v38, %v9051_v62  ;;  %v7652_v24 = vadd.f32 %v2740_v42, %v9060_v58 }
 0xa1c   :  { %v2747_v2 = vmul.f32 0.5, %v7635_v29 }
 0xa1d   :  { %v2748_v19 = vmul.f32 0.5, %v7636_v54  ;;  %v2750_v33 = vmul.f32 0.5, %v7652_v24 }
 0xa1e   :  { %7894 = vtanh.f32 %v2747_v2 }
 0xa1f   :  { %7896 = vtanh.f32 %v2748_v19 }
 0xa20   :  { %7898 = vtanh.f32 %v7651_v14 }
 0xa21   :  { %7900 = vtanh.f32 %v2750_v33 }
 0xa28   :  { %v7895_v43 = vpop.eup %7894 }
 0xa29   :  { %v7897_v18 = vpop.eup %7896  ;;  %v2759_v52 = vmul.f32 0.5, %v7895_v43 }
 0xa2a   :  { %v2760_v56 = vmul.f32 0.5, %v7897_v18  ;;  %v7899_v1 = vpop.eup %7898 }
 0xa2b   :  { %v2763_v26 = vadd.f32 0.5, %v2759_v52  ;;  %v7901_v45 = vpop.eup %7900 }
 0xa2c   :  { %v2764_v57 = vadd.f32 0.5, %v2760_v56  ;;  %v2762_v49 = vmul.f32 0.5, %v7901_v45 }
 0xa2d   :  { %v2772_v44 = vmul.f32 %v7899_v1, %v2763_v26 }
 0xa2e   :  { %v2771_v7 = vmul.f32 %v2764_v57, %v9063_v23  ;;  %v2766_v29 = vadd.f32 0.5, %v2762_v49 }
 0xa30   :  { %v9109_v9 = vadd.f32 %v2772_v44, %v2771_v7 }
 0xa32   :  { %7902 = vtanh.f32 %v9109_v9 }
 0xa3c   :  { %v7903_v38 = vpop.eup %7902 }
 0xa3d   :  { %v9112_v42 = vmul.f32 %v7903_v38, %v2766_v29 }
 0xa3f   :  { %2846 = vmatmul.mubr.f32.vlgmr.msra.gmra.mrb[20].mxu0 %v9112_v42  ;;  %2917 = vmatmul.mubr.f32.vlgmr.msra.gmra.mrb[20].mxu1 %v9112_v42 }
 0xa40   :  { %6684 = vmatpush1.bf16.msra.mxu0 %v8907_v6  ;;  %6716 = vmatpush1.bf16.msra.mxu1 %v8910_v55 }
 0xa41   :  { %6686 = vmatprep.subr.bf16.mxu0 %v8915_v59  ;;  %6718 = vmatprep.subr.bf16.mxu1 %v8917_v3 }
 0xa42   :  { %3025 = vmatprep.mubr.f32.mxu0 %v8191_v0  ;;  %3096 = vmatprep.mubr.f32.mxu1 %v8191_v0 }
 0xa44   :  { %6688 = vmatpush1.bf16.msra.mxu0 %v8919_v30  ;;  %6720 = vmatpush1.bf16.msra.mxu1 %v8922_v41 }
 0xa45   :  { %6690 = vmatprep.subr.bf16.mxu0 %v8927_v48  ;;  %6722 = vmatprep.subr.bf16.mxu1 %v8929_v34 }
 0xa48   :  { %6692 = vmatpush1.bf16.msra.mxu0 %v8931_v35  ;;  %6724 = vmatpush1.bf16.msra.mxu1 %v8934_v47 }
 0xa49   :  { %6694 = vmatprep.subr.bf16.mxu0 %v8939_v61  ;;  %6726 = vmatprep.subr.bf16.mxu1 %v8941_v11 }
 0xa4c   :  { %6696 = vmatpush1.bf16.msra.mxu0 %v8943_v15  ;;  %6728 = vmatpush1.bf16.msra.mxu1 %v8946_v28 }
 0xa4d   :  { %6698 = vmatprep.subr.bf16.mxu0 %v8951_v46  ;;  %6730 = vmatprep.subr.bf16.mxu1 %v8953_v40 }
 0xa50   :  { %6700 = vmatpush1.bf16.msra.mxu0 %v8955_v51  ;;  %6732 = vmatpush1.bf16.msra.mxu1 %v8958_v12 }
 0xa51   :  { %6702 = vmatprep.subr.bf16.mxu0 %v8962_v17  ;;  %6734 = vmatprep.subr.bf16.mxu1 %v8964_v21 }
 0xa54   :  { %6704 = vmatpush1.bf16.msra.mxu0 %v8967_v20  ;;  %6736 = vmatpush1.bf16.msra.mxu1 %v8971_v22 }
 0xa55   :  { %6706 = vmatprep.subr.bf16.mxu0 %v8973_v25  ;;  %6738 = vmatprep.subr.bf16.mxu1 %v8975_v50 }
 0xa58   :  { %6708 = vmatpush1.bf16.msra.mxu0 %v8978_v5  ;;  %6740 = vmatpush1.bf16.msra.mxu1 %v8982_v8 }
 0xa59   :  { %6710 = vmatprep.subr.bf16.mxu0 %v8987_v39  ;;  %6742 = vmatprep.subr.bf16.mxu1 %v8989_v27 }
 0xa5c   :  { %6712 = vmatpush1.bf16.msra.mxu0 %v8991_v36  ;;  %6744 = vmatpush1.bf16.msra.mxu1 %v8994_v53 }
 0xa5d   :  { %6746 = vmatprep.subr.bf16.mxu0 %v8903_v63  ;;  %6778 = vmatprep.subr.bf16.mxu1 %v8905_v4 }
 0xb12   :  { %v2847_v23 = vpop.f32.mrb[20].mxu0  ;;  %v2918_v54 = vpop.f32.mrb[20].mxu1 }
 0xb13   :  { %v7637_v2 = vadd.f32 %v2847_v23, %v9048_v60  ;;  %v2849_v19 = vpop.f32.mrb[21].mxu0  ;;  %v2920_v14 = vpop.f32.mrb[21].mxu1  ;;  %v7653_v18 = vadd.f32 %v2918_v54, %v9055_v37 }
 0xb14   :  { %v7638_v24 = vadd.f32 %v2849_v19, %v9051_v62  ;;  %v7654_v52 = vadd.f32 %v2920_v14, %v9060_v58 }
 0xb15   :  { %v2927_v33 = vmul.f32 0.5, %v7637_v2 }
 0xb16   :  { %v2928_v43 = vmul.f32 0.5, %v7638_v24  ;;  %v2930_v56 = vmul.f32 0.5, %v7654_v52 }
 0xb17   :  { %7904 = vtanh.f32 %v2927_v33 }
 0xb18   :  { %7906 = vtanh.f32 %v2928_v43 }
 0xb19   :  { %7908 = vtanh.f32 %v7653_v18 }
 0xb1a   :  { %7910 = vtanh.f32 %v2930_v56 }
 0xb21   :  { %v7905_v26 = vpop.eup %7904 }
 0xb22   :  { %v7907_v1 = vpop.eup %7906  ;;  %v2939_v57 = vmul.f32 0.5, %v7905_v26 }
 0xb23   :  { %v2940_v44 = vmul.f32 0.5, %v7907_v1  ;;  %v7909_v45 = vpop.eup %7908 }
 0xb24   :  { %v2943_v7 = vadd.f32 0.5, %v2939_v57  ;;  %v7911_v54 = vpop.eup %7910 }
 0xb25   :  { %v2944_v49 = vadd.f32 0.5, %v2940_v44  ;;  %v2942_v2 = vmul.f32 0.5, %v7911_v54 }
 0xb26   :  { %v2952_v29 = vmul.f32 %v7909_v45, %v2943_v7 }
 0xb27   :  { %v2951_v38 = vmul.f32 %v2944_v49, %v9109_v9  ;;  %v2946_v19 = vadd.f32 0.5, %v2942_v2 }
 0xb29   :  { %v9155_v23 = vadd.f32 %v2952_v29, %v2951_v38 }
 0xb2b   :  { %7912 = vtanh.f32 %v9155_v23 }
 0xb35   :  { %v7913_v14 = vpop.eup %7912 }
 0xb36   :  { %v9158_v24 = vmul.f32 %v7913_v14, %v2946_v19 }
 0xb38   :  { %3026 = vmatmul.mubr.f32.vlgmr.msra.gmra.mrb[22].mxu0 %v9158_v24  ;;  %3097 = vmatmul.mubr.f32.vlgmr.msra.gmra.mrb[22].mxu1 %v9158_v24 }
 0xb39   :  { %6748 = vmatpush1.bf16.msra.mxu0 %v8907_v6  ;;  %6780 = vmatpush1.bf16.msra.mxu1 %v8910_v55 }
 0xb3a   :  { %6750 = vmatprep.subr.bf16.mxu0 %v8915_v59  ;;  %6782 = vmatprep.subr.bf16.mxu1 %v8917_v3 }
 0xb3b   :  { %3205 = vmatprep.mubr.f32.mxu0 %v8191_v0  ;;  %3276 = vmatprep.mubr.f32.mxu1 %v8191_v0 }
 0xb3d   :  { %6752 = vmatpush1.bf16.msra.mxu0 %v8919_v30  ;;  %6784 = vmatpush1.bf16.msra.mxu1 %v8922_v41 }
 0xb3e   :  { %6754 = vmatprep.subr.bf16.mxu0 %v8927_v48  ;;  %6786 = vmatprep.subr.bf16.mxu1 %v8929_v34 }
 0xb41   :  { %6756 = vmatpush1.bf16.msra.mxu0 %v8931_v35  ;;  %6788 = vmatpush1.bf16.msra.mxu1 %v8934_v47 }
 0xb42   :  { %6758 = vmatprep.subr.bf16.mxu0 %v8939_v61  ;;  %6790 = vmatprep.subr.bf16.mxu1 %v8941_v11 }
 0xb45   :  { %6760 = vmatpush1.bf16.msra.mxu0 %v8943_v15  ;;  %6792 = vmatpush1.bf16.msra.mxu1 %v8946_v28 }
 0xb46   :  { %6762 = vmatprep.subr.bf16.mxu0 %v8951_v46  ;;  %6794 = vmatprep.subr.bf16.mxu1 %v8953_v40 }
 0xb49   :  { %6764 = vmatpush1.bf16.msra.mxu0 %v8955_v51  ;;  %6796 = vmatpush1.bf16.msra.mxu1 %v8958_v12 }
 0xb4a   :  { %6766 = vmatprep.subr.bf16.mxu0 %v8962_v17  ;;  %6798 = vmatprep.subr.bf16.mxu1 %v8964_v21 }
 0xb4d   :  { %6768 = vmatpush1.bf16.msra.mxu0 %v8967_v20  ;;  %6800 = vmatpush1.bf16.msra.mxu1 %v8971_v22 }
 0xb4e   :  { %6770 = vmatprep.subr.bf16.mxu0 %v8973_v25  ;;  %6802 = vmatprep.subr.bf16.mxu1 %v8975_v50 }
 0xb51   :  { %6772 = vmatpush1.bf16.msra.mxu0 %v8978_v5  ;;  %6804 = vmatpush1.bf16.msra.mxu1 %v8982_v8 }
 0xb52   :  { %6774 = vmatprep.subr.bf16.mxu0 %v8987_v39  ;;  %6806 = vmatprep.subr.bf16.mxu1 %v8989_v27 }
 0xb55   :  { %6776 = vmatpush1.bf16.msra.mxu0 %v8991_v36  ;;  %6808 = vmatpush1.bf16.msra.mxu1 %v8994_v53 }
 0xb56   :  { %6810 = vmatprep.subr.bf16.mxu0 %v8903_v63  ;;  %6842 = vmatprep.subr.bf16.mxu1 %v8905_v4 }
 0xc0b   :  { %v3027_v9 = vpop.f32.mrb[22].mxu0  ;;  %v3098_v33 = vpop.f32.mrb[22].mxu1 }
 0xc0c   :  { %v7639_v43 = vadd.f32 %v3027_v9, %v9048_v60  ;;  %v3029_v18 = vpop.f32.mrb[23].mxu0  ;;  %v3100_v52 = vpop.f32.mrb[23].mxu1  ;;  %v7655_v57 = vadd.f32 %v3098_v33, %v9055_v37 }
 0xc0d   :  { %v7640_v56 = vadd.f32 %v3029_v18, %v9051_v62  ;;  %v7656_v44 = vadd.f32 %v3100_v52, %v9060_v58 }
 0xc0e   :  { %v3107_v26 = vmul.f32 0.5, %v7639_v43 }
 0xc0f   :  { %v3108_v1 = vmul.f32 0.5, %v7640_v56  ;;  %v3110_v7 = vmul.f32 0.5, %v7656_v44 }
 0xc10   :  { %7914 = vtanh.f32 %v3107_v26 }
 0xc11   :  { %7916 = vtanh.f32 %v3108_v1 }
 0xc12   :  { %7918 = vtanh.f32 %v7655_v57 }
 0xc13   :  { %7920 = vtanh.f32 %v3110_v7 }
 0xc1a   :  { %v7915_v45 = vpop.eup %7914 }
 0xc1b   :  { %v7917_v49 = vpop.eup %7916  ;;  %v3119_v29 = vmul.f32 0.5, %v7915_v45 }
 0xc1c   :  { %v3120_v38 = vmul.f32 0.5, %v7917_v49  ;;  %v7919_v2 = vpop.eup %7918 }
 0xc1d   :  { %v3123_v54 = vadd.f32 0.5, %v3119_v29  ;;  %v7921_v33 = vpop.eup %7920 }
 0xc1e   :  { %v3124_v19 = vadd.f32 0.5, %v3120_v38  ;;  %v3122_v18 = vmul.f32 0.5, %v7921_v33 }
 0xc1f   :  { %v3132_v14 = vmul.f32 %v7919_v2, %v3123_v54 }
 0xc20   :  { %v3131_v9 = vmul.f32 %v3124_v19, %v9155_v23  ;;  %v3126_v56 = vadd.f32 0.5, %v3122_v18 }
 0xc22   :  { %v9201_v43 = vadd.f32 %v3132_v14, %v3131_v9 }
 0xc24   :  { %7922 = vtanh.f32 %v9201_v43 }
 0xc2e   :  { %v7923_v52 = vpop.eup %7922 }
 0xc2f   :  { %v9204_v26 = vmul.f32 %v7923_v52, %v3126_v56 }
 0xc31   :  { %3206 = vmatmul.mubr.f32.vlgmr.msra.gmra.mrb[24].mxu0 %v9204_v26  ;;  %3277 = vmatmul.mubr.f32.vlgmr.msra.gmra.mrb[24].mxu1 %v9204_v26 }
 0xc32   :  { %6812 = vmatpush1.bf16.msra.mxu0 %v8907_v6  ;;  %6844 = vmatpush1.bf16.msra.mxu1 %v8910_v55 }
 0xc33   :  { %6814 = vmatprep.subr.bf16.mxu0 %v8915_v59  ;;  %6846 = vmatprep.subr.bf16.mxu1 %v8917_v3 }
 0xc34   :  { %3385 = vmatprep.mubr.f32.mxu0 %v8191_v0  ;;  %3456 = vmatprep.mubr.f32.mxu1 %v8191_v0 }
 0xc36   :  { %6816 = vmatpush1.bf16.msra.mxu0 %v8919_v30  ;;  %6848 = vmatpush1.bf16.msra.mxu1 %v8922_v41 }
 0xc37   :  { %6818 = vmatprep.subr.bf16.mxu0 %v8927_v48  ;;  %6850 = vmatprep.subr.bf16.mxu1 %v8929_v34 }
 0xc3a   :  { %6820 = vmatpush1.bf16.msra.mxu0 %v8931_v35  ;;  %6852 = vmatpush1.bf16.msra.mxu1 %v8934_v47 }
 0xc3b   :  { %6822 = vmatprep.subr.bf16.mxu0 %v8939_v61  ;;  %6854 = vmatprep.subr.bf16.mxu1 %v8941_v11 }
 0xc3e   :  { %6824 = vmatpush1.bf16.msra.mxu0 %v8943_v15  ;;  %6856 = vmatpush1.bf16.msra.mxu1 %v8946_v28 }
 0xc3f   :  { %6826 = vmatprep.subr.bf16.mxu0 %v8951_v46  ;;  %6858 = vmatprep.subr.bf16.mxu1 %v8953_v40 }
 0xc42   :  { %6828 = vmatpush1.bf16.msra.mxu0 %v8955_v51  ;;  %6860 = vmatpush1.bf16.msra.mxu1 %v8958_v12 }
 0xc43   :  { %6830 = vmatprep.subr.bf16.mxu0 %v8962_v17  ;;  %6862 = vmatprep.subr.bf16.mxu1 %v8964_v21 }
 0xc46   :  { %6832 = vmatpush1.bf16.msra.mxu0 %v8967_v20  ;;  %6864 = vmatpush1.bf16.msra.mxu1 %v8971_v22 }
 0xc47   :  { %6834 = vmatprep.subr.bf16.mxu0 %v8973_v25  ;;  %6866 = vmatprep.subr.bf16.mxu1 %v8975_v50 }
 0xc4a   :  { %6836 = vmatpush1.bf16.msra.mxu0 %v8978_v5  ;;  %6868 = vmatpush1.bf16.msra.mxu1 %v8982_v8 }
 0xc4b   :  { %6838 = vmatprep.subr.bf16.mxu0 %v8987_v39  ;;  %6870 = vmatprep.subr.bf16.mxu1 %v8989_v27 }
 0xc4e   :  { %6840 = vmatpush1.bf16.msra.mxu0 %v8991_v36  ;;  %6872 = vmatpush1.bf16.msra.mxu1 %v8994_v53 }
 0xc4f   :  { %6874 = vmatprep.subr.bf16.mxu0 %v8903_v63  ;;  %6906 = vmatprep.subr.bf16.mxu1 %v8905_v4 }
 0xd04   :  { %v3207_v23 = vpop.f32.mrb[24].mxu0  ;;  %v3278_v1 = vpop.f32.mrb[24].mxu1 }
 0xd05   :  { %v7641_v57 = vadd.f32 %v3207_v23, %v9048_v60  ;;  %v3209_v44 = vpop.f32.mrb[25].mxu0  ;;  %v3280_v7 = vpop.f32.mrb[25].mxu1  ;;  %v7657_v38 = vadd.f32 %v3278_v1, %v9055_v37 }
 0xd06   :  { %v7642_v45 = vadd.f32 %v3209_v44, %v9051_v62  ;;  %v7658_v54 = vadd.f32 %v3280_v7, %v9060_v58 }
 0xd07   :  { %v3287_v49 = vmul.f32 0.5, %v7641_v57 }
 0xd08   :  { %v3288_v29 = vmul.f32 0.5, %v7642_v45  ;;  %v3290_v2 = vmul.f32 0.5, %v7658_v54 }
 0xd09   :  { %7924 = vtanh.f32 %v3287_v49 }
 0xd0a   :  { %7926 = vtanh.f32 %v3288_v29 }
 0xd0b   :  { %7928 = vtanh.f32 %v7657_v38 }
 0xd0c   :  { %7930 = vtanh.f32 %v3290_v2 }
 0xd13   :  { %v7925_v19 = vpop.eup %7924 }
 0xd14   :  { %v7927_v14 = vpop.eup %7926  ;;  %v3299_v9 = vmul.f32 0.5, %v7925_v19 }
 0xd15   :  { %v3300_v33 = vmul.f32 0.5, %v7927_v14  ;;  %v7929_v56 = vpop.eup %7928 }
 0xd16   :  { %v3303_v18 = vadd.f32 0.5, %v3299_v9  ;;  %v7931_v1 = vpop.eup %7930 }
 0xd17   :  { %v3304_v52 = vadd.f32 0.5, %v3300_v33  ;;  %v3302_v45 = vmul.f32 0.5, %v7931_v1 }
 0xd18   :  { %v3312_v23 = vmul.f32 %v7929_v56, %v3303_v18 }
 0xd19   :  { %v3311_v57 = vmul.f32 %v3304_v52, %v9201_v43  ;;  %v3306_v49 = vadd.f32 0.5, %v3302_v45 }
 0xd1b   :  { %v9247_v44 = vadd.f32 %v3312_v23, %v3311_v57 }
 0xd1d   :  { %7932 = vtanh.f32 %v9247_v44 }
 0xd27   :  { %v7933_v7 = vpop.eup %7932 }
 0xd28   :  { %v9250_v29 = vmul.f32 %v7933_v7, %v3306_v49 }
 0xd2a   :  { %3386 = vmatmul.mubr.f32.vlgmr.msra.gmra.mrb[26].mxu0 %v9250_v29  ;;  %3457 = vmatmul.mubr.f32.vlgmr.msra.gmra.mrb[26].mxu1 %v9250_v29 }
 0xd2b   :  { %6876 = vmatpush1.bf16.msra.mxu0 %v8907_v6  ;;  %6908 = vmatpush1.bf16.msra.mxu1 %v8910_v55 }
 0xd2c   :  { %6878 = vmatprep.subr.bf16.mxu0 %v8915_v59  ;;  %6910 = vmatprep.subr.bf16.mxu1 %v8917_v3 }
 0xd2d   :  { %3565 = vmatprep.mubr.f32.mxu0 %v8191_v0  ;;  %3636 = vmatprep.mubr.f32.mxu1 %v8191_v0 }
 0xd2f   :  { %6880 = vmatpush1.bf16.msra.mxu0 %v8919_v30  ;;  %6912 = vmatpush1.bf16.msra.mxu1 %v8922_v41 }
 0xd30   :  { %6882 = vmatprep.subr.bf16.mxu0 %v8927_v48  ;;  %6914 = vmatprep.subr.bf16.mxu1 %v8929_v34 }
 0xd33   :  { %6884 = vmatpush1.bf16.msra.mxu0 %v8931_v35  ;;  %6916 = vmatpush1.bf16.msra.mxu1 %v8934_v47 }
 0xd34   :  { %6886 = vmatprep.subr.bf16.mxu0 %v8939_v61  ;;  %6918 = vmatprep.subr.bf16.mxu1 %v8941_v11 }
 0xd37   :  { %6888 = vmatpush1.bf16.msra.mxu0 %v8943_v15  ;;  %6920 = vmatpush1.bf16.msra.mxu1 %v8946_v28 }
 0xd38   :  { %6890 = vmatprep.subr.bf16.mxu0 %v8951_v46  ;;  %6922 = vmatprep.subr.bf16.mxu1 %v8953_v40 }
 0xd3b   :  { %6892 = vmatpush1.bf16.msra.mxu0 %v8955_v51  ;;  %6924 = vmatpush1.bf16.msra.mxu1 %v8958_v12 }
 0xd3c   :  { %6894 = vmatprep.subr.bf16.mxu0 %v8962_v17  ;;  %6926 = vmatprep.subr.bf16.mxu1 %v8964_v21 }
 0xd3f   :  { %6896 = vmatpush1.bf16.msra.mxu0 %v8967_v20  ;;  %6928 = vmatpush1.bf16.msra.mxu1 %v8971_v22 }
 0xd40   :  { %6898 = vmatprep.subr.bf16.mxu0 %v8973_v25  ;;  %6930 = vmatprep.subr.bf16.mxu1 %v8975_v50 }
 0xd43   :  { %6900 = vmatpush1.bf16.msra.mxu0 %v8978_v5  ;;  %6932 = vmatpush1.bf16.msra.mxu1 %v8982_v8 }
 0xd44   :  { %6902 = vmatprep.subr.bf16.mxu0 %v8987_v39  ;;  %6934 = vmatprep.subr.bf16.mxu1 %v8989_v27 }
 0xd47   :  { %6904 = vmatpush1.bf16.msra.mxu0 %v8991_v36  ;;  %6936 = vmatpush1.bf16.msra.mxu1 %v8994_v53 }
 0xd48   :  { %6938 = vmatprep.subr.bf16.mxu0 %v8903_v63  ;;  %6970 = vmatprep.subr.bf16.mxu1 %v8905_v4 }
 0xdfd   :  { %v3387_v43 = vpop.f32.mrb[26].mxu0  ;;  %v3458_v38 = vpop.f32.mrb[26].mxu1 }
 0xdfe   :  { %v7643_v54 = vadd.f32 %v3387_v43, %v9048_v60  ;;  %v3389_v2 = vpop.f32.mrb[27].mxu0  ;;  %v3460_v19 = vpop.f32.mrb[27].mxu1  ;;  %v7659_v18 = vadd.f32 %v3458_v38, %v9055_v37 }
 0xdff   :  { %v7644_v14 = vadd.f32 %v3389_v2, %v9051_v62  ;;  %v7660_v56 = vadd.f32 %v3460_v19, %v9060_v58 }
 0xe00   :  { %v3467_v9 = vmul.f32 0.5, %v7643_v54 }
 0xe01   :  { %v3468_v33 = vmul.f32 0.5, %v7644_v14  ;;  %v3470_v63 = vmul.f32 0.5, %v7660_v56  ;;  %v3941_v56 = vld [vmem:[#allocation12 + $0x48] sm:$0xff] }
 0xe02   :  { %7934 = vtanh.f32 %v3467_v9 }
 0xe03   :  { %7936 = vtanh.f32 %v3468_v33  ;;  %v3934_v33 = vld [vmem:[#allocation12 + $0x10] sm:$0xff] }
 0xe04   :  { %7938 = vtanh.f32 %v7659_v18  ;;  %v3938_v18 = vld [vmem:[#allocation12 + $0x30] sm:$0xff] }
 0xe05   :  { %7940 = vtanh.f32 %v3470_v63  ;;  %v3945_v63 = vld [vmem:[#allocation12 + $0x68] sm:$0xff] }
 0xe0c   :  { %v7935_v52 = vpop.eup %7934 }
 0xe0d   :  { %v7937_v4 = vpop.eup %7936  ;;  %v3479_v23 = vmul.f32 0.5, %v7935_v52  ;;  %v3943_v52 = vld [vmem:[#allocation12 + $0x58] sm:$0xff] }
 0xe0e   :  { %v3480_v57 = vmul.f32 0.5, %v7937_v4  ;;  %v7939_v45 = vpop.eup %7938  ;;  %v3947_v4 = vld [vmem:[#allocation12 + $0x78] sm:$0xff] }
 0xe0f   :  { %v3483_v1 = vadd.f32 0.5, %v3479_v23  ;;  %v7941_v38 = vpop.eup %7940 }
 0xe10   :  { %v3484_v49 = vadd.f32 0.5, %v3480_v57  ;;  %v3482_v2 = vmul.f32 0.5, %v7941_v38  ;;  %v7037_v38 = vpack.c.bf16 %v3947_v4, %v3943_v52  ;;  %v3970_v52 = vld [vmem:[#allocation12 + $0x130] sm:$0xff]  ;;  %v3973_v4 = vld [vmem:[#allocation12 + $0x148] sm:$0xff] }
 0xe11   :  { %v3492_v7 = vmul.f32 %v7939_v45, %v3483_v1  ;;  %v7035_v45 = vpack.c.bf16 %v3938_v18, %v3934_v33  ;;  %v3968_v33 = vld [vmem:[#allocation12 + $0x120] sm:$0xff] }
 0xe12   :  { %v3491_v43 = vmul.f32 %v3484_v49, %v9247_v44  ;;  %v3486_v14 = vadd.f32 0.5, %v3482_v2  ;;  %v3936_v44 = vld [vmem:[#allocation12 + $0x20] sm:$0xff]  ;;  %v3942_v2 = vld [vmem:[#allocation12 + $0x50] sm:$0xff] }
 0xe13   :  { %v3940_v49 = vld [vmem:[#allocation12 + $0x40] sm:$0xff] }
 0xe14   :  { %v9293_v54 = vadd.f32 %v3492_v7, %v3491_v43  ;;  %v3944_v7 = vld [vmem:[#allocation12 + $0x60] sm:$0xff] }
 0xe16   :  { %7942 = vtanh.f32 %v9293_v54 }
 0xe20   :  { %v7943_v19 = vpop.eup %7942 }
 0xe21   :  { %v9296_v9 = vmul.f32 %v7943_v19, %v3486_v14  ;;  %v3946_v14 = vld [vmem:[#allocation12 + $0x70] sm:$0xff]  ;;  %v3949_v19 = vld [vmem:[#allocation12 + $0x88] sm:$0xff] }
 0xe23   :  { %3566 = vmatmul.mubr.f32.vlgmr.msra.gmra.mrb[28].mxu0 %v9296_v9  ;;  %3637 = vmatmul.mubr.f32.vlgmr.msra.gmra.mrb[28].mxu1 %v9296_v9 }
 0xe24   :  { %6940 = vmatpush1.bf16.msra.mxu0 %v8907_v6  ;;  %6972 = vmatpush1.bf16.msra.mxu1 %v8910_v55  ;;  %v3933_v6 = vld [vmem:[#allocation12 + $0x8] sm:$0xff] }
 0xe25   :  { %6942 = vmatprep.subr.bf16.mxu0 %v8915_v59  ;;  %6974 = vmatprep.subr.bf16.mxu1 %v8917_v3  ;;  %v3937_v55 = vld [vmem:[#allocation12 + $0x28] sm:$0xff]  ;;  %v3935_v59 = vld [vmem:[#allocation12 + $0x18] sm:$0xff] }
 0xe26   :  { %3745 = vmatprep.mubr.f32.mxu0 %v8191_v0  ;;  %3816 = vmatprep.mubr.f32.mxu1 %v8191_v0  ;;  %v7001_v3 = vpack.c.bf16 %v3937_v55, %v3933_v6  ;;  %v3953_v6 = vld [vmem:[#allocation12 + $0xa8] sm:$0xff]  ;;  %v3951_v55 = vld [vmem:[#allocation12 + $0x98] sm:$0xff] }
 0xe28   :  { %6944 = vmatpush1.bf16.msra.mxu0 %v8919_v30  ;;  %6976 = vmatpush1.bf16.msra.mxu1 %v8922_v41  ;;  %v3939_v30 = vld [vmem:[#allocation12 + $0x38] sm:$0xff] }
 0xe29   :  { %6946 = vmatprep.subr.bf16.mxu0 %v8927_v48  ;;  %6978 = vmatprep.subr.bf16.mxu1 %v8929_v34  ;;  %v7033_v41 = vpack.c.bf16 %v3939_v30, %v3935_v59  ;;  %v3955_v59 = vld [vmem:[#allocation12 + $0xb8] sm:$0xff]  ;;  %v7039_v30 = vpack.c.bf16 %v3946_v14, %v3942_v2  ;;  %v3974_v14 = vld [vmem:[#allocation12 + $0x150] sm:$0xff] }
 0xe2c   :  { %6948 = vmatpush1.bf16.msra.mxu0 %v8931_v35  ;;  %6980 = vmatpush1.bf16.msra.mxu1 %v8934_v47 }
 0xe2d   :  { %6950 = vmatprep.subr.bf16.mxu0 %v8939_v61  ;;  %6982 = vmatprep.subr.bf16.mxu1 %v8941_v11 }
 0xe30   :  { %6952 = vmatpush1.bf16.msra.mxu0 %v8943_v15  ;;  %6984 = vmatpush1.bf16.msra.mxu1 %v8946_v28 }
 0xe31   :  { %6954 = vmatprep.subr.bf16.mxu0 %v8951_v46  ;;  %6986 = vmatprep.subr.bf16.mxu1 %v8953_v40 }
 0xe34   :  { %6956 = vmatpush1.bf16.msra.mxu0 %v8955_v51  ;;  %6988 = vmatpush1.bf16.msra.mxu1 %v8958_v12 }
 0xe35   :  { %6958 = vmatprep.subr.bf16.mxu0 %v8962_v17  ;;  %6990 = vmatprep.subr.bf16.mxu1 %v8964_v21 }
 0xe38   :  { %6960 = vmatpush1.bf16.msra.mxu0 %v8967_v20  ;;  %6992 = vmatpush1.bf16.msra.mxu1 %v8971_v22 }
 0xe39   :  { %6962 = vmatprep.subr.bf16.mxu0 %v8973_v25  ;;  %6994 = vmatprep.subr.bf16.mxu1 %v8975_v50 }
 0xe3c   :  { %6964 = vmatpush1.bf16.msra.mxu0 %v8978_v5  ;;  %6996 = vmatpush1.bf16.msra.mxu1 %v8982_v8 }
 0xe3d   :  { %6966 = vmatprep.subr.bf16.mxu0 %v8987_v39  ;;  %6998 = vmatprep.subr.bf16.mxu1 %v8989_v27 }
 0xe40   :  { %6968 = vmatpush1.bf16.msra.mxu0 %v8991_v36  ;;  %7000 = vmatpush1.bf16.msra.mxu1 %v8994_v53  ;;  %v3932_v53 = vld [vmem:[#allocation12] sm:$0xff] }
 0xe41   :  { %7002 = vmatprep.subr.bf16.mxu0 %v7001_v3  ;;  %7034 = vmatprep.subr.bf16.mxu1 %v7033_v41  ;;  %v7003_v1 = vpack.c.bf16 %v3936_v44, %v3932_v53  ;;  %v7007_v3 = vpack.c.bf16 %v3944_v7, %v3940_v49  ;;  %v3948_v41 = vld [vmem:[#allocation12 + $0x80] sm:$0xff] }
 0xe42   :  { %v3964_v44 = vld [vmem:[#allocation12 + $0x100] sm:$0xff] }
 0xe43   :  { %v3972_v7 = vld [vmem:[#allocation12 + $0x140] sm:$0xff] }
 0xef6   :  { %v3567_v48 = vpop.f32.mrb[28].mxu0  ;;  %v3638_v34 = vpop.f32.mrb[28].mxu1 }
 0xef7   :  { %v7645_v35 = vadd.f32 %v3567_v48, %v9048_v60  ;;  %v3569_v47 = vpop.f32.mrb[29].mxu0  ;;  %v3640_v61 = vpop.f32.mrb[29].mxu1  ;;  %v7661_v46 = vadd.f32 %v3638_v34, %v9055_v37  ;;  %v3952_v48 = vld [vmem:[#allocation12 + $0xa0] sm:$0xff]  ;;  %v7009_v34 = vpack.c.bf16 %v3953_v6, %v3949_v19  ;;  %v3978_v19 = vld [vmem:[#allocation12 + $0x170] sm:$0xff]  ;;  %v3981_v6 = vld [vmem:[#allocation12 + $0x188] sm:$0xff] }
 0xef8   :  { %v7646_v11 = vadd.f32 %v3569_v47, %v9051_v62  ;;  %v7662_v40 = vadd.f32 %v3640_v61, %v9060_v58  ;;  %v3950_v47 = vld [vmem:[#allocation12 + $0x90] sm:$0xff] }
 0xef9   :  { %v3647_v15 = vmul.f32 0.5, %v7645_v35  ;;  %v7041_v35 = vpack.c.bf16 %v3955_v59, %v3951_v55  ;;  %v3954_v61 = vld [vmem:[#allocation12 + $0xb0] sm:$0xff]  ;;  %v3985_v55 = vld [vmem:[#allocation12 + $0x1a8] sm:$0xff]  ;;  %v3983_v59 = vld [vmem:[#allocation12 + $0x198] sm:$0xff] }
 0xefa   :  { %v3648_v28 = vmul.f32 0.5, %v7646_v11  ;;  %v3650_v51 = vmul.f32 0.5, %v7662_v40  ;;  %v3957_v11 = vld [vmem:[#allocation12 + $0xc8] sm:$0xff]  ;;  %v7011_v40 = vpack.c.bf16 %v3952_v48, %v3948_v41  ;;  %v7055_v41 = vpack.c.bf16 %v3978_v19, %v3974_v14  ;;  %v3980_v48 = vld [vmem:[#allocation12 + $0x180] sm:$0xff]  ;;  %v3878_v14 = vld [vmem:[#allocation14 + $0x98] sm:$0xff] }
 0xefb   :  { %7944 = vtanh.f32 %v3647_v15  ;;  %v3961_v15 = vld [vmem:[#allocation12 + $0xe8] sm:$0xff] }
 0xefc   :  { %7946 = vtanh.f32 %v3648_v28  ;;  %v3959_v28 = vld [vmem:[#allocation12 + $0xd8] sm:$0xff] }
 0xefd   :  { %7948 = vtanh.f32 %v7661_v46  ;;  %v3963_v46 = vld [vmem:[#allocation12 + $0xf8] sm:$0xff] }
 0xefe   :  { %7950 = vtanh.f32 %v3650_v51  ;;  %v7043_v51 = vpack.c.bf16 %v3954_v61, %v3950_v47  ;;  %v3982_v61 = vld [vmem:[#allocation12 + $0x190] sm:$0xff] }
 0xf05   :  { %v7945_v12 = vpop.eup %7944 }
 0xf06   :  { %v7947_v17 = vpop.eup %7946  ;;  %v3659_v21 = vmul.f32 0.5, %v7945_v12  ;;  %v3956_v12 = vld [vmem:[#allocation12 + $0xc0] sm:$0xff] }
 0xf07   :  { %v3660_v20 = vmul.f32 0.5, %v7947_v17  ;;  %v7949_v25 = vpop.eup %7948  ;;  %v3960_v17 = vld [vmem:[#allocation12 + $0xe0] sm:$0xff] }
 0xf08   :  { %v3663_v22 = vadd.f32 0.5, %v3659_v21  ;;  %v7951_v27 = vpop.eup %7950  ;;  %v7013_v21 = vpack.c.bf16 %v3961_v15, %v3957_v11  ;;  %v3986_v11 = vld [vmem:[#allocation12 + $0x1b0] sm:$0xff]  ;;  %v3989_v15 = vld [vmem:[#allocation12 + $0x1c8] sm:$0xff] }
 0xf09   :  { %v3664_v50 = vadd.f32 0.5, %v3660_v20  ;;  %v3662_v36 = vmul.f32 0.5, %v7951_v27  ;;  %v7045_v20 = vpack.c.bf16 %v3963_v46, %v3959_v28  ;;  %v3971_v27 = vld [vmem:[#allocation12 + $0x138] sm:$0xff]  ;;  %v3993_v28 = vld [vmem:[#allocation12 + $0x1e8] sm:$0xff] }
 0xf0a   :  { %v3672_v5 = vmul.f32 %v7949_v25, %v3663_v22  ;;  %v3958_v22 = vld [vmem:[#allocation12 + $0xd0] sm:$0xff]  ;;  %v3991_v46 = vld [vmem:[#allocation12 + $0x1d8] sm:$0xff] }
 0xf0b   :  { %v3671_v8 = vmul.f32 %v3664_v50, %v9293_v54  ;;  %v3666_v23 = vadd.f32 0.5, %v3662_v36  ;;  %v7005_v54 = vpack.c.bf16 %v3945_v63, %v3941_v56  ;;  %v3962_v25 = vld [vmem:[#allocation12 + $0xf0] sm:$0xff]  ;;  %v3965_v50 = vld [vmem:[#allocation12 + $0x108] sm:$0xff]  ;;  %v7015_v36 = vpack.c.bf16 %v3960_v17, %v3956_v12  ;;  %v3988_v17 = vld [vmem:[#allocation12 + $0x1c0] sm:$0xff] }
 0xf0c   :  { %v7047_v53 = vpack.c.bf16 %v3962_v25, %v3958_v22  ;;  %v3966_v63 = vld [vmem:[#allocation12 + $0x110] sm:$0xff]  ;;  %v7059_v12 = vpack.c.bf16 %v3986_v11, %v3982_v61  ;;  %v3992_v22 = vld [vmem:[#allocation12 + $0x1e0] sm:$0xff]  ;;  %v3886_v61 = vld [vmem:[#allocation14 + $0xd8] sm:$0xff] }
 0xf0d   :  { %v9337_v39 = vadd.f32 %v3672_v5, %v3671_v8  ;;  %v3969_v5 = vld [vmem:[#allocation12 + $0x128] sm:$0xff]  ;;  %v3967_v8 = vld [vmem:[#allocation12 + $0x118] sm:$0xff]  ;;  %v7051_v49 = vpack.c.bf16 %v3970_v52, %v3966_v63  ;;  %v3990_v25 = vld [vmem:[#allocation12 + $0x1d0] sm:$0xff] }
 0xf0e   :  { %v7017_v18 = vpack.c.bf16 %v3969_v5, %v3965_v50  ;;  %v7049_v56 = vpack.c.bf16 %v3971_v27, %v3967_v8  ;;  %v3994_v50 = vld [vmem:[#allocation12 + $0x1f0] sm:$0xff]  ;;  %v7031_v5 = vpack.c.bf16 %v3992_v22, %v3988_v17  ;;  %v3859_v27 = vld [vmem:[#allocation14] sm:$0xff]  ;;  %v3870_v63 = vld [vmem:[#allocation14 + $0x58] sm:$0xff] }
 0xf0f   :  { %7952 = vtanh.f32 %v9337_v39  ;;  %v7063_v8 = vpack.c.bf16 %v3994_v50, %v3990_v25  ;;  %v3889_v17 = vld [vmem:[#allocation14 + $0xf0] sm:$0xff]  ;;  %v3896_v22 = vld [vmem:[#allocation14 + $0x128] sm:$0xff]  ;;  %v3894_v25 = vld [vmem:[#allocation14 + $0x118] sm:$0xff] }
 0xf19   :  { %v7953_v57 = vpop.eup %7952 }
 0xf1a   :  { %v9340_v43 = vmul.f32 %v7953_v57, %v3666_v23  ;;  %v3977_v23 = vld [vmem:[#allocation12 + $0x168] sm:$0xff]  ;;  %v3975_v57 = vld [vmem:[#allocation12 + $0x158] sm:$0xff] }
 0xf1c   :  { %3746 = vmatmul.mubr.f32.vlgmr.msra.gmra.mrb[30].mxu0 %v9340_v43  ;;  %3817 = vmatmul.mubr.f32.vlgmr.msra.gmra.mrb[30].mxu1 %v9340_v43 }
 0xf1d   :  { %7004 = vmatpush1.bf16.msra.mxu0 %v7003_v1  ;;  %7036 = vmatpush1.bf16.msra.mxu1 %v7035_v45  ;;  %v3979_v1 = vld [vmem:[#allocation12 + $0x178] sm:$0xff]  ;;  %v7019_v45 = vpack.c.bf16 %v3968_v33, %v3964_v44  ;;  %v3861_v44 = vld [vmem:[#allocation14 + $0x10] sm:$0xff] }
 0xf1e   :  { %7006 = vmatprep.subr.bf16.mxu0 %v7005_v54  ;;  %7038 = vmatprep.subr.bf16.mxu1 %v7037_v38  ;;  %v3976_v54 = vld [vmem:[#allocation12 + $0x160] sm:$0xff]  ;;  %v7021_v38 = vpack.c.bf16 %v3977_v23, %v3973_v4  ;;  %v7053_v2 = vpack.c.bf16 %v3979_v1, %v3975_v57  ;;  %v3865_v33 = vld [vmem:[#allocation14 + $0x30] sm:$0xff]  ;;  %v3874_v4 = vld [vmem:[#allocation14 + $0x78] sm:$0xff] }
 0xf1f   :  { %4081 = vmatprep.mubr.f32.mxu0 %v8191_v0  ;;  %4194 = vmatprep.mubr.f32.mxu1 %v8191_v0  ;;  %v3867_v23 = vld [vmem:[#allocation14 + $0x40] sm:$0xff]  ;;  %v9388_v1 = vpack.c.bf16 %v3874_v4, %v3870_v63 }
 0xf20   :  { %v3871_v57 = vld [vmem:[#allocation14 + $0x60] sm:$0xff] }
 0xf21   :  { %7008 = vmatpush1.bf16.msra.mxu0 %v7007_v3  ;;  %7040 = vmatpush1.bf16.msra.mxu1 %v7039_v30  ;;  %v3987_v3 = vld [vmem:[#allocation12 + $0x1b8] sm:$0xff]  ;;  %v7023_v30 = vpack.c.bf16 %v3976_v54, %v3972_v7  ;;  %v3873_v7 = vld [vmem:[#allocation14 + $0x70] sm:$0xff] }
 0xf22   :  { %7010 = vmatprep.subr.bf16.mxu0 %v7009_v34  ;;  %7042 = vmatprep.subr.bf16.mxu1 %v7041_v35  ;;  %v3984_v34 = vld [vmem:[#allocation12 + $0x1a0] sm:$0xff]  ;;  %v7025_v35 = vpack.c.bf16 %v3985_v55, %v3981_v6  ;;  %v7057_v47 = vpack.c.bf16 %v3987_v3, %v3983_v59  ;;  %v3882_v6 = vld [vmem:[#allocation14 + $0xb8] sm:$0xff] }
 0xf23   :  { %v3875_v55 = vld [vmem:[#allocation14 + $0x80] sm:$0xff]  ;;  %v9400_v3 = vpack.c.bf16 %v3882_v6, %v3878_v14  ;;  %v3912_v14 = vld [vmem:[#allocation14 + $0x1a8] sm:$0xff] }
 0xf24   :  { %v3879_v59 = vld [vmem:[#allocation14 + $0xa0] sm:$0xff] }
 0xf25   :  { %7012 = vmatpush1.bf16.msra.mxu0 %v7011_v40  ;;  %7044 = vmatpush1.bf16.msra.mxu1 %v7043_v51  ;;  %v3995_v40 = vld [vmem:[#allocation12 + $0x1f8] sm:$0xff]  ;;  %v7027_v51 = vpack.c.bf16 %v3984_v34, %v3980_v48  ;;  %v3881_v48 = vld [vmem:[#allocation14 + $0xb0] sm:$0xff] }
 0xf26   :  { %7014 = vmatprep.subr.bf16.mxu0 %v7013_v21  ;;  %7046 = vmatprep.subr.bf16.mxu1 %v7045_v20  ;;  %v7029_v21 = vpack.c.bf16 %v3993_v28, %v3989_v15  ;;  %v7061_v20 = vpack.c.bf16 %v3995_v40, %v3991_v46  ;;  %v3890_v15 = vld [vmem:[#allocation14 + $0xf8] sm:$0xff]  ;;  %v3883_v28 = vld [vmem:[#allocation14 + $0xc0] sm:$0xff] }
 0xf27   :  { %v3887_v46 = vld [vmem:[#allocation14 + $0xe0] sm:$0xff]  ;;  %v9412_v40 = vpack.c.bf16 %v3890_v15, %v3886_v61  ;;  %v3909_v61 = vld [vmem:[#allocation14 + $0x190] sm:$0xff] }
 0xf28   :  { %v3913_v15 = vld [vmem:[#allocation14 + $0x1b0] sm:$0xff] }
 0xf29   :  { %7016 = vmatpush1.bf16.msra.mxu0 %v7015_v36  ;;  %7048 = vmatpush1.bf16.msra.mxu1 %v7047_v53 }
 0xf2a   :  { %7018 = vmatprep.subr.bf16.mxu0 %v7017_v18  ;;  %7050 = vmatprep.subr.bf16.mxu1 %v7049_v56  ;;  %v3868_v18 = vld [vmem:[#allocation14 + $0x48] sm:$0xff] }
 0xf2b   :  { %v3872_v56 = vld [vmem:[#allocation14 + $0x68] sm:$0xff] }
 0xf2c   :  { %v9386_v52 = vpack.c.bf16 %v3872_v56, %v3868_v18  ;;  %v3902_v18 = vld [vmem:[#allocation14 + $0x158] sm:$0xff] }
 0xf2d   :  { %7020 = vmatpush1.bf16.msra.mxu0 %v7019_v45  ;;  %7052 = vmatpush1.bf16.msra.mxu1 %v7051_v49  ;;  %v9390_v45 = vpack.c.bf16 %v3871_v57, %v3867_v23  ;;  %v3869_v49 = vld [vmem:[#allocation14 + $0x50] sm:$0xff]  ;;  %v3906_v56 = vld [vmem:[#allocation14 + $0x178] sm:$0xff]  ;;  %v3899_v23 = vld [vmem:[#allocation14 + $0x140] sm:$0xff] }
 0xf2e   :  { %7022 = vmatprep.subr.bf16.mxu0 %v7021_v38  ;;  %7054 = vmatprep.subr.bf16.mxu1 %v7053_v2  ;;  %v9393_v54 = vpack.c.bf16 %v3873_v7, %v3869_v49  ;;  %v3876_v38 = vld [vmem:[#allocation14 + $0x88] sm:$0xff]  ;;  %v9435_v4 = vpack.c.bf16 %v3906_v56, %v3902_v18  ;;  %v3903_v57 = vld [vmem:[#allocation14 + $0x160] sm:$0xff]  ;;  %v3901_v49 = vld [vmem:[#allocation14 + $0x150] sm:$0xff] }
 0xf2f   :  { %v3880_v2 = vld [vmem:[#allocation14 + $0xa8] sm:$0xff]  ;;  %v9438_v7 = vpack.c.bf16 %v3903_v57, %v3899_v23 }
 0xf30   :  { %v9398_v19 = vpack.c.bf16 %v3880_v2, %v3876_v38  ;;  %v3905_v38 = vld [vmem:[#allocation14 + $0x170] sm:$0xff]  ;;  %v3908_v2 = vld [vmem:[#allocation14 + $0x188] sm:$0xff] }
 0xf31   :  { %7024 = vmatpush1.bf16.msra.mxu0 %v7023_v30  ;;  %7056 = vmatpush1.bf16.msra.mxu1 %v7055_v41  ;;  %v9402_v30 = vpack.c.bf16 %v3879_v59, %v3875_v55  ;;  %v3877_v41 = vld [vmem:[#allocation14 + $0x90] sm:$0xff]  ;;  %v9442_v6 = vpack.c.bf16 %v3905_v38, %v3901_v49  ;;  %v9444_v55 = vpack.c.bf16 %v3912_v14, %v3908_v2  ;;  %v3910_v59 = vld [vmem:[#allocation14 + $0x198] sm:$0xff] }
 0xf32   :  { %7026 = vmatprep.subr.bf16.mxu0 %v7025_v35  ;;  %7058 = vmatprep.subr.bf16.mxu1 %v7057_v47  ;;  %v9405_v34 = vpack.c.bf16 %v3881_v48, %v3877_v41  ;;  %v3884_v35 = vld [vmem:[#allocation14 + $0xc8] sm:$0xff]  ;;  %v3914_v41 = vld [vmem:[#allocation14 + $0x1b8] sm:$0xff]  ;;  %v3907_v48 = vld [vmem:[#allocation14 + $0x180] sm:$0xff] }
 0xf33   :  { %v3888_v47 = vld [vmem:[#allocation14 + $0xe8] sm:$0xff] }
 0xf34   :  { %v9410_v11 = vpack.c.bf16 %v3888_v47, %v3884_v35  ;;  %v9446_v35 = vpack.c.bf16 %v3914_v41, %v3910_v59  ;;  %v3911_v47 = vld [vmem:[#allocation14 + $0x1a0] sm:$0xff] }
 0xf35   :  { %7028 = vmatpush1.bf16.msra.mxu0 %v7027_v51  ;;  %7060 = vmatpush1.bf16.msra.mxu1 %v7059_v12  ;;  %v9414_v51 = vpack.c.bf16 %v3887_v46, %v3883_v28  ;;  %v3885_v12 = vld [vmem:[#allocation14 + $0xd0] sm:$0xff]  ;;  %v9449_v28 = vpack.c.bf16 %v3911_v47, %v3907_v48  ;;  %v9453_v46 = vpack.c.bf16 %v3913_v15, %v3909_v61 }
 0xf36   :  { %7030 = vmatprep.subr.bf16.mxu0 %v7029_v21  ;;  %7062 = vmatprep.subr.bf16.mxu1 %v7061_v20  ;;  %v9417_v21 = vpack.c.bf16 %v3889_v17, %v3885_v12  ;;  %v3892_v20 = vld [vmem:[#allocation14 + $0x108] sm:$0xff] }
 0xf37   :  { %v9422_v50 = vpack.c.bf16 %v3896_v22, %v3892_v20  ;;  %v3916_v12 = vld [vmem:[#allocation14 + $0x1c8] sm:$0xff]  ;;  %v3918_v20 = vld [vmem:[#allocation14 + $0x1d8] sm:$0xff] }
 0xf38   :  { %v3920_v17 = vld [vmem:[#allocation14 + $0x1e8] sm:$0xff] }
 0xf39   :  { %7032 = vmatpush1.bf16.msra.mxu0 %v7031_v5  ;;  %7064 = vmatpush1.bf16.msra.mxu1 %v7063_v8  ;;  %v3898_v5 = vld [vmem:[#allocation14 + $0x138] sm:$0xff]  ;;  %v3891_v8 = vld [vmem:[#allocation14 + $0x100] sm:$0xff]  ;;  %v9458_v22 = vpack.c.bf16 %v3920_v17, %v3916_v12 }
 0xf3c   :  { %4082 = vmatmul.mubr.f32.vlgmr.msra.gmra.mrb[32].mxu0 %v9066_v32  ;;  %4195 = vmatmul.mubr.f32.vlgmr.msra.gmra.mrb[32].mxu1 %v9066_v32  ;;  %v3860_v32 = vld [vmem:[#allocation14 + $0x8] sm:$0xff] }
 0xf3d   :  { %4087 = vmatprep.mubr.f32.mxu0 %v8191_v0  ;;  %4200 = vmatprep.mubr.f32.mxu1 %v8191_v0 }
 0xf40   :  { %4088 = vmatmul.mubr.f32.gmra.mrb[34].mxu0 %v9112_v42  ;;  %4201 = vmatmul.mubr.f32.gmra.mrb[34].mxu1 %v9112_v42  ;;  %v3864_v42 = vld [vmem:[#allocation14 + $0x28] sm:$0xff] }
 0xf41   :  { %4093 = vmatprep.mubr.f32.mxu0 %v8191_v0  ;;  %4206 = vmatprep.mubr.f32.mxu1 %v8191_v0 }
 0xf44   :  { %4094 = vmatmul.mubr.f32.gmra.mrb[36].mxu0 %v9158_v24  ;;  %4207 = vmatmul.mubr.f32.gmra.mrb[36].mxu1 %v9158_v24  ;;  %v3862_v24 = vld [vmem:[#allocation14 + $0x18] sm:$0xff] }
 0xf45   :  { %4099 = vmatprep.mubr.f32.mxu0 %v8191_v0  ;;  %4212 = vmatprep.mubr.f32.mxu1 %v8191_v0 }
 0xf48   :  { %4100 = vmatmul.mubr.f32.gmra.mrb[38].mxu0 %v9204_v26  ;;  %4213 = vmatmul.mubr.f32.gmra.mrb[38].mxu1 %v9204_v26  ;;  %v9374_v26 = vpack.c.bf16 %v3864_v42, %v3860_v32  ;;  %v3895_v32 = vld [vmem:[#allocation14 + $0x120] sm:$0xff]  ;;  %v9424_v42 = vpack.c.bf16 %v3898_v5, %v3894_v25  ;;  %v3922_v25 = vld [vmem:[#allocation14 + $0x1f8] sm:$0xff] }
 0xf49   :  { %4105 = vmatprep.mubr.f32.mxu0 %v8191_v0  ;;  %4218 = vmatprep.mubr.f32.mxu1 %v8191_v0  ;;  %v3915_v5 = vld [vmem:[#allocation14 + $0x1c0] sm:$0xff] }
 0xf4a   :  { %7066 = vmatprep.subr.bf16.mxu0 %v9374_v26 }
 0xf4c   :  { %4106 = vmatmul.mubr.f32.gmra.mrb[40].mxu0 %v9250_v29  ;;  %4219 = vmatmul.mubr.f32.gmra.mrb[40].mxu1 %v9250_v29  ;;  %v3866_v29 = vld [vmem:[#allocation14 + $0x38] sm:$0xff] }
 0xf4d   :  { %4111 = vmatprep.mubr.f32.mxu0 %v8191_v0  ;;  %4224 = vmatprep.mubr.f32.mxu1 %v8191_v0  ;;  %v9376_v36 = vpack.c.bf16 %v3866_v29, %v3862_v24  ;;  %v9426_v24 = vpack.c.bf16 %v3895_v32, %v3891_v8  ;;  %v3893_v29 = vld [vmem:[#allocation14 + $0x110] sm:$0xff]  ;;  %v3919_v8 = vld [vmem:[#allocation14 + $0x1e0] sm:$0xff]  ;;  %v9460_v32 = vpack.c.bf16 %v3922_v25, %v3918_v20 }
 0xf4f   :  { %7098 = vmatprep.subr.bf16.mxu1 %v9376_v36 }
 0xf50   :  { %4112 = vmatmul.mubr.f32.gmra.mrb[42].mxu0 %v9296_v9  ;;  %4225 = vmatmul.mubr.f32.gmra.mrb[42].mxu1 %v9296_v9  ;;  %v3863_v9 = vld [vmem:[#allocation14 + $0x20] sm:$0xff] }
 0xf51   :  { %4117 = vmatprep.mubr.f32.mxu0 %v8191_v0  ;;  %4230 = vmatprep.mubr.f32.mxu1 %v8191_v0  ;;  %v9378_v53 = vpack.c.bf16 %v3863_v9, %v3859_v27  ;;  %v3897_v27 = vld [vmem:[#allocation14 + $0x130] sm:$0xff]  ;;  %v3900_v9 = vld [vmem:[#allocation14 + $0x148] sm:$0xff] }
 0xf53   :  { %7068 = vmatpush1.bf16.msra.mxu0 %v9378_v53 }
 0xf54   :  { %4118 = vmatmul.mubr.f32.gmra.mrb[44].mxu0 %v9340_v43  ;;  %4231 = vmatmul.mubr.f32.gmra.mrb[44].mxu1 %v9340_v43  ;;  %v9381_v43 = vpack.c.bf16 %v3865_v33, %v3861_v44  ;;  %v9429_v44 = vpack.c.bf16 %v3897_v27, %v3893_v29  ;;  %v3904_v33 = vld [vmem:[#allocation14 + $0x168] sm:$0xff]  ;;  %v9462_v29 = vpack.c.bf16 %v3919_v8, %v3915_v5  ;;  %v3917_v27 = vld [vmem:[#allocation14 + $0x1d0] sm:$0xff] }
 0xf55   :  { %4123 = vmatprep.mubr.f32.mxu0 %v8191_v0  ;;  %4236 = vmatprep.mubr.f32.mxu1 %v8191_v0  ;;  %v9433_v63 = vpack.c.bf16 %v3904_v33, %v3900_v9  ;;  %v3921_v9 = vld [vmem:[#allocation14 + $0x1f0] sm:$0xff] }
 0xf56   :  { %7100 = vmatpush1.bf16.msra.mxu1 %v9381_v43  ;;  %7070 = vmatprep.subr.bf16.mxu0 %v9386_v52  ;;  %v9465_v33 = vpack.c.bf16 %v3921_v9, %v3917_v27 }
 0xf57   :  { %7102 = vmatprep.subr.bf16.mxu1 %v9388_v1  ;;  %7072 = vmatpush1.bf16.msra.mxu0 %v9390_v45 }
 0xf58   :  { %7074 = vmatprep.subr.bf16.mxu0 %v9398_v19 }
 0xf5a   :  { %7104 = vmatpush1.bf16.msra.mxu1 %v9393_v54 }
 0xf5b   :  { %7106 = vmatprep.subr.bf16.mxu1 %v9400_v3  ;;  %7076 = vmatpush1.bf16.msra.mxu0 %v9402_v30 }
 0xf5c   :  { %7078 = vmatprep.subr.bf16.mxu0 %v9410_v11 }
 0xf5e   :  { %7108 = vmatpush1.bf16.msra.mxu1 %v9405_v34 }
 0xf5f   :  { %7110 = vmatprep.subr.bf16.mxu1 %v9412_v40  ;;  %7080 = vmatpush1.bf16.msra.mxu0 %v9414_v51 }
 0xf60   :  { %7082 = vmatprep.subr.bf16.mxu0 %v9422_v50 }
 0xf62   :  { %7112 = vmatpush1.bf16.msra.mxu1 %v9417_v21 }
 0xf63   :  { %7114 = vmatprep.subr.bf16.mxu1 %v9424_v42  ;;  %7084 = vmatpush1.bf16.msra.mxu0 %v9426_v24 }
 0xf64   :  { %7086 = vmatprep.subr.bf16.mxu0 %v9433_v63 }
 0xf66   :  { %7116 = vmatpush1.bf16.msra.mxu1 %v9429_v44 }
 0xf67   :  { %7118 = vmatprep.subr.bf16.mxu1 %v9435_v4  ;;  %7088 = vmatpush1.bf16.msra.mxu0 %v9438_v7 }
 0xf68   :  { %7090 = vmatprep.subr.bf16.mxu0 %v9444_v55 }
 0xf6a   :  { %7120 = vmatpush1.bf16.msra.mxu1 %v9442_v6 }
 0xf6b   :  { %7122 = vmatprep.subr.bf16.mxu1 %v9446_v35  ;;  %7092 = vmatpush1.bf16.msra.mxu0 %v9449_v28 }
 0xf6c   :  { %7094 = vmatprep.subr.bf16.mxu0 %v9458_v22 }
 0xf6e   :  { %7124 = vmatpush1.bf16.msra.mxu1 %v9453_v46 }
 0xf6f   :  { %7126 = vmatprep.subr.bf16.mxu1 %v9460_v32  ;;  %7096 = vmatpush1.bf16.msra.mxu0 %v9462_v29 }
 0xf70   :  { %7130 = vmatprep.subr.bf16.mxu0 %v9374_v26 }
 0xf72   :  { %7128 = vmatpush1.bf16.msra.mxu1 %v9465_v33 }
 0xf73   :  { %7162 = vmatprep.subr.bf16.mxu1 %v9376_v36 }
 0xfef   :  { %v3747_v18 = vpop.f32.mrb[30].mxu0  ;;  %v3818_v56 = vpop.f32.mrb[30].mxu1 }
 0xff0   :  { %v7647_v23 = vadd.f32 %v3747_v18, %v9048_v60  ;;  %v3749_v57 = vpop.f32.mrb[31].mxu0  ;;  %v3820_v49 = vpop.f32.mrb[31].mxu1  ;;  %v7663_v59 = vadd.f32 %v3818_v56, %v9055_v37 }
 0xff1   :  { %v7648_v38 = vadd.f32 %v3749_v57, %v9051_v62  ;;  %v7664_v41 = vadd.f32 %v3820_v49, %v9060_v58  ;;  %v3923_v58 = vld [vmem:[%s9865_s9] sm:$0xf] }
 0xff2   :  { %v3827_v2 = vmul.f32 0.5, %v7647_v23  ;;  %v9522_v56 = vrot.slane %v3923_v58, %v8570_v13 }
 0xff3   :  { %v3828_v14 = vmul.f32 0.5, %v7648_v38  ;;  %v3830_v48 = vmul.f32 0.5, %v7664_v41  ;;  %v9526_v38 = vrot.slane %v3923_v58, %v8575_v16 }
 0xff4   :  { %7954 = vtanh.f32 %v3827_v2 }
 0xff5   :  { %7956 = vtanh.f32 %v3828_v14 }
 0xff6   :  { %7958 = vtanh.f32 %v7663_v59 }
 0xff7   :  { %7960 = vtanh.f32 %v3830_v48 }
 0xffe   :  { %v7955_v47 = vpop.eup %7954 }
 0xfff   :  { %v7957_v61 = vpop.eup %7956  ;;  %v3839_v15 = vmul.f32 0.5, %v7955_v47  ;;  %v9531_v47 = vrot.slane %v3923_v58, %v8584_v31 }
0x1000   :  { %v3840_v12 = vmul.f32 0.5, %v7957_v61  ;;  %v7959_v17 = vpop.eup %7958 }
0x1001   :  { %v3843_v60 = vadd.f32 0.5, %v3839_v15  ;;  %v7961_v8 = vpop.eup %7960 }
0x1002   :  { %v3844_v20 = vadd.f32 0.5, %v3840_v12  ;;  %v3842_v37 = vmul.f32 0.5, %v7961_v8 }
0x1003   :  { %v3852_v25 = vmul.f32 %v7959_v17, %v3843_v60 }
0x1004   :  { %v3851_v62 = vmul.f32 %v3844_v20, %v9337_v39  ;;  %v3846_v27 = vadd.f32 0.5, %v3842_v37  ;;  %v9519_v39 = vrot.slane %v3923_v58, %v8565_v10 }
0x1006   :  { %v3853_v5 = vadd.f32 %v3852_v25, %v3851_v62 }
0x1008   :  { %7962 = vtanh.f32 %v3853_v5 }
0x1012   :  { %v7963_v9 = vpop.eup %7962 }
0x1013   :  { %v3855_v18 = vmul.f32 %v7963_v9, %v3846_v27 }
0x1015   :  { %4124 = vmatmul.mubr.f32.gmra.mrb[46].mxu0 %v3855_v18  ;;  %4237 = vmatmul.mubr.f32.gmra.mrb[46].mxu1 %v3855_v18 }
0x1016   :  { %4347 = vmatprep.mubr.f32.mxu0 %v8191_v0  ;;  %4418 = vmatprep.mubr.f32.mxu1 %v8191_v0 }
0x1019   :  { %4348 = vmatmul.mubr.f32.vlgmr.msra.gmra.mrb[32].mxu0 %v8191_v0  ;;  %4419 = vmatmul.mubr.f32.vlgmr.msra.gmra.mrb[32].mxu1 %v8191_v0 }
0x101a   :  { %7132 = vmatpush1.bf16.msra.mxu0 %v9378_v53  ;;  %7164 = vmatpush1.bf16.msra.mxu1 %v9381_v43 }
0x101b   :  { %7134 = vmatprep.subr.bf16.mxu0 %v9386_v52  ;;  %7166 = vmatprep.subr.bf16.mxu1 %v9388_v1 }
0x101c   :  { %4526 = vmatprep.mubr.f32.mxu0 %v8191_v0  ;;  %4597 = vmatprep.mubr.f32.mxu1 %v8191_v0 }
0x101e   :  { %7136 = vmatpush1.bf16.msra.mxu0 %v9390_v45  ;;  %7168 = vmatpush1.bf16.msra.mxu1 %v9393_v54 }
0x101f   :  { %7138 = vmatprep.subr.bf16.mxu0 %v9398_v19  ;;  %7170 = vmatprep.subr.bf16.mxu1 %v9400_v3 }
0x1022   :  { %7140 = vmatpush1.bf16.msra.mxu0 %v9402_v30  ;;  %7172 = vmatpush1.bf16.msra.mxu1 %v9405_v34 }
0x1023   :  { %7142 = vmatprep.subr.bf16.mxu0 %v9410_v11  ;;  %7174 = vmatprep.subr.bf16.mxu1 %v9412_v40 }
0x1026   :  { %7144 = vmatpush1.bf16.msra.mxu0 %v9414_v51  ;;  %7176 = vmatpush1.bf16.msra.mxu1 %v9417_v21 }
0x1027   :  { %7146 = vmatprep.subr.bf16.mxu0 %v9422_v50  ;;  %7178 = vmatprep.subr.bf16.mxu1 %v9424_v42 }
0x102a   :  { %7148 = vmatpush1.bf16.msra.mxu0 %v9426_v24  ;;  %7180 = vmatpush1.bf16.msra.mxu1 %v9429_v44 }
0x102b   :  { %7150 = vmatprep.subr.bf16.mxu0 %v9433_v63  ;;  %7182 = vmatprep.subr.bf16.mxu1 %v9435_v4 }
0x102e   :  { %7152 = vmatpush1.bf16.msra.mxu0 %v9438_v7  ;;  %7184 = vmatpush1.bf16.msra.mxu1 %v9442_v6 }
0x102f   :  { %7154 = vmatprep.subr.bf16.mxu0 %v9444_v55  ;;  %7186 = vmatprep.subr.bf16.mxu1 %v9446_v35 }
0x1032   :  { %7156 = vmatpush1.bf16.msra.mxu0 %v9449_v28  ;;  %7188 = vmatpush1.bf16.msra.mxu1 %v9453_v46 }
0x1033   :  { %7158 = vmatprep.subr.bf16.mxu0 %v9458_v22  ;;  %7190 = vmatprep.subr.bf16.mxu1 %v9460_v32 }
0x1036   :  { %7160 = vmatpush1.bf16.msra.mxu0 %v9462_v29  ;;  %7192 = vmatpush1.bf16.msra.mxu1 %v9465_v33 }
0x1037   :  { %7194 = vmatprep.subr.bf16.mxu0 %v9374_v26  ;;  %7226 = vmatprep.subr.bf16.mxu1 %v9376_v36 }
0x10ec   :  { %v4349_v23 = vpop.f32.mrb[32].mxu0  ;;  %v4420_v57 = vpop.f32.mrb[32].mxu1 }
0x10ed   :  { %v7665_v49 = vadd.f32 %v4349_v23, %v9519_v39  ;;  %v4351_v2 = vpop.f32.mrb[33].mxu0  ;;  %v4422_v14 = vpop.f32.mrb[33].mxu1  ;;  %v7681_v10 = vadd.f32 %v4420_v57, %v9526_v38 }
0x10ee   :  { %v7666_v59 = vadd.f32 %v4351_v2, %v9522_v56  ;;  %v7682_v13 = vadd.f32 %v4422_v14, %v9531_v47 }
0x10ef   :  { %v4429_v41 = vmul.f32 0.5, %v7665_v49 }
0x10f0   :  { %v4430_v48 = vmul.f32 0.5, %v7666_v59  ;;  %v4432_v61 = vmul.f32 0.5, %v7682_v13 }
0x10f1   :  { %7964 = vtanh.f32 %v4429_v41 }
0x10f2   :  { %7966 = vtanh.f32 %v4430_v48 }
0x10f3   :  { %7968 = vtanh.f32 %v7681_v10 }
0x10f4   :  { %7970 = vtanh.f32 %v4432_v61 }
0x10fb   :  { %v7965_v15 = vpop.eup %7964 }
0x10fc   :  { %v7967_v16 = vpop.eup %7966  ;;  %v4441_v12 = vmul.f32 0.5, %v7965_v15 }
0x10fd   :  { %v4442_v60 = vmul.f32 0.5, %v7967_v16  ;;  %v7969_v20 = vpop.eup %7968 }
0x10fe   :  { %v4445_v17 = vadd.f32 0.5, %v4441_v12  ;;  %v7971_v31 = vpop.eup %7970 }
0x10ff   :  { %v4446_v25 = vadd.f32 0.5, %v4442_v60  ;;  %v4444_v37 = vmul.f32 0.5, %v7971_v31 }
0x1100   :  { %v4454_v62 = vmul.f32 %v7969_v20, %v4445_v17 }
0x1101   :  { %v4453_v5 = vmul.f32 0.0, %v4446_v25  ;;  %v4448_v27 = vadd.f32 0.5, %v4444_v37 }
0x1103   :  { %v9534_v8 = vadd.f32 %v4454_v62, %v4453_v5 }
0x1105   :  { %7972 = vtanh.f32 %v9534_v8 }
0x110f   :  { %v7973_v9 = vpop.eup %7972 }
0x1110   :  { %v4457_v18 = vmul.f32 %v7973_v9, %v4448_v27 }
0x1112   :  { %4527 = vmatmul.mubr.f32.vlgmr.msra.gmra.mrb[34].mxu0 %v4457_v18  ;;  %4598 = vmatmul.mubr.f32.vlgmr.msra.gmra.mrb[34].mxu1 %v4457_v18 }
0x1113   :  { %7196 = vmatpush1.bf16.msra.mxu0 %v9378_v53  ;;  %7228 = vmatpush1.bf16.msra.mxu1 %v9381_v43 }
0x1114   :  { %7198 = vmatprep.subr.bf16.mxu0 %v9386_v52  ;;  %7230 = vmatprep.subr.bf16.mxu1 %v9388_v1 }
0x1115   :  { %4705 = vmatprep.mubr.f32.mxu0 %v8191_v0  ;;  %4776 = vmatprep.mubr.f32.mxu1 %v8191_v0 }
0x1117   :  { %7200 = vmatpush1.bf16.msra.mxu0 %v9390_v45  ;;  %7232 = vmatpush1.bf16.msra.mxu1 %v9393_v54 }
0x1118   :  { %7202 = vmatprep.subr.bf16.mxu0 %v9398_v19  ;;  %7234 = vmatprep.subr.bf16.mxu1 %v9400_v3 }
0x111b   :  { %7204 = vmatpush1.bf16.msra.mxu0 %v9402_v30  ;;  %7236 = vmatpush1.bf16.msra.mxu1 %v9405_v34 }
0x111c   :  { %7206 = vmatprep.subr.bf16.mxu0 %v9410_v11  ;;  %7238 = vmatprep.subr.bf16.mxu1 %v9412_v40 }
0x111f   :  { %7208 = vmatpush1.bf16.msra.mxu0 %v9414_v51  ;;  %7240 = vmatpush1.bf16.msra.mxu1 %v9417_v21 }
0x1120   :  { %7210 = vmatprep.subr.bf16.mxu0 %v9422_v50  ;;  %7242 = vmatprep.subr.bf16.mxu1 %v9424_v42 }
0x1123   :  { %7212 = vmatpush1.bf16.msra.mxu0 %v9426_v24  ;;  %7244 = vmatpush1.bf16.msra.mxu1 %v9429_v44 }
0x1124   :  { %7214 = vmatprep.subr.bf16.mxu0 %v9433_v63  ;;  %7246 = vmatprep.subr.bf16.mxu1 %v9435_v4 }
0x1127   :  { %7216 = vmatpush1.bf16.msra.mxu0 %v9438_v7  ;;  %7248 = vmatpush1.bf16.msra.mxu1 %v9442_v6 }
0x1128   :  { %7218 = vmatprep.subr.bf16.mxu0 %v9444_v55  ;;  %7250 = vmatprep.subr.bf16.mxu1 %v9446_v35 }
0x112b   :  { %7220 = vmatpush1.bf16.msra.mxu0 %v9449_v28  ;;  %7252 = vmatpush1.bf16.msra.mxu1 %v9453_v46 }
0x112c   :  { %7222 = vmatprep.subr.bf16.mxu0 %v9458_v22  ;;  %7254 = vmatprep.subr.bf16.mxu1 %v9460_v32 }
0x112f   :  { %7224 = vmatpush1.bf16.msra.mxu0 %v9462_v29  ;;  %7256 = vmatpush1.bf16.msra.mxu1 %v9465_v33 }
0x1130   :  { %7258 = vmatprep.subr.bf16.mxu0 %v9374_v26  ;;  %7290 = vmatprep.subr.bf16.mxu1 %v9376_v36 }
0x11e5   :  { %v4528_v58 = vpop.f32.mrb[34].mxu0  ;;  %v4599_v23 = vpop.f32.mrb[34].mxu1 }
0x11e6   :  { %v7667_v57 = vadd.f32 %v4528_v58, %v9519_v39  ;;  %v4530_v49 = vpop.f32.mrb[35].mxu0  ;;  %v4601_v2 = vpop.f32.mrb[35].mxu1  ;;  %v7683_v48 = vadd.f32 %v4599_v23, %v9526_v38 }
0x11e7   :  { %v7668_v14 = vadd.f32 %v4530_v49, %v9522_v56  ;;  %v7684_v10 = vadd.f32 %v4601_v2, %v9531_v47 }
0x11e8   :  { %v4608_v59 = vmul.f32 0.5, %v7667_v57 }
0x11e9   :  { %v4609_v41 = vmul.f32 0.5, %v7668_v14  ;;  %v4611_v13 = vmul.f32 0.5, %v7684_v10 }
0x11ea   :  { %7974 = vtanh.f32 %v4608_v59 }
0x11eb   :  { %7976 = vtanh.f32 %v4609_v41 }
0x11ec   :  { %7978 = vtanh.f32 %v7683_v48 }
0x11ed   :  { %7980 = vtanh.f32 %v4611_v13 }
0x11f4   :  { %v7975_v61 = vpop.eup %7974 }
0x11f5   :  { %v7977_v15 = vpop.eup %7976  ;;  %v4620_v16 = vmul.f32 0.5, %v7975_v61 }
0x11f6   :  { %v4621_v12 = vmul.f32 0.5, %v7977_v15  ;;  %v7979_v17 = vpop.eup %7978 }
0x11f7   :  { %v4624_v60 = vadd.f32 0.5, %v4620_v16  ;;  %v7981_v31 = vpop.eup %7980 }
0x11f8   :  { %v4625_v20 = vadd.f32 0.5, %v4621_v12  ;;  %v4623_v37 = vmul.f32 0.5, %v7981_v31 }
0x11f9   :  { %v4633_v25 = vmul.f32 %v7979_v17, %v4624_v60 }
0x11fa   :  { %v4632_v62 = vmul.f32 %v4625_v20, %v9534_v8  ;;  %v4627_v27 = vadd.f32 0.5, %v4623_v37 }
0x11fc   :  { %v9576_v5 = vadd.f32 %v4633_v25, %v4632_v62 }
0x11fe   :  { %7982 = vtanh.f32 %v9576_v5 }
0x1208   :  { %v7983_v9 = vpop.eup %7982 }
0x1209   :  { %v4636_v18 = vmul.f32 %v7983_v9, %v4627_v27 }
0x120b   :  { %4706 = vmatmul.mubr.f32.vlgmr.msra.gmra.mrb[36].mxu0 %v4636_v18  ;;  %4777 = vmatmul.mubr.f32.vlgmr.msra.gmra.mrb[36].mxu1 %v4636_v18 }
0x120c   :  { %7260 = vmatpush1.bf16.msra.mxu0 %v9378_v53  ;;  %7292 = vmatpush1.bf16.msra.mxu1 %v9381_v43 }
0x120d   :  { %7262 = vmatprep.subr.bf16.mxu0 %v9386_v52  ;;  %7294 = vmatprep.subr.bf16.mxu1 %v9388_v1 }
0x120e   :  { %4884 = vmatprep.mubr.f32.mxu0 %v8191_v0  ;;  %4955 = vmatprep.mubr.f32.mxu1 %v8191_v0 }
0x1210   :  { %7264 = vmatpush1.bf16.msra.mxu0 %v9390_v45  ;;  %7296 = vmatpush1.bf16.msra.mxu1 %v9393_v54 }
0x1211   :  { %7266 = vmatprep.subr.bf16.mxu0 %v9398_v19  ;;  %7298 = vmatprep.subr.bf16.mxu1 %v9400_v3 }
0x1214   :  { %7268 = vmatpush1.bf16.msra.mxu0 %v9402_v30  ;;  %7300 = vmatpush1.bf16.msra.mxu1 %v9405_v34 }
0x1215   :  { %7270 = vmatprep.subr.bf16.mxu0 %v9410_v11  ;;  %7302 = vmatprep.subr.bf16.mxu1 %v9412_v40 }
0x1218   :  { %7272 = vmatpush1.bf16.msra.mxu0 %v9414_v51  ;;  %7304 = vmatpush1.bf16.msra.mxu1 %v9417_v21 }
0x1219   :  { %7274 = vmatprep.subr.bf16.mxu0 %v9422_v50  ;;  %7306 = vmatprep.subr.bf16.mxu1 %v9424_v42 }
0x121c   :  { %7276 = vmatpush1.bf16.msra.mxu0 %v9426_v24  ;;  %7308 = vmatpush1.bf16.msra.mxu1 %v9429_v44 }
0x121d   :  { %7278 = vmatprep.subr.bf16.mxu0 %v9433_v63  ;;  %7310 = vmatprep.subr.bf16.mxu1 %v9435_v4 }
0x1220   :  { %7280 = vmatpush1.bf16.msra.mxu0 %v9438_v7  ;;  %7312 = vmatpush1.bf16.msra.mxu1 %v9442_v6 }
0x1221   :  { %7282 = vmatprep.subr.bf16.mxu0 %v9444_v55  ;;  %7314 = vmatprep.subr.bf16.mxu1 %v9446_v35 }
0x1224   :  { %7284 = vmatpush1.bf16.msra.mxu0 %v9449_v28  ;;  %7316 = vmatpush1.bf16.msra.mxu1 %v9453_v46 }
0x1225   :  { %7286 = vmatprep.subr.bf16.mxu0 %v9458_v22  ;;  %7318 = vmatprep.subr.bf16.mxu1 %v9460_v32 }
0x1228   :  { %7288 = vmatpush1.bf16.msra.mxu0 %v9462_v29  ;;  %7320 = vmatpush1.bf16.msra.mxu1 %v9465_v33 }
0x1229   :  { %7322 = vmatprep.subr.bf16.mxu0 %v9374_v26  ;;  %7354 = vmatprep.subr.bf16.mxu1 %v9376_v36 }
0x12de   :  { %v4707_v8 = vpop.f32.mrb[36].mxu0  ;;  %v4778_v58 = vpop.f32.mrb[36].mxu1 }
0x12df   :  { %v7669_v23 = vadd.f32 %v4707_v8, %v9519_v39  ;;  %v4709_v57 = vpop.f32.mrb[37].mxu0  ;;  %v4780_v49 = vpop.f32.mrb[37].mxu1  ;;  %v7685_v41 = vadd.f32 %v4778_v58, %v9526_v38 }
0x12e0   :  { %v7670_v2 = vadd.f32 %v4709_v57, %v9522_v56  ;;  %v7686_v48 = vadd.f32 %v4780_v49, %v9531_v47 }
0x12e1   :  { %v4787_v14 = vmul.f32 0.5, %v7669_v23 }
0x12e2   :  { %v4788_v59 = vmul.f32 0.5, %v7670_v2  ;;  %v4790_v10 = vmul.f32 0.5, %v7686_v48 }
0x12e3   :  { %7984 = vtanh.f32 %v4787_v14 }
0x12e4   :  { %7986 = vtanh.f32 %v4788_v59 }
0x12e5   :  { %7988 = vtanh.f32 %v7685_v41 }
0x12e6   :  { %7990 = vtanh.f32 %v4790_v10 }
0x12ed   :  { %v7985_v13 = vpop.eup %7984 }
0x12ee   :  { %v7987_v61 = vpop.eup %7986  ;;  %v4799_v15 = vmul.f32 0.5, %v7985_v13 }
0x12ef   :  { %v4800_v16 = vmul.f32 0.5, %v7987_v61  ;;  %v7989_v60 = vpop.eup %7988 }
0x12f0   :  { %v4803_v12 = vadd.f32 0.5, %v4799_v15  ;;  %v7991_v31 = vpop.eup %7990 }
0x12f1   :  { %v4804_v17 = vadd.f32 0.5, %v4800_v16  ;;  %v4802_v37 = vmul.f32 0.5, %v7991_v31 }
0x12f2   :  { %v4812_v20 = vmul.f32 %v7989_v60, %v4803_v12 }
0x12f3   :  { %v4811_v25 = vmul.f32 %v4804_v17, %v9576_v5  ;;  %v4806_v27 = vadd.f32 0.5, %v4802_v37 }
0x12f5   :  { %v9618_v62 = vadd.f32 %v4812_v20, %v4811_v25 }
0x12f7   :  { %7992 = vtanh.f32 %v9618_v62 }
0x1301   :  { %v7993_v9 = vpop.eup %7992 }
0x1302   :  { %v4815_v18 = vmul.f32 %v7993_v9, %v4806_v27 }
0x1304   :  { %4885 = vmatmul.mubr.f32.vlgmr.msra.gmra.mrb[38].mxu0 %v4815_v18  ;;  %4956 = vmatmul.mubr.f32.vlgmr.msra.gmra.mrb[38].mxu1 %v4815_v18 }
0x1305   :  { %7324 = vmatpush1.bf16.msra.mxu0 %v9378_v53  ;;  %7356 = vmatpush1.bf16.msra.mxu1 %v9381_v43 }
0x1306   :  { %7326 = vmatprep.subr.bf16.mxu0 %v9386_v52  ;;  %7358 = vmatprep.subr.bf16.mxu1 %v9388_v1 }
0x1307   :  { %5063 = vmatprep.mubr.f32.mxu0 %v8191_v0  ;;  %5134 = vmatprep.mubr.f32.mxu1 %v8191_v0 }
0x1309   :  { %7328 = vmatpush1.bf16.msra.mxu0 %v9390_v45  ;;  %7360 = vmatpush1.bf16.msra.mxu1 %v9393_v54 }
0x130a   :  { %7330 = vmatprep.subr.bf16.mxu0 %v9398_v19  ;;  %7362 = vmatprep.subr.bf16.mxu1 %v9400_v3 }
0x130d   :  { %7332 = vmatpush1.bf16.msra.mxu0 %v9402_v30  ;;  %7364 = vmatpush1.bf16.msra.mxu1 %v9405_v34 }
0x130e   :  { %7334 = vmatprep.subr.bf16.mxu0 %v9410_v11  ;;  %7366 = vmatprep.subr.bf16.mxu1 %v9412_v40 }
0x1311   :  { %7336 = vmatpush1.bf16.msra.mxu0 %v9414_v51  ;;  %7368 = vmatpush1.bf16.msra.mxu1 %v9417_v21 }
0x1312   :  { %7338 = vmatprep.subr.bf16.mxu0 %v9422_v50  ;;  %7370 = vmatprep.subr.bf16.mxu1 %v9424_v42 }
0x1315   :  { %7340 = vmatpush1.bf16.msra.mxu0 %v9426_v24  ;;  %7372 = vmatpush1.bf16.msra.mxu1 %v9429_v44 }
0x1316   :  { %7342 = vmatprep.subr.bf16.mxu0 %v9433_v63  ;;  %7374 = vmatprep.subr.bf16.mxu1 %v9435_v4 }
0x1319   :  { %7344 = vmatpush1.bf16.msra.mxu0 %v9438_v7  ;;  %7376 = vmatpush1.bf16.msra.mxu1 %v9442_v6 }
0x131a   :  { %7346 = vmatprep.subr.bf16.mxu0 %v9444_v55  ;;  %7378 = vmatprep.subr.bf16.mxu1 %v9446_v35 }
0x131d   :  { %7348 = vmatpush1.bf16.msra.mxu0 %v9449_v28  ;;  %7380 = vmatpush1.bf16.msra.mxu1 %v9453_v46 }
0x131e   :  { %7350 = vmatprep.subr.bf16.mxu0 %v9458_v22  ;;  %7382 = vmatprep.subr.bf16.mxu1 %v9460_v32 }
0x1321   :  { %7352 = vmatpush1.bf16.msra.mxu0 %v9462_v29  ;;  %7384 = vmatpush1.bf16.msra.mxu1 %v9465_v33 }
0x1322   :  { %7386 = vmatprep.subr.bf16.mxu0 %v9374_v26  ;;  %7418 = vmatprep.subr.bf16.mxu1 %v9376_v36 }
0x13d7   :  { %v4886_v5 = vpop.f32.mrb[38].mxu0  ;;  %v4957_v8 = vpop.f32.mrb[38].mxu1 }
0x13d8   :  { %v7671_v58 = vadd.f32 %v4886_v5, %v9519_v39  ;;  %v4888_v23 = vpop.f32.mrb[39].mxu0  ;;  %v4959_v57 = vpop.f32.mrb[39].mxu1  ;;  %v7687_v59 = vadd.f32 %v4957_v8, %v9526_v38 }
0x13d9   :  { %v7672_v49 = vadd.f32 %v4888_v23, %v9522_v56  ;;  %v7688_v41 = vadd.f32 %v4959_v57, %v9531_v47 }
0x13da   :  { %v4966_v2 = vmul.f32 0.5, %v7671_v58 }
0x13db   :  { %v4967_v14 = vmul.f32 0.5, %v7672_v49  ;;  %v4969_v48 = vmul.f32 0.5, %v7688_v41 }
0x13dc   :  { %7994 = vtanh.f32 %v4966_v2 }
0x13dd   :  { %7996 = vtanh.f32 %v4967_v14 }
0x13de   :  { %7998 = vtanh.f32 %v7687_v59 }
0x13df   :  { %8000 = vtanh.f32 %v4969_v48 }
0x13e6   :  { %v7995_v10 = vpop.eup %7994 }
0x13e7   :  { %v7997_v13 = vpop.eup %7996  ;;  %v4978_v61 = vmul.f32 0.5, %v7995_v10 }
0x13e8   :  { %v4979_v15 = vmul.f32 0.5, %v7997_v13  ;;  %v7999_v12 = vpop.eup %7998 }
0x13e9   :  { %v4982_v16 = vadd.f32 0.5, %v4978_v61  ;;  %v8001_v31 = vpop.eup %8000 }
0x13ea   :  { %v4983_v60 = vadd.f32 0.5, %v4979_v15  ;;  %v4981_v37 = vmul.f32 0.5, %v8001_v31 }
0x13eb   :  { %v4991_v17 = vmul.f32 %v7999_v12, %v4982_v16 }
0x13ec   :  { %v4990_v20 = vmul.f32 %v4983_v60, %v9618_v62  ;;  %v4985_v27 = vadd.f32 0.5, %v4981_v37 }
0x13ee   :  { %v9660_v25 = vadd.f32 %v4991_v17, %v4990_v20 }
0x13f0   :  { %8002 = vtanh.f32 %v9660_v25 }
0x13fa   :  { %v8003_v9 = vpop.eup %8002 }
0x13fb   :  { %v4994_v18 = vmul.f32 %v8003_v9, %v4985_v27 }
0x13fd   :  { %5064 = vmatmul.mubr.f32.vlgmr.msra.gmra.mrb[40].mxu0 %v4994_v18  ;;  %5135 = vmatmul.mubr.f32.vlgmr.msra.gmra.mrb[40].mxu1 %v4994_v18 }
0x13fe   :  { %7388 = vmatpush1.bf16.msra.mxu0 %v9378_v53  ;;  %7420 = vmatpush1.bf16.msra.mxu1 %v9381_v43 }
0x13ff   :  { %7390 = vmatprep.subr.bf16.mxu0 %v9386_v52  ;;  %7422 = vmatprep.subr.bf16.mxu1 %v9388_v1 }
0x1400   :  { %5242 = vmatprep.mubr.f32.mxu0 %v8191_v0  ;;  %5313 = vmatprep.mubr.f32.mxu1 %v8191_v0 }
0x1402   :  { %7392 = vmatpush1.bf16.msra.mxu0 %v9390_v45  ;;  %7424 = vmatpush1.bf16.msra.mxu1 %v9393_v54 }
0x1403   :  { %7394 = vmatprep.subr.bf16.mxu0 %v9398_v19  ;;  %7426 = vmatprep.subr.bf16.mxu1 %v9400_v3 }
0x1406   :  { %7396 = vmatpush1.bf16.msra.mxu0 %v9402_v30  ;;  %7428 = vmatpush1.bf16.msra.mxu1 %v9405_v34 }
0x1407   :  { %7398 = vmatprep.subr.bf16.mxu0 %v9410_v11  ;;  %7430 = vmatprep.subr.bf16.mxu1 %v9412_v40 }
0x140a   :  { %7400 = vmatpush1.bf16.msra.mxu0 %v9414_v51  ;;  %7432 = vmatpush1.bf16.msra.mxu1 %v9417_v21 }
0x140b   :  { %7402 = vmatprep.subr.bf16.mxu0 %v9422_v50  ;;  %7434 = vmatprep.subr.bf16.mxu1 %v9424_v42 }
0x140e   :  { %7404 = vmatpush1.bf16.msra.mxu0 %v9426_v24  ;;  %7436 = vmatpush1.bf16.msra.mxu1 %v9429_v44 }
0x140f   :  { %7406 = vmatprep.subr.bf16.mxu0 %v9433_v63  ;;  %7438 = vmatprep.subr.bf16.mxu1 %v9435_v4 }
0x1412   :  { %7408 = vmatpush1.bf16.msra.mxu0 %v9438_v7  ;;  %7440 = vmatpush1.bf16.msra.mxu1 %v9442_v6 }
0x1413   :  { %7410 = vmatprep.subr.bf16.mxu0 %v9444_v55  ;;  %7442 = vmatprep.subr.bf16.mxu1 %v9446_v35 }
0x1416   :  { %7412 = vmatpush1.bf16.msra.mxu0 %v9449_v28  ;;  %7444 = vmatpush1.bf16.msra.mxu1 %v9453_v46 }
0x1417   :  { %7414 = vmatprep.subr.bf16.mxu0 %v9458_v22  ;;  %7446 = vmatprep.subr.bf16.mxu1 %v9460_v32 }
0x141a   :  { %7416 = vmatpush1.bf16.msra.mxu0 %v9462_v29  ;;  %7448 = vmatpush1.bf16.msra.mxu1 %v9465_v33 }
0x141b   :  { %7450 = vmatprep.subr.bf16.mxu0 %v9374_v26  ;;  %7482 = vmatprep.subr.bf16.mxu1 %v9376_v36 }
0x14d0   :  { %v5065_v62 = vpop.f32.mrb[40].mxu0  ;;  %v5136_v5 = vpop.f32.mrb[40].mxu1 }
0x14d1   :  { %v7673_v8 = vadd.f32 %v5065_v62, %v9519_v39  ;;  %v5067_v58 = vpop.f32.mrb[41].mxu0  ;;  %v5138_v23 = vpop.f32.mrb[41].mxu1  ;;  %v7689_v14 = vadd.f32 %v5136_v5, %v9526_v38 }
0x14d2   :  { %v7674_v57 = vadd.f32 %v5067_v58, %v9522_v56  ;;  %v7690_v59 = vadd.f32 %v5138_v23, %v9531_v47 }
0x14d3   :  { %v5145_v49 = vmul.f32 0.5, %v7673_v8 }
0x14d4   :  { %v5146_v2 = vmul.f32 0.5, %v7674_v57  ;;  %v5148_v41 = vmul.f32 0.5, %v7690_v59 }
0x14d5   :  { %8004 = vtanh.f32 %v5145_v49 }
0x14d6   :  { %8006 = vtanh.f32 %v5146_v2 }
0x14d7   :  { %8008 = vtanh.f32 %v7689_v14 }
0x14d8   :  { %8010 = vtanh.f32 %v5148_v41 }
0x14df   :  { %v8005_v48 = vpop.eup %8004 }
0x14e0   :  { %v8007_v10 = vpop.eup %8006  ;;  %v5157_v13 = vmul.f32 0.5, %v8005_v48 }
0x14e1   :  { %v5158_v61 = vmul.f32 0.5, %v8007_v10  ;;  %v8009_v16 = vpop.eup %8008 }
0x14e2   :  { %v5161_v15 = vadd.f32 0.5, %v5157_v13  ;;  %v8011_v31 = vpop.eup %8010 }
0x14e3   :  { %v5162_v12 = vadd.f32 0.5, %v5158_v61  ;;  %v5160_v37 = vmul.f32 0.5, %v8011_v31 }
0x14e4   :  { %v5170_v60 = vmul.f32 %v8009_v16, %v5161_v15 }
0x14e5   :  { %v5169_v17 = vmul.f32 %v5162_v12, %v9660_v25  ;;  %v5164_v27 = vadd.f32 0.5, %v5160_v37 }
0x14e7   :  { %v9702_v20 = vadd.f32 %v5170_v60, %v5169_v17 }
0x14e9   :  { %8012 = vtanh.f32 %v9702_v20 }
0x14f3   :  { %v8013_v9 = vpop.eup %8012 }
0x14f4   :  { %v5173_v18 = vmul.f32 %v8013_v9, %v5164_v27  ;;  %v5720_v9 = vld [vmem:[%s9866_s10 + $0x18] sm:$0xff] }
0x14f6   :  { %5243 = vmatmul.mubr.f32.vlgmr.msra.gmra.mrb[42].mxu0 %v5173_v18  ;;  %5314 = vmatmul.mubr.f32.vlgmr.msra.gmra.mrb[42].mxu1 %v5173_v18 }
0x14f7   :  { %7452 = vmatpush1.bf16.msra.mxu0 %v9378_v53  ;;  %7484 = vmatpush1.bf16.msra.mxu1 %v9381_v43 }
0x14f8   :  { %7454 = vmatprep.subr.bf16.mxu0 %v9386_v52  ;;  %7486 = vmatprep.subr.bf16.mxu1 %v9388_v1 }
0x14f9   :  { %5421 = vmatprep.mubr.f32.mxu0 %v8191_v0  ;;  %5492 = vmatprep.mubr.f32.mxu1 %v8191_v0 }
0x14fb   :  { %7456 = vmatpush1.bf16.msra.mxu0 %v9390_v45  ;;  %7488 = vmatpush1.bf16.msra.mxu1 %v9393_v54 }
0x14fc   :  { %7458 = vmatprep.subr.bf16.mxu0 %v9398_v19  ;;  %7490 = vmatprep.subr.bf16.mxu1 %v9400_v3 }
0x14ff   :  { %7460 = vmatpush1.bf16.msra.mxu0 %v9402_v30  ;;  %7492 = vmatpush1.bf16.msra.mxu1 %v9405_v34 }
0x1500   :  { %7462 = vmatprep.subr.bf16.mxu0 %v9410_v11  ;;  %7494 = vmatprep.subr.bf16.mxu1 %v9412_v40 }
0x1503   :  { %7464 = vmatpush1.bf16.msra.mxu0 %v9414_v51  ;;  %7496 = vmatpush1.bf16.msra.mxu1 %v9417_v21 }
0x1504   :  { %7466 = vmatprep.subr.bf16.mxu0 %v9422_v50  ;;  %7498 = vmatprep.subr.bf16.mxu1 %v9424_v42 }
0x1507   :  { %7468 = vmatpush1.bf16.msra.mxu0 %v9426_v24  ;;  %7500 = vmatpush1.bf16.msra.mxu1 %v9429_v44 }
0x1508   :  { %7470 = vmatprep.subr.bf16.mxu0 %v9433_v63  ;;  %7502 = vmatprep.subr.bf16.mxu1 %v9435_v4 }
0x150b   :  { %7472 = vmatpush1.bf16.msra.mxu0 %v9438_v7  ;;  %7504 = vmatpush1.bf16.msra.mxu1 %v9442_v6 }
0x150c   :  { %7474 = vmatprep.subr.bf16.mxu0 %v9444_v55  ;;  %7506 = vmatprep.subr.bf16.mxu1 %v9446_v35 }
0x150f   :  { %7476 = vmatpush1.bf16.msra.mxu0 %v9449_v28  ;;  %7508 = vmatpush1.bf16.msra.mxu1 %v9453_v46 }
0x1510   :  { %7478 = vmatprep.subr.bf16.mxu0 %v9458_v22  ;;  %7510 = vmatprep.subr.bf16.mxu1 %v9460_v32 }
0x1513   :  { %7480 = vmatpush1.bf16.msra.mxu0 %v9462_v29  ;;  %7512 = vmatpush1.bf16.msra.mxu1 %v9465_v33 }
0x1514   :  { %7514 = vmatprep.subr.bf16.mxu0 %v9374_v26  ;;  %7546 = vmatprep.subr.bf16.mxu1 %v9376_v36 }
0x15c9   :  { %v5244_v25 = vpop.f32.mrb[42].mxu0  ;;  %v5315_v62 = vpop.f32.mrb[42].mxu1 }
0x15ca   :  { %v7675_v5 = vadd.f32 %v5244_v25, %v9519_v39  ;;  %v5246_v8 = vpop.f32.mrb[43].mxu0  ;;  %v5317_v58 = vpop.f32.mrb[43].mxu1  ;;  %v7691_v2 = vadd.f32 %v5315_v62, %v9526_v38  ;;  %v5721_v25 = vld [vmem:[%s9866_s10 + $0x20] sm:$0xff]  ;;  %v5722_v62 = vld [vmem:[%s9866_s10 + $0x28] sm:$0xff] }
0x15cb   :  { %v7676_v23 = vadd.f32 %v5246_v8, %v9522_v56  ;;  %v7692_v14 = vadd.f32 %v5317_v58, %v9531_v47  ;;  %v5723_v8 = vld [vmem:[%s9866_s10 + $0x30] sm:$0xff]  ;;  %v5724_v58 = vld [vmem:[%s9866_s10 + $0x38] sm:$0xff] }
0x15cc   :  { %v5324_v57 = vmul.f32 0.5, %v7675_v5  ;;  %v7584_v5 = vpack.c.bf16 %v5722_v62, %v5721_v25 }
0x15cd   :  { %v5325_v49 = vmul.f32 0.5, %v7676_v23  ;;  %v5327_v26 = vmul.f32 0.5, %v7692_v14  ;;  %v7587_v23 = vpack.c.bf16 %v5724_v58, %v5723_v8  ;;  %v5727_v14 = vld [vmem:[%s9866_s10 + $0x50] sm:$0xff] }
0x15ce   :  { %8014 = vtanh.f32 %v5324_v57  ;;  %v5725_v57 = vld [vmem:[%s9866_s10 + $0x40] sm:$0xff] }
0x15cf   :  { %8016 = vtanh.f32 %v5325_v49  ;;  %v5726_v49 = vld [vmem:[%s9866_s10 + $0x48] sm:$0xff] }
0x15d0   :  { %8018 = vtanh.f32 %v7691_v2  ;;  %v7590_v2 = vpack.c.bf16 %v5726_v49, %v5725_v57 }
0x15d1   :  { %8020 = vtanh.f32 %v5327_v26  ;;  %v5728_v26 = vld [vmem:[%s9866_s10 + $0x58] sm:$0xff] }
0x15d8   :  { %v8015_v59 = vpop.eup %8014 }
0x15d9   :  { %v8017_v36 = vpop.eup %8016  ;;  %v5336_v41 = vmul.f32 0.5, %v8015_v59  ;;  %v7593_v59 = vpack.c.bf16 %v5728_v26, %v5727_v14 }
0x15da   :  { %v5337_v48 = vmul.f32 0.5, %v8017_v36  ;;  %v8019_v13 = vpop.eup %8018  ;;  %v5729_v36 = vld [vmem:[%s9866_s10 + $0x60] sm:$0xff] }
0x15db   :  { %v5340_v10 = vadd.f32 0.5, %v5336_v41  ;;  %v8021_v60 = vpop.eup %8020  ;;  %v5730_v41 = vld [vmem:[%s9866_s10 + $0x68] sm:$0xff] }
0x15dc   :  { %v5341_v61 = vadd.f32 0.5, %v5337_v48  ;;  %v5339_v17 = vmul.f32 0.5, %v8021_v60  ;;  %v7596_v48 = vpack.c.bf16 %v5730_v41, %v5729_v36 }
0x15dd   :  { %v5349_v15 = vmul.f32 %v8019_v13, %v5340_v10  ;;  %v5731_v10 = vld [vmem:[%s9866_s10 + $0x70] sm:$0xff]  ;;  %v5732_v13 = vld [vmem:[%s9866_s10 + $0x78] sm:$0xff] }
0x15de   :  { %v5348_v16 = vmul.f32 %v5341_v61, %v9702_v20  ;;  %v5343_v31 = vadd.f32 0.5, %v5339_v17  ;;  %v5719_v20 = vld [vmem:[%s9866_s10 + $0x10] sm:$0xff]  ;;  %v7599_v61 = vpack.c.bf16 %v5732_v13, %v5731_v10 }
0x15df   :  { %v7581_v18 = vpack.c.bf16 %v5720_v9, %v5719_v20 }
0x15e0   :  { %v9744_v12 = vadd.f32 %v5349_v15, %v5348_v16 }
0x15e2   :  { %8022 = vtanh.f32 %v9744_v12 }
0x15ec   :  { %v8023_v37 = vpop.eup %8022 }
0x15ed   :  { %v5352_v27 = vmul.f32 %v8023_v37, %v5343_v31 }
0x15ef   :  { %5422 = vmatmul.mubr.f32.vlgmr.msra.gmra.mrb[44].mxu0 %v5352_v27  ;;  %5493 = vmatmul.mubr.f32.vlgmr.msra.gmra.mrb[44].mxu1 %v5352_v27 }
0x15f0   :  { %7516 = vmatpush1.bf16.msra.mxu0 %v9378_v53  ;;  %7548 = vmatpush1.bf16.msra.mxu1 %v9381_v43 }
0x15f1   :  { %7518 = vmatprep.subr.bf16.mxu0 %v9386_v52  ;;  %7550 = vmatprep.subr.bf16.mxu1 %v9388_v1 }
0x15f2   :  { %5600 = vmatprep.mubr.f32.mxu0 %v8191_v0  ;;  %5671 = vmatprep.mubr.f32.mxu1 %v8191_v0 }
0x15f4   :  { %7520 = vmatpush1.bf16.msra.mxu0 %v9390_v45  ;;  %7552 = vmatpush1.bf16.msra.mxu1 %v9393_v54 }
0x15f5   :  { %7522 = vmatprep.subr.bf16.mxu0 %v9398_v19  ;;  %7554 = vmatprep.subr.bf16.mxu1 %v9400_v3 }
0x15f8   :  { %7524 = vmatpush1.bf16.msra.mxu0 %v9402_v30  ;;  %7556 = vmatpush1.bf16.msra.mxu1 %v9405_v34 }
0x15f9   :  { %7526 = vmatprep.subr.bf16.mxu0 %v9410_v11  ;;  %7558 = vmatprep.subr.bf16.mxu1 %v9412_v40 }
0x15fc   :  { %7528 = vmatpush1.bf16.msra.mxu0 %v9414_v51  ;;  %7560 = vmatpush1.bf16.msra.mxu1 %v9417_v21 }
0x15fd   :  { %7530 = vmatprep.subr.bf16.mxu0 %v9422_v50  ;;  %7562 = vmatprep.subr.bf16.mxu1 %v9424_v42 }
0x1600   :  { %7532 = vmatpush1.bf16.msra.mxu0 %v9426_v24  ;;  %7564 = vmatpush1.bf16.msra.mxu1 %v9429_v44 }
0x1601   :  { %7534 = vmatprep.subr.bf16.mxu0 %v9433_v63  ;;  %7566 = vmatprep.subr.bf16.mxu1 %v9435_v4 }
0x1604   :  { %7536 = vmatpush1.bf16.msra.mxu0 %v9438_v7  ;;  %7568 = vmatpush1.bf16.msra.mxu1 %v9442_v6 }
0x1605   :  { %7538 = vmatprep.subr.bf16.mxu0 %v9444_v55  ;;  %7570 = vmatprep.subr.bf16.mxu1 %v9446_v35 }
0x1608   :  { %7540 = vmatpush1.bf16.msra.mxu0 %v9449_v28  ;;  %7572 = vmatpush1.bf16.msra.mxu1 %v9453_v46 }
0x1609   :  { %7542 = vmatprep.subr.bf16.mxu0 %v9458_v22  ;;  %7574 = vmatprep.subr.bf16.mxu1 %v9460_v32  ;;  %v5717_v22 = vld [vmem:[%s9866_s10] sm:$0xff]  ;;  %v5718_v32 = vld [vmem:[%s9866_s10 + $0x8] sm:$0xff] }
0x160c   :  { %7544 = vmatpush1.bf16.msra.mxu0 %v9462_v29  ;;  %7576 = vmatpush1.bf16.msra.mxu1 %v9465_v33  ;;  %v7578_v29 = vpack.c.bf16 %v5718_v32, %v5717_v22  ;;  %v8192_v33 = vmov 0.0|0.0  }
0x160d   :  { %7577 = vmatprep.subr.bf16.mxu0 %v8192_v33 }
0x16c2   :  { %v5423_v53 = vpop.f32.mrb[44].mxu0  ;;  %v5494_v43 = vpop.f32.mrb[44].mxu1 }
0x16c3   :  { %v7677_v52 = vadd.f32 %v5423_v53, %v9519_v39  ;;  %v5425_v1 = vpop.f32.mrb[45].mxu0  ;;  %v5496_v45 = vpop.f32.mrb[45].mxu1  ;;  %v7693_v30 = vadd.f32 %v5494_v43, %v9526_v38 }
0x16c4   :  { %v7678_v54 = vadd.f32 %v5425_v1, %v9522_v56  ;;  %v7694_v34 = vadd.f32 %v5496_v45, %v9531_v47 }
0x16c5   :  { %v5503_v19 = vmul.f32 0.5, %v7677_v52 }
0x16c6   :  { %v5504_v3 = vmul.f32 0.5, %v7678_v54  ;;  %v5506_v11 = vmul.f32 0.5, %v7694_v34 }
0x16c7   :  { %8024 = vtanh.f32 %v5503_v19 }
0x16c8   :  { %8026 = vtanh.f32 %v5504_v3 }
0x16c9   :  { %8028 = vtanh.f32 %v7693_v30 }
0x16ca   :  { %8030 = vtanh.f32 %v5506_v11 }
0x16d1   :  { %v8025_v40 = vpop.eup %8024 }
0x16d2   :  { %v8027_v51 = vpop.eup %8026  ;;  %v5515_v21 = vmul.f32 0.5, %v8025_v40 }
0x16d3   :  { %v5516_v50 = vmul.f32 0.5, %v8027_v51  ;;  %v8029_v24 = vpop.eup %8028 }
0x16d4   :  { %v5519_v42 = vadd.f32 0.5, %v5515_v21  ;;  %v8031_v6 = vpop.eup %8030 }
0x16d5   :  { %v5520_v44 = vadd.f32 0.5, %v5516_v50  ;;  %v5518_v55 = vmul.f32 0.5, %v8031_v6 }
0x16d6   :  { %v5528_v63 = vmul.f32 %v8029_v24, %v5519_v42 }
0x16d7   :  { %v5527_v4 = vmul.f32 %v5520_v44, %v9744_v12  ;;  %v5522_v35 = vadd.f32 0.5, %v5518_v55 }
0x16d9   :  { %v9784_v7 = vadd.f32 %v5528_v63, %v5527_v4 }
0x16db   :  { %8032 = vtanh.f32 %v9784_v7 }
0x16e5   :  { %v8033_v28 = vpop.eup %8032 }
0x16e6   :  { %v5531_v46 = vmul.f32 %v8033_v28, %v5522_v35 }
0x16e8   :  { %5601 = vmatmul.mubr.f32.vlgmr.msra.gmra.mrb[46].mxu0 %v5531_v46  ;;  %5672 = vmatmul.mubr.f32.vlgmr.msra.gmra.mrb[46].mxu1 %v5531_v46 }
0x16e9   :  { %7579 = vmatpush3.bf16.msra.mxu0 %v7578_v29  ;;  %5902 = vmatprep.mubr.msk.f32.mxu0 %vm8193_vm1, %v8191_v0 }
0x16ea   :  { %7580 = vmatprep.subr.bf16.mxu0 %v8192_v33 }
0x16ed   :  { %7582 = vmatpush3.bf16.msra.mxu0 %v7581_v18 }
0x16ee   :  { %7583 = vmatprep.subr.bf16.mxu0 %v8192_v33 }
0x16f1   :  { %7585 = vmatpush3.bf16.msra.mxu0 %v7584_v5 }
0x16f2   :  { %7586 = vmatprep.subr.bf16.mxu0 %v8192_v33 }
0x16f5   :  { %7588 = vmatpush3.bf16.msra.mxu0 %v7587_v23 }
0x16f6   :  { %7589 = vmatprep.subr.bf16.mxu0 %v8192_v33 }
0x16f9   :  { %7591 = vmatpush3.bf16.msra.mxu0 %v7590_v2 }
0x16fa   :  { %7592 = vmatprep.subr.bf16.mxu0 %v8192_v33 }
0x16fd   :  { %7594 = vmatpush3.bf16.msra.mxu0 %v7593_v59 }
0x16fe   :  { %7595 = vmatprep.subr.bf16.mxu0 %v8192_v33 }
0x1701   :  { %7597 = vmatpush3.bf16.msra.mxu0 %v7596_v48 }
0x1702   :  { %7598 = vmatprep.subr.bf16.mxu0 %v8192_v33 }
0x1705   :  { %7600 = vmatpush3.bf16.msra.mxu0 %v7599_v61 }
0x17bb   :  { %v5602_v15 = vpop.f32.mrb[46].mxu0  ;;  %v5673_v16 = vpop.f32.mrb[46].mxu1 }
0x17bc   :  { %v7679_v12 = vadd.f32 %v5602_v15, %v9519_v39  ;;  %v5604_v60 = vpop.f32.mrb[47].mxu0  ;;  %v5675_v17 = vpop.f32.mrb[47].mxu1  ;;  %v7695_v53 = vadd.f32 %v5673_v16, %v9526_v38 }
0x17bd   :  { %v7680_v31 = vadd.f32 %v5604_v60, %v9522_v56  ;;  %v7696_v43 = vadd.f32 %v5675_v17, %v9531_v47  ;;  %v5852_v47 = vld [vmem:[%s9867_s11] ss:$0 sm:$0xff] }
0x17be   :  { %v5682_v37 = vmul.f32 0.5, %v7679_v12 }
0x17bf   :  { %v5683_v27 = vmul.f32 0.5, %v7680_v31  ;;  %v5685_v52 = vmul.f32 0.5, %v7696_v43 }
0x17c0   :  { %8034 = vtanh.f32 %v5682_v37 }
0x17c1   :  { %8036 = vtanh.f32 %v5683_v27 }
0x17c2   :  { %8038 = vtanh.f32 %v7695_v53 }
0x17c3   :  { %8040 = vtanh.f32 %v5685_v52 }
0x17ca   :  { %v8035_v1 = vpop.eup %8034 }
0x17cb   :  { %v8037_v0 = vpop.eup %8036  ;;  %v5694_v45 = vmul.f32 0.5, %v8035_v1 }
0x17cc   :  { %v5695_v54 = vmul.f32 0.5, %v8037_v0  ;;  %v8039_v19 = vpop.eup %8038 }
0x17cd   :  { %v5698_v39 = vadd.f32 0.5, %v5694_v45  ;;  %v8041_v11 = vpop.eup %8040 }
0x17ce   :  { %v5699_v3 = vadd.f32 0.5, %v5695_v54  ;;  %v5697_v38 = vmul.f32 0.5, %v8041_v11 }
0x17cf   :  { %v5707_v30 = vmul.f32 %v8039_v19, %v5698_v39 }
0x17d0   :  { %v5706_v56 = vmul.f32 %v5699_v3, %v9784_v7  ;;  %v5701_v40 = vadd.f32 0.5, %v5697_v38 }
0x17d2   :  { %v5708_v34 = vadd.f32 %v5707_v30, %v5706_v56 }
0x17d4   :  { %8042 = vtanh.f32 %v5708_v34 }
0x17de   :  { %v8043_v51 = vpop.eup %8042 }
0x17df   :  { %v5710_v21 = vmul.f32 %v8043_v51, %v5701_v40 }
0x17e1   :  { %5903 = vmatmul.mubr.f32.vlgmr.msra.gmra.mrb[48].mxu0 %v5710_v21 }
0x18b4   :  { %v5806_v50 = vpop.f32.mrb[48].mxu0 }
0x18b5   :  { %v5807_v42 = vadd.f32 %v5852_v47, %v5806_v50  ;;  %v5904_v24 = vpop.f32.mrb[49].mxu0 }
0x18b7   :  { %5811 = vst.msk [vmem:[#allocation15] sm:$0xff] %vm5810_vm2, %v5807_v42 }
0x18b8   :  { %8165 = shalt.err (!%p8162_p2)
}
0x18b9   :  { %s8166_s27 = scalar_lea.hbm %s9868_s12, 128 }
0x18ba   :  { %p8167_p3 = scmp.ne.s32.totalorder %s9868_s12, %s8166_s27  ;;  %p8170_p4 = scmp.lt.u32.totalorder %s8166_s27, %s9868_s12 }
0x18bc   :  { %p8172_p5 = pnand %p8170_p4, %p8167_p3 }
0x18be   :  { %8175 = shalt.err (!%p8172_p5)
}
0x18bf   :  { %5821 = dma.vmem_to_hbm [thread:$0]  %s5819_s7, 128, %s9868_s12, [#allocation8]  }
0x18c0   :  { %8182 = dma.done.wait [#allocation8], 128  }
0x18c1   :  { %8183 = vsyncadd [#allocation8], 4294967168 }
0x18c2   :  { %5825 = vsyncpa [#allocation7], 1 }
0x18c3   :  { %5826 = vsyncpa [#allocation10], 1 }
0x18c4   :  { %5827 = vsyncpa [#allocation13], 1 }
0x18c5   :  { %5828 = vsyncpa [#allocation8], 1 }

</bundles_post_ra>
